<compile_context>
chip_gen: v6e
topology: v6e:2x2x1
jax: 0.10.0
libtpu: 0.0.40
codegen_flags: <defaults>
</compile_context>

<pallas_src>
import jax
import jax.numpy as jnp
from jax.experimental import pallas as pl
from jax.experimental.pallas import tpu as pltpu

_EPS = 1e-5


# ----------------------------------------------------------------------------
# Kernel 1: conv-as-matmul, fused  out = relu( X @ W + shift )
#   (BN scale already folded into W columns).  All operands are tiny, so each
#   is a single VMEM-resident block with no grid (single-buffered).
# ----------------------------------------------------------------------------
def _conv_matmul_kernel(x_ref, w_ref, shift_ref, o_ref):
    acc = jnp.dot(x_ref[...].astype(jnp.bfloat16), w_ref[...],
                  preferred_element_type=jnp.float32)
    o_ref[...] = jnp.maximum(acc + shift_ref[...], 0.0).astype(o_ref.dtype)


def conv_matmul(x, w_bf16, shift):
    """x: (M, K) f32, w: (K, N) bf16, shift: (1, N) f32 -> (M, N) f32."""
    M, K = x.shape
    K2, N = w_bf16.shape
    assert K == K2
    vmem = pl.BlockSpec(memory_space=pltpu.MemorySpace.VMEM)
    return pl.pallas_call(
        _conv_matmul_kernel,
        out_shape=jax.ShapeDtypeStruct((M, N), jnp.float32),
        in_specs=[vmem, vmem, vmem],
        out_specs=vmem,
    )(x, w_bf16, shift)


# ----------------------------------------------------------------------------
# Kernel 2: fused head — cnn_h (Linear+BN+ReLU) + fc_pi in one kernel.
#   K-tiled over the 6400-wide contraction so the bf16 weight streams in
#   ~1.3 MB chunks (double-buffered, overlaps MXU); h stays in a VMEM scratch.
# ----------------------------------------------------------------------------
def _head_kernel(x_ref, wh_ref, shift_h_ref, wpi_ref, bpi_ref, pi_ref, acc_ref):
    k = pl.program_id(0)

    @pl.when(k == 0)
    def _():
        acc_ref[...] = jnp.zeros_like(acc_ref)

    acc_ref[...] += jnp.dot(x_ref[...].astype(jnp.bfloat16), wh_ref[...],
                            preferred_element_type=jnp.float32)

    @pl.when(k == pl.num_programs(0) - 1)
    def _():
        h = jnp.maximum(acc_ref[...] + shift_h_ref[...], 0.0)     # cnn_h BN+ReLU
        pi = jnp.dot(h.astype(jnp.bfloat16), wpi_ref[...],
                     preferred_element_type=jnp.float32) + bpi_ref[...]
        pi_ref[...] = pi.astype(pi_ref.dtype)


def head_matmul(flat, wh_bf16, shift_h, wpi_bf16, bpi, *, tk=1280):
    B, K = flat.shape
    K2, H = wh_bf16.shape
    H2, N = wpi_bf16.shape
    assert K == K2 and H == H2 and K % tk == 0
    return pl.pallas_call(
        _head_kernel,
        out_shape=jax.ShapeDtypeStruct((B, N), jnp.float32),
        grid_spec=pltpu.PrefetchScalarGridSpec(
            num_scalar_prefetch=0,
            grid=(K // tk,),
            in_specs=[
                pl.BlockSpec((B, tk), lambda k: (0, k)),   # activation K-slice
                pl.BlockSpec((tk, H), lambda k: (k, 0)),   # wh K-slice (bf16)
                pl.BlockSpec((1, H), lambda k: (0, 0)),    # folded BN shift
                pl.BlockSpec((H, N), lambda k: (0, 0)),    # wpi (bf16)
                pl.BlockSpec((1, N), lambda k: (0, 0)),    # bpi
            ],
            out_specs=pl.BlockSpec((B, N), lambda k: (0, 0)),
            scratch_shapes=[pltpu.VMEM((B, H), jnp.float32)],
        ),
        compiler_params=pltpu.CompilerParams(
            dimension_semantics=("arbitrary",)),
    )(flat, wh_bf16, shift_h, wpi_bf16, bpi)


# ----------------------------------------------------------------------------
# Plain-JAX glue: NHWC im2col (strided slices; channels stay lane-minor)
# ----------------------------------------------------------------------------
def im2col_nhwc(x, kh, kw, stride, pad):
    """x: (B, H, W, C) -> ((B*OH*OW, kh*kw*C), OH, OW), feature order (kh, kw, C)."""
    B, H, W, C = x.shape
    xp = jnp.pad(x, ((0, 0), (pad, pad), (pad, pad), (0, 0)))
    OH = (H + 2 * pad - kh) // stride + 1
    OW = (W + 2 * pad - kw) // stride + 1
    cols = [xp[:, i:i + stride * OH:stride, j:j + stride * OW:stride, :]
            for i in range(kh) for j in range(kw)]
    col = jnp.stack(cols, axis=3)                      # (B, OH, OW, kh*kw, C)
    return col.reshape(B * OH * OW, kh * kw * C), OH, OW


# ----------------------------------------------------------------------------
# Parameters: raw (PyTorch-shaped) build + one-time inference preparation
# ----------------------------------------------------------------------------
def make_params(key, history_length):
    def nrm(k, shape, std=0.05):
        return std * jax.random.normal(k, shape, dtype=jnp.float32)

    keys = jax.random.split(key, 24)
    ki = iter(keys)
    p = {}

    def bn(c):
        return dict(
            gamma=1.0 + nrm(next(ki), (c,)),
            beta=nrm(next(ki), (c,)),
            mean=nrm(next(ki), (c,)),
            var=jnp.abs(nrm(next(ki), (c,))) + 0.5,
        )

    # cnn_conv1: Conv2d(history, 32, k=8, s=4, p=2), bias zeroed; BN(32)
    p["w1"] = nrm(next(ki), (32, history_length, 8, 8))
    p["b1"] = jnp.zeros((32,), jnp.float32)
    p["bn1"] = bn(32)
    # cnn_conv2: Conv2d(32, 64, k=4, s=2, p=1), bias zeroed; BN(64)
    p["w2"] = nrm(next(ki), (64, 32, 4, 4))
    p["b2"] = jnp.zeros((64,), jnp.float32)
    p["bn2"] = bn(64)
    # cnn_conv3: Conv2d(64, 64, k=3, s=1, p=1), bias zeroed; BN(64)
    p["w3"] = nrm(next(ki), (64, 64, 3, 3))
    p["b3"] = jnp.zeros((64,), jnp.float32)
    p["bn3"] = bn(64)
    # cnn_h: Linear(10*10*64, 512) + BN1d(512)
    p["wh"] = nrm(next(ki), (512, 10 * 10 * 64), std=0.01)
    p["bh"] = nrm(next(ki), (512,))
    p["bnh"] = bn(512)
    # fc_pi: Linear(512, 18)
    p["wpi"] = nrm(next(ki), (18, 512))
    p["bpi"] = nrm(next(ki), (18,))
    return p


def _bn_scale_shift(bn, bias):
    scale = bn["gamma"] / jnp.sqrt(bn["var"] + _EPS)
    shift = (bias - bn["mean"]) * scale + bn["beta"]
    return scale, shift


def prepare_params(p):
    """One-time (outside jit) weight prep: NHWC im2col layout, BN-scale folding
    into weight columns, bf16 weight cast."""
    out = {}

    def conv(w, b, bn):
        cout, cin, kh, kw = w.shape
        scale, shift = _bn_scale_shift(bn, b)
        # feature order matches im2col_nhwc: (kh, kw, cin), channels minor.
        w2d = w.transpose(2, 3, 1, 0).reshape(kh * kw * cin, cout) * scale[None, :]
        return w2d.astype(jnp.bfloat16), shift[None, :].astype(jnp.float32)

    out["w1"], out["shift1"] = conv(p["w1"], p["b1"], p["bn1"])
    out["w2"], out["shift2"] = conv(p["w2"], p["b2"], p["bn2"])
    out["w3"], out["shift3"] = conv(p["w3"], p["b3"], p["bn3"])

    # cnn_h: PyTorch flattens NCHW (c,h,w); our activations flatten NHWC (h,w,c)
    # -> permute the K axis of wh once here, and fold the BN scale into columns.
    scale_h, shift_h = _bn_scale_shift(p["bnh"], p["bh"])
    wh = p["wh"].reshape(512, 64, 10, 10).transpose(2, 3, 1, 0).reshape(6400, 512)
    out["wh"] = (wh * scale_h[None, :]).astype(jnp.bfloat16)
    out["shift_h"] = shift_h[None, :].astype(jnp.float32)

    out["wpi"] = p["wpi"].T.astype(jnp.bfloat16)          # (512, 18), pre-transposed
    out["bpi"] = p["bpi"][None, :].astype(jnp.float32)
    return out


# ----------------------------------------------------------------------------
# DPiN forward (eval semantics)
# ----------------------------------------------------------------------------
def conv_bn_relu_nhwc(x_nhwc, w2d, shift, kh, kw, stride, pad):
    B = x_nhwc.shape[0]
    cout = w2d.shape[1]
    cols, OH, OW = im2col_nhwc(x_nhwc, kh, kw, stride, pad)   # (B*OH*OW, kh*kw*Cin)
    out = conv_matmul(cols, w2d, shift)                        # (B*OH*OW, Cout)
    return out.reshape(B, OH, OW, cout)                        # stays NHWC


def dpin_forward(prep, s_nchw):
    # Dropout(0.25) layers: identity in eval mode.
    x = s_nchw.transpose(0, 2, 3, 1)                           # NCHW -> NHWC once
    x = conv_bn_relu_nhwc(x, prep["w1"], prep["shift1"], 8, 8, 4, 2)
    x = conv_bn_relu_nhwc(x, prep["w2"], prep["shift2"], 4, 4, 2, 1)
    x = conv_bn_relu_nhwc(x, prep["w3"], prep["shift3"], 3, 3, 1, 1)
    phi = x.transpose(0, 3, 1, 2)                              # detach(): same values, NCHW
    flat = x.reshape(x.shape[0], -1)                           # NHWC flatten (h,w,c)
    pi = head_matmul(flat, prep["wh"], prep["shift_h"],
                     prep["wpi"], prep["bpi"])                 # fused cnn_h + fc_pi
    return pi, phi


if __name__ == "__main__":
    # Spatial size 80x80 is implied by the Linear(10*10*64, 512) flatten.
    B, HIST, H, W = 2, 4, 80, 80
    key = jax.random.PRNGKey(0)
    k_param, k_x = jax.random.split(key)
    raw = make_params(k_param, HIST)
    prep = prepare_params(raw)                                  # outside jit
    s = jax.random.normal(k_x, (B, HIST, H, W), dtype=jnp.float32)

    pi, phi = jax.jit(dpin_forward)(prep, s)
    jax.block_until_ready((pi, phi))

    assert pi.shape == (B, 18), pi.shape
    assert phi.shape == (B, 64, 10, 10), phi.shape
    assert bool(jnp.all(jnp.isfinite(pi))) and bool(jnp.all(jnp.isfinite(phi)))
    print("KERNEL_OK")
</pallas_src>

<mosaic_0001>
module attributes {stable_mosaic.version = 11 : i64} {
  func.func @_conv_matmul_kernel(%arg0: memref<800x256xf32, #tpu.memory_space<vmem>>, %arg1: memref<256x32xbf16, #tpu.memory_space<vmem>>, %arg2: memref<1x32xf32, #tpu.memory_space<vmem>>, %arg3: memref<800x32xf32, #tpu.memory_space<vmem>>) attributes {dimension_semantics = [], scalar_prefetch = 0 : i64, scratch_operands = 0 : i64, tpu.core_type = #tpu.core_type<tc>} {
    %c0 = arith.constant 0 : index
    %c0_0 = arith.constant 0 : index
    %0 = vector.load %arg0[%c0, %c0_0] : memref<800x256xf32, #tpu.memory_space<vmem>>, vector<800x256xf32>
    %1 = arith.truncf %0 : vector<800x256xf32> to vector<800x256xbf16>
    %c0_1 = arith.constant 0 : index
    %c0_2 = arith.constant 0 : index
    %2 = vector.load %arg1[%c0_1, %c0_2] : memref<256x32xbf16, #tpu.memory_space<vmem>>, vector<256x32xbf16>
    %cst = arith.constant dense<0.000000e+00> : vector<800x32xf32>
    %3 = tpu.matmul %1, %2, %cst {dimension_numbers = #tpu.dot_dimension_numbers<[1], [0], [0], [1], [0, 0, 1, 1], [], []>} : vector<800x256xbf16>, vector<256x32xbf16>, vector<800x32xf32> -> vector<800x32xf32>
    %c0_3 = arith.constant 0 : index
    %c0_4 = arith.constant 0 : index
    %4 = vector.load %arg2[%c0_3, %c0_4] : memref<1x32xf32, #tpu.memory_space<vmem>>, vector<1x32xf32>
    %5 = vector.broadcast %4 : vector<1x32xf32> to vector<800x32xf32>
    %6 = arith.addf %3, %5 : vector<800x32xf32>
    %cst_5 = arith.constant 0.000000e+00 : f32
    %7 = vector.broadcast %cst_5 : f32 to vector<800x32xf32>
    %8 = arith.maximumf %6, %7 : vector<800x32xf32>
    %c0_6 = arith.constant 0 : index
    %c0_7 = arith.constant 0 : index
    %9 = vector.load %arg3[%c0_6, %c0_7] : memref<800x32xf32, #tpu.memory_space<vmem>>, vector<800x32xf32>
    tpu.vector_store %arg3[%c0_6, %c0_7], %8 {strides = array<i32>} : memref<800x32xf32, #tpu.memory_space<vmem>>, vector<800x32xf32>,
    return
  }
}

module attributes {stable_mosaic.version = 11 : i64} {
  func.func @_conv_matmul_kernel(%arg0: memref<200x512xf32, #tpu.memory_space<vmem>>, %arg1: memref<512x64xbf16, #tpu.memory_space<vmem>>, %arg2: memref<1x64xf32, #tpu.memory_space<vmem>>, %arg3: memref<200x64xf32, #tpu.memory_space<vmem>>) attributes {dimension_semantics = [], scalar_prefetch = 0 : i64, scratch_operands = 0 : i64, tpu.core_type = #tpu.core_type<tc>} {
    %c0 = arith.constant 0 : index
    %c0_0 = arith.constant 0 : index
    %0 = vector.load %arg0[%c0, %c0_0] : memref<200x512xf32, #tpu.memory_space<vmem>>, vector<200x512xf32>
    %1 = arith.truncf %0 : vector<200x512xf32> to vector<200x512xbf16>
    %c0_1 = arith.constant 0 : index
    %c0_2 = arith.constant 0 : index
    %2 = vector.load %arg1[%c0_1, %c0_2] : memref<512x64xbf16, #tpu.memory_space<vmem>>, vector<512x64xbf16>
    %cst = arith.constant dense<0.000000e+00> : vector<200x64xf32>
    %3 = tpu.matmul %1, %2, %cst {dimension_numbers = #tpu.dot_dimension_numbers<[1], [0], [0], [1], [0, 0, 1, 1], [], []>} : vector<200x512xbf16>, vector<512x64xbf16>, vector<200x64xf32> -> vector<200x64xf32>
    %c0_3 = arith.constant 0 : index
    %c0_4 = arith.constant 0 : index
    %4 = vector.load %arg2[%c0_3, %c0_4] : memref<1x64xf32, #tpu.memory_space<vmem>>, vector<1x64xf32>
    %5 = vector.broadcast %4 : vector<1x64xf32> to vector<200x64xf32>
    %6 = arith.addf %3, %5 : vector<200x64xf32>
    %cst_5 = arith.constant 0.000000e+00 : f32
    %7 = vector.broadcast %cst_5 : f32 to vector<200x64xf32>
    %8 = arith.maximumf %6, %7 : vector<200x64xf32>
    %c0_6 = arith.constant 0 : index
    %c0_7 = arith.constant 0 : index
    %9 = vector.load %arg3[%c0_6, %c0_7] : memref<200x64xf32, #tpu.memory_space<vmem>>, vector<200x64xf32>
    tpu.vector_store %arg3[%c0_6, %c0_7], %8 {strides = array<i32>} : memref<200x64xf32, #tpu.memory_space<vmem>>, vector<200x64xf32>,
    return
  }
}

module attributes {stable_mosaic.version = 11 : i64} {
  func.func @_conv_matmul_kernel(%arg0: memref<200x576xf32, #tpu.memory_space<vmem>>, %arg1: memref<576x64xbf16, #tpu.memory_space<vmem>>, %arg2: memref<1x64xf32, #tpu.memory_space<vmem>>, %arg3: memref<200x64xf32, #tpu.memory_space<vmem>>) attributes {dimension_semantics = [], scalar_prefetch = 0 : i64, scratch_operands = 0 : i64, tpu.core_type = #tpu.core_type<tc>} {
    %c0 = arith.constant 0 : index
    %c0_0 = arith.constant 0 : index
    %0 = vector.load %arg0[%c0, %c0_0] : memref<200x576xf32, #tpu.memory_space<vmem>>, vector<200x576xf32>
    %1 = arith.truncf %0 : vector<200x576xf32> to vector<200x576xbf16>
    %c0_1 = arith.constant 0 : index
    %c0_2 = arith.constant 0 : index
    %2 = vector.load %arg1[%c0_1, %c0_2] : memref<576x64xbf16, #tpu.memory_space<vmem>>, vector<576x64xbf16>
    %cst = arith.constant dense<0.000000e+00> : vector<200x64xf32>
    %3 = tpu.matmul %1, %2, %cst {dimension_numbers = #tpu.dot_dimension_numbers<[1], [0], [0], [1], [0, 0, 1, 1], [], []>} : vector<200x576xbf16>, vector<576x64xbf16>, vector<200x64xf32> -> vector<200x64xf32>
    %c0_3 = arith.constant 0 : index
    %c0_4 = arith.constant 0 : index
    %4 = vector.load %arg2[%c0_3, %c0_4] : memref<1x64xf32, #tpu.memory_space<vmem>>, vector<1x64xf32>
    %5 = vector.broadcast %4 : vector<1x64xf32> to vector<200x64xf32>
    %6 = arith.addf %3, %5 : vector<200x64xf32>
    %cst_5 = arith.constant 0.000000e+00 : f32
    %7 = vector.broadcast %cst_5 : f32 to vector<200x64xf32>
    %8 = arith.maximumf %6, %7 : vector<200x64xf32>
    %c0_6 = arith.constant 0 : index
    %c0_7 = arith.constant 0 : index
    %9 = vector.load %arg3[%c0_6, %c0_7] : memref<200x64xf32, #tpu.memory_space<vmem>>, vector<200x64xf32>
    tpu.vector_store %arg3[%c0_6, %c0_7], %8 {strides = array<i32>} : memref<200x64xf32, #tpu.memory_space<vmem>>, vector<200x64xf32>,
    return
  }
}

module attributes {stable_mosaic.version = 11 : i64} {
  func.func @_head_kernel(%arg0: i32, %arg1: memref<2x1280xf32, #tpu.memory_space<vmem>>, %arg2: memref<1280x512xbf16, #tpu.memory_space<vmem>>, %arg3: memref<1x512xf32, #tpu.memory_space<vmem>>, %arg4: memref<512x18xbf16, #tpu.memory_space<vmem>>, %arg5: memref<1x18xf32, #tpu.memory_space<vmem>>, %arg6: memref<2x18xf32, #tpu.memory_space<vmem>>, %arg7: memref<2x512xf32, #tpu.memory_space<vmem>>) attributes {dimension_semantics = [#tpu.dimension_semantics<arbitrary>], iteration_bounds = array<i64: 5>, scalar_prefetch = 0 : i64, scratch_operands = 1 : i64, tpu.core_type = #tpu.core_type<tc>, window_params = [{transform_indices = @transform_0, window_bounds = array<i64: 2, 1280>}, {transform_indices = @transform_1, window_bounds = array<i64: 1280, 512>}, {pipeline_mode = #tpu.pipeline_mode<synchronous>, transform_indices = @transform_2, window_bounds = array<i64: 1, 512>}, {pipeline_mode = #tpu.pipeline_mode<synchronous>, transform_indices = @transform_3, window_bounds = array<i64: 512, 18>}, {pipeline_mode = #tpu.pipeline_mode<synchronous>, transform_indices = @transform_4, window_bounds = array<i64: 1, 18>}, {pipeline_mode = #tpu.pipeline_mode<synchronous>, transform_indices = @transform_5, window_bounds = array<i64: 2, 18>}]} {
    %c0_i32 = arith.constant 0 : i32
    %0 = arith.cmpi eq, %arg0, %c0_i32 : i32
    %1 = arith.extui %0 : i1 to i32
    %c0_i32_0 = arith.constant 0 : i32
    %2 = arith.cmpi ne, %1, %c0_i32_0 : i32
    scf.if %2 {
      %cst_9 = arith.constant 0.000000e+00 : f32
      %13 = vector.broadcast %cst_9 : f32 to vector<2x512xf32>
      %c0_10 = arith.constant 0 : index
      %c0_11 = arith.constant 0 : index
      %14 = vector.load %arg7[%c0_10, %c0_11] : memref<2x512xf32, #tpu.memory_space<vmem>>, vector<2x512xf32>
      tpu.vector_store %arg7[%c0_10, %c0_11], %13 {strides = array<i32>} : memref<2x512xf32, #tpu.memory_space<vmem>>, vector<2x512xf32>,
    } else {
    }
    %c0 = arith.constant 0 : index
    %c0_1 = arith.constant 0 : index
    %3 = vector.load %arg7[%c0, %c0_1] : memref<2x512xf32, #tpu.memory_space<vmem>>, vector<2x512xf32>
    %c0_2 = arith.constant 0 : index
    %c0_3 = arith.constant 0 : index
    %4 = vector.load %arg1[%c0_2, %c0_3] : memref<2x1280xf32, #tpu.memory_space<vmem>>, vector<2x1280xf32>
    %5 = arith.truncf %4 : vector<2x1280xf32> to vector<2x1280xbf16>
    %c0_4 = arith.constant 0 : index
    %c0_5 = arith.constant 0 : index
    %6 = vector.load %arg2[%c0_4, %c0_5] : memref<1280x512xbf16, #tpu.memory_space<vmem>>, vector<1280x512xbf16>
    %cst = arith.constant dense<0.000000e+00> : vector<2x512xf32>
    %7 = tpu.matmul %5, %6, %cst {dimension_numbers = #tpu.dot_dimension_numbers<[1], [0], [0], [1], [0, 0, 1, 1], [], []>} : vector<2x1280xbf16>, vector<1280x512xbf16>, vector<2x512xf32> -> vector<2x512xf32>
    %8 = arith.addf %3, %7 : vector<2x512xf32>
    %c0_6 = arith.constant 0 : index
    %c0_7 = arith.constant 0 : index
    %9 = vector.load %arg7[%c0_6, %c0_7] : memref<2x512xf32, #tpu.memory_space<vmem>>, vector<2x512xf32>
    tpu.vector_store %arg7[%c0_6, %c0_7], %8 {strides = array<i32>} : memref<2x512xf32, #tpu.memory_space<vmem>>, vector<2x512xf32>,
    %c4_i32 = arith.constant 4 : i32
    %10 = arith.cmpi eq, %arg0, %c4_i32 : i32
    %11 = arith.extui %10 : i1 to i32
    %c0_i32_8 = arith.constant 0 : i32
    %12 = arith.cmpi ne, %11, %c0_i32_8 : i32
    scf.if %12 {
      %c0_9 = arith.constant 0 : index
      %c0_10 = arith.constant 0 : index
      %13 = vector.load %arg7[%c0_9, %c0_10] : memref<2x512xf32, #tpu.memory_space<vmem>>, vector<2x512xf32>
      %c0_11 = arith.constant 0 : index
      %c0_12 = arith.constant 0 : index
      %14 = vector.load %arg3[%c0_11, %c0_12] : memref<1x512xf32, #tpu.memory_space<vmem>>, vector<1x512xf32>
      %15 = vector.broadcast %14 : vector<1x512xf32> to vector<2x512xf32>
      %16 = arith.addf %13, %15 : vector<2x512xf32>
      %cst_13 = arith.constant 0.000000e+00 : f32
      %17 = vector.broadcast %cst_13 : f32 to vector<2x512xf32>
      %18 = arith.maximumf %16, %17 : vector<2x512xf32>
      %19 = arith.truncf %18 : vector<2x512xf32> to vector<2x512xbf16>
      %c0_14 = arith.constant 0 : index
      %c0_15 = arith.constant 0 : index
      %20 = vector.load %arg4[%c0_14, %c0_15] : memref<512x18xbf16, #tpu.memory_space<vmem>>, vector<512x18xbf16>
      %cst_16 = arith.constant dense<0.000000e+00> : vector<2x18xf32>
      %21 = tpu.matmul %19, %20, %cst_16 {dimension_numbers = #tpu.dot_dimension_numbers<[1], [0], [0], [1], [0, 0, 1, 1], [], []>} : vector<2x512xbf16>, vector<512x18xbf16>, vector<2x18xf32> -> vector<2x18xf32>
      %c0_17 = arith.constant 0 : index
      %c0_18 = arith.constant 0 : index
      %22 = vector.load %arg5[%c0_17, %c0_18] : memref<1x18xf32, #tpu.memory_space<vmem>>, vector<1x18xf32>
      %23 = vector.broadcast %22 : vector<1x18xf32> to vector<2x18xf32>
      %24 = arith.addf %21, %23 : vector<2x18xf32>
      %c0_19 = arith.constant 0 : index
      %c0_20 = arith.constant 0 : index
      %25 = vector.load %arg6[%c0_19, %c0_20] : memref<2x18xf32, #tpu.memory_space<vmem>>, vector<2x18xf32>
      tpu.vector_store %arg6[%c0_19, %c0_20], %24 {strides = array<i32>} : memref<2x18xf32, #tpu.memory_space<vmem>>, vector<2x18xf32>,
    } else {
    }
    return
  }
  func.func @transform_0(%arg0: i32) -> (i32, i32) {
    %c0_i32 = arith.constant 0 : i32
    %c0_i32_0 = arith.constant 0 : i32
    return %c0_i32, %arg0 : i32, i32
  }
  func.func @transform_1(%arg0: i32) -> (i32, i32) {
    %c0_i32 = arith.constant 0 : i32
    %c0_i32_0 = arith.constant 0 : i32
    return %arg0, %c0_i32 : i32, i32
  }
  func.func @transform_2(%arg0: i32) -> (i32, i32) {
    %c0_i32 = arith.constant 0 : i32
    %c0_i32_0 = arith.constant 0 : i32
    %c0_i32_1 = arith.constant 0 : i32
    return %c0_i32, %c0_i32_0 : i32, i32
  }
  func.func @transform_3(%arg0: i32) -> (i32, i32) {
    %c0_i32 = arith.constant 0 : i32
    %c0_i32_0 = arith.constant 0 : i32
    %c0_i32_1 = arith.constant 0 : i32
    return %c0_i32, %c0_i32_0 : i32, i32
  }
  func.func @transform_4(%arg0: i32) -> (i32, i32) {
    %c0_i32 = arith.constant 0 : i32
    %c0_i32_0 = arith.constant 0 : i32
    %c0_i32_1 = arith.constant 0 : i32
    return %c0_i32, %c0_i32_0 : i32, i32
  }
  func.func @transform_5(%arg0: i32) -> (i32, i32) {
    %c0_i32 = arith.constant 0 : i32
    %c0_i32_0 = arith.constant 0 : i32
    %c0_i32_1 = arith.constant 0 : i32
    return %c0_i32, %c0_i32_0 : i32, i32
  }
}

</mosaic_0001>

<bundles_post_ra>
// kernel: dpin_forward.4
= control target key start
LH: loop header
LB: loop body
LE: loop exit
PB: predicated region body
PF: predicated region fallthrough
CT: control target
= control target key end

     0   :  { %v1154_v0 = vmov 0   ;;  %vm983_vm0 = vcmask 261120   ;;  %s2360_s1 = inlined_call_operand.vmem [shape: bf16[256,32], index: 1, kind: input, shape index: {}]   ;;  %s2361_s0 = inlined_call_operand.vmem [shape: f32[800,256], index: 0, kind: input, shape index: {}]   ;;  %s2362_s2 = inlined_call_operand.vmem [shape: f32[1,32], index: 2, kind: input, shape index: {}]   ;;  %s2363_s3 = inlined_call_operand.vmem [shape: f32[800,32], index: 3, kind: output, shape index: {}]  }
   0x1   :  { %450 = vmatprep.subr.bf16.mxu0 %v1154_v0  ;;  %1105 = vmatprep.subr.bf16.mxu1 %v1154_v0  ;;  %v1138_v1 = vld [vmem:[%s2360_s1 + $0x38] sm:$0xff]   ;;  %v1139_v2 = vld [vmem:[%s2360_s1 + $0x30] sm:$0xff]   ;;  %v1140_v3 = vld [vmem:[%s2360_s1 + $0x28] sm:$0xff]  }
   0x2   :  { %451 = vmatpush1.bf16.msra.mxu0 %v1138_v1  ;;  %1121 = vmatpush1.bf16.msra.mxu1 %v1138_v1  ;;  %v1141_v4 = vld [vmem:[%s2360_s1 + $0x20] sm:$0xff]   ;;  %v1142_v5 = vld [vmem:[%s2360_s1 + $0x18] sm:$0xff]   ;;  %v16_v6 = vld [vmem:[%s2361_s0 + $0x8] sm:$0xff] }
   0x3   :  { %452 = vmatprep.subr.bf16.mxu0 %v1154_v0  ;;  %1106 = vmatprep.subr.bf16.mxu1 %v1154_v0  ;;  %v18_v7 = vld [vmem:[%s2361_s0 + $0x18] sm:$0xff]  ;;  %v116_v8 = vld [vmem:[%s2361_s0 + $0x328] sm:$0xff]  ;;  %v1143_v11 = vld [vmem:[%s2360_s1 + $0x10] sm:$0xff]  }
   0x4   :  { %v216_v9 = vpack.c.bf16 %v18_v7, %v16_v6  ;;  %v118_v10 = vld [vmem:[%s2361_s0 + $0x338] sm:$0xff]  ;;  %v1144_v13 = vld [vmem:[%s2360_s1 + $0x8] sm:$0xff]   ;;  %v1145_v14 = vld [vmem:[%s2360_s1] sm:$0xff]  }
   0x5   :  { %v266_v12 = vpack.c.bf16 %v118_v10, %v116_v8  ;;  %v1146_v15 = vld [vmem:[%s2360_s1 + $0x78] sm:$0xff]   ;;  %v1147_v16 = vld [vmem:[%s2360_s1 + $0x70] sm:$0xff]   ;;  %v1148_v17 = vld [vmem:[%s2360_s1 + $0x68] sm:$0xff]  }
   0x6   :  { %453 = vmatpush1.bf16.msra.mxu0 %v1139_v2  ;;  %1122 = vmatpush1.bf16.msra.mxu1 %v1139_v2  ;;  %v1149_v18 = vld [vmem:[%s2360_s1 + $0x60] sm:$0xff]   ;;  %v1150_v19 = vld [vmem:[%s2360_s1 + $0x58] sm:$0xff]   ;;  %v1151_v20 = vld [vmem:[%s2360_s1 + $0x50] sm:$0xff]  }
   0x7   :  { %454 = vmatprep.subr.bf16.mxu0 %v1154_v0  ;;  %1107 = vmatprep.subr.bf16.mxu1 %v1154_v0  ;;  %v1152_v21 = vld [vmem:[%s2360_s1 + $0x48] sm:$0xff]   ;;  %v1153_v22 = vld [vmem:[%s2360_s1 + $0x40] sm:$0xff]   ;;  %v17_v24 = vld [vmem:[%s2361_s0 + $0x10] sm:$0xff] }
   0x8   :  { %482 = vmatprep.mubr.bf16.mxu0 %v216_v9  ;;  %682 = vmatprep.mubr.bf16.mxu1 %v266_v12  ;;  %v15_v23 = vld [vmem:[%s2361_s0] sm:$0xff]  ;;  %v117_v26 = vld [vmem:[%s2361_s0 + $0x330] sm:$0xff]  ;;  %v20_v27 = vld [vmem:[%s2361_s0 + $0x28] sm:$0xff] }
   0x9   :  { %v115_v25 = vld [vmem:[%s2361_s0 + $0x320] sm:$0xff]  ;;  %v22_v28 = vld [vmem:[%s2361_s0 + $0x38] sm:$0xff]  ;;  %v120_v29 = vld [vmem:[%s2361_s0 + $0x348] sm:$0xff]  ;;  %v215_v31 = vpack.c.bf16 %v17_v24, %v15_v23 }
   0xa   :  { %455 = vmatpush1.bf16.msra.mxu0 %v1140_v3  ;;  %1123 = vmatpush1.bf16.msra.mxu1 %v1140_v3  ;;  %v122_v30 = vld [vmem:[%s2361_s0 + $0x358] sm:$0xff]  ;;  %v265_v32 = vpack.c.bf16 %v117_v26, %v115_v25  ;;  %v218_v33 = vpack.c.bf16 %v22_v28, %v20_v27  ;;  %v19_v35 = vld [vmem:[%s2361_s0 + $0x20] sm:$0xff]  ;;  %v21_v36 = vld [vmem:[%s2361_s0 + $0x30] sm:$0xff] }
   0xb   :  { %456 = vmatprep.subr.bf16.mxu0 %v1154_v0  ;;  %1108 = vmatprep.subr.bf16.mxu1 %v1154_v0  ;;  %v268_v34 = vpack.c.bf16 %v122_v30, %v120_v29  ;;  %v119_v37 = vld [vmem:[%s2361_s0 + $0x340] sm:$0xff]  ;;  %v121_v38 = vld [vmem:[%s2361_s0 + $0x350] sm:$0xff]  ;;  %v24_v39 = vld [vmem:[%s2361_s0 + $0x48] sm:$0xff]  ;;  %v217_v43 = vpack.c.bf16 %v21_v36, %v19_v35 }
   0xc   :  { %v26_v40 = vld [vmem:[%s2361_s0 + $0x58] sm:$0xff]  ;;  %v124_v41 = vld [vmem:[%s2361_s0 + $0x368] sm:$0xff]  ;;  %v267_v44 = vpack.c.bf16 %v121_v38, %v119_v37  ;;  %v23_v47 = vld [vmem:[%s2361_s0 + $0x40] sm:$0xff] }
   0xd   :  { %v126_v42 = vld [vmem:[%s2361_s0 + $0x378] sm:$0xff]  ;;  %v220_v45 = vpack.c.bf16 %v26_v40, %v24_v39  ;;  %v25_v48 = vld [vmem:[%s2361_s0 + $0x50] sm:$0xff]  ;;  %v123_v49 = vld [vmem:[%s2361_s0 + $0x360] sm:$0xff] }
   0xe   :  { %457 = vmatpush1.bf16.msra.mxu0 %v1141_v4  ;;  %1124 = vmatpush1.bf16.msra.mxu1 %v1141_v4  ;;  %v270_v46 = vpack.c.bf16 %v126_v42, %v124_v41  ;;  %v125_v50 = vld [vmem:[%s2361_s0 + $0x370] sm:$0xff]  ;;  %v28_v51 = vld [vmem:[%s2361_s0 + $0x68] sm:$0xff]  ;;  %v30_v52 = vld [vmem:[%s2361_s0 + $0x78] sm:$0xff]  ;;  %v219_v55 = vpack.c.bf16 %v25_v48, %v23_v47 }
   0xf   :  { %458 = vmatprep.subr.bf16.mxu0 %v1154_v0  ;;  %1109 = vmatprep.subr.bf16.mxu1 %v1154_v0  ;;  %v128_v53 = vld [vmem:[%s2361_s0 + $0x388] sm:$0xff]  ;;  %v130_v54 = vld [vmem:[%s2361_s0 + $0x398] sm:$0xff]  ;;  %v269_v56 = vpack.c.bf16 %v125_v50, %v123_v49  ;;  %v222_v57 = vpack.c.bf16 %v30_v52, %v28_v51  ;;  %v27_v59 = vld [vmem:[%s2361_s0 + $0x60] sm:$0xff] }
  0x10   :  { %v272_v58 = vpack.c.bf16 %v130_v54, %v128_v53  ;;  %v29_v60 = vld [vmem:[%s2361_s0 + $0x70] sm:$0xff]  ;;  %v127_v61 = vld [vmem:[%s2361_s0 + $0x380] sm:$0xff]  ;;  %v32_v63 = vld [vmem:[%s2361_s0 + $0x88] sm:$0xff] }
  0x11   :  { %v129_v62 = vld [vmem:[%s2361_s0 + $0x390] sm:$0xff]  ;;  %v132_v1 = vld [vmem:[%s2361_s0 + $0x3a8] sm:$0xff]  ;;  %v134_v2 = vld [vmem:[%s2361_s0 + $0x3b8] sm:$0xff]  ;;  %v221_v3 = vpack.c.bf16 %v29_v60, %v27_v59 }
  0x12   :  { %459 = vmatpush1.bf16.msra.mxu0 %v1142_v5  ;;  %1125 = vmatpush1.bf16.msra.mxu1 %v1142_v5  ;;  %v271_v4 = vpack.c.bf16 %v129_v62, %v127_v61  ;;  %v274_v6 = vpack.c.bf16 %v134_v2, %v132_v1  ;;  %v31_v7 = vld [vmem:[%s2361_s0 + $0x80] sm:$0xff]  ;;  %v33_v8 = vld [vmem:[%s2361_s0 + $0x90] sm:$0xff]  ;;  %v38_v12 = vld [vmem:[%s2361_s0 + $0xb8] sm:$0xff] }
  0x13   :  { %460 = vmatprep.subr.bf16.mxu0 %v1154_v0  ;;  %1110 = vmatprep.subr.bf16.mxu1 %v1154_v0  ;;  %v131_v9 = vld [vmem:[%s2361_s0 + $0x3a0] sm:$0xff]  ;;  %v133_v10 = vld [vmem:[%s2361_s0 + $0x3b0] sm:$0xff]  ;;  %v40_v23 = vld [vmem:[%s2361_s0 + $0xc8] sm:$0xff] }
  0x14   :  { %v42_v24 = vld [vmem:[%s2361_s0 + $0xd8] sm:$0xff]  ;;  %v140_v25 = vld [vmem:[%s2361_s0 + $0x3e8] sm:$0xff] }
  0x15   :  { %v142_v26 = vld [vmem:[%s2361_s0 + $0x3f8] sm:$0xff]  ;;  %v228_v29 = vpack.c.bf16 %v42_v24, %v40_v23  ;;  %v44_v35 = vld [vmem:[%s2361_s0 + $0xe8] sm:$0xff] }
  0x16   :  { %461 = vmatpush1.bf16.msra.mxu0 %v1143_v11  ;;  %1126 = vmatpush1.bf16.msra.mxu1 %v1143_v11  ;;  %v36_v11 = vld [vmem:[%s2361_s0 + $0xa8] sm:$0xff]  ;;  %v278_v30 = vpack.c.bf16 %v142_v26, %v140_v25  ;;  %v46_v36 = vld [vmem:[%s2361_s0 + $0xf8] sm:$0xff] }
  0x17   :  { %462 = vmatprep.subr.bf16.mxu0 %v1154_v0  ;;  %1111 = vmatprep.subr.bf16.mxu1 %v1154_v0  ;;  %v144_v37 = vld [vmem:[%s2361_s0 + $0x408] sm:$0xff]  ;;  %v146_v38 = vld [vmem:[%s2361_s0 + $0x418] sm:$0xff]  ;;  %v230_v41 = vpack.c.bf16 %v46_v36, %v44_v35 }
  0x18   :  { %v280_v42 = vpack.c.bf16 %v146_v38, %v144_v37  ;;  %v48_v47 = vld [vmem:[%s2361_s0 + $0x108] sm:$0xff]  ;;  %v50_v48 = vld [vmem:[%s2361_s0 + $0x118] sm:$0xff] }
  0x19   :  { %v148_v49 = vld [vmem:[%s2361_s0 + $0x428] sm:$0xff]  ;;  %v150_v50 = vld [vmem:[%s2361_s0 + $0x438] sm:$0xff]  ;;  %v232_v53 = vpack.c.bf16 %v50_v48, %v48_v47 }
  0x1a   :  { %463 = vmatpush1.bf16.msra.mxu0 %v1144_v13  ;;  %1127 = vmatpush1.bf16.msra.mxu1 %v1144_v13  ;;  %v136_v13 = vld [vmem:[%s2361_s0 + $0x3c8] sm:$0xff]  ;;  %v282_v54 = vpack.c.bf16 %v150_v50, %v148_v49  ;;  %v54_v60 = vld [vmem:[%s2361_s0 + $0x138] sm:$0xff] }
  0x1b   :  { %464 = vmatprep.subr.bf16.mxu0 %v1154_v0  ;;  %1112 = vmatprep.subr.bf16.mxu1 %v1154_v0  ;;  %v52_v59 = vld [vmem:[%s2361_s0 + $0x128] sm:$0xff]  ;;  %v154_v62 = vld [vmem:[%s2361_s0 + $0x458] sm:$0xff] }
  0x1c   :  { %v152_v61 = vld [vmem:[%s2361_s0 + $0x448] sm:$0xff]  ;;  %v234_v1 = vpack.c.bf16 %v54_v60, %v52_v59 }
  0x1d   :  { %v284_v2 = vpack.c.bf16 %v154_v62, %v152_v61 }
  0x1e   :  { %465 = vmatpush1.bf16.msra.mxu0 %v1145_v14  ;;  %1128 = vmatpush1.bf16.msra.mxu1 %v1145_v14  ;;  %v138_v14 = vld [vmem:[%s2361_s0 + $0x3d8] sm:$0xff] }
  0x1f   :  { %466 = vmatprep.subr.bf16.mxu0 %v1154_v0  ;;  %1113 = vmatprep.subr.bf16.mxu1 %v1154_v0 }
  0x22   :  { %467 = vmatpush2.bf16.msra.mxu0 %v1146_v15  ;;  %1129 = vmatpush2.bf16.msra.mxu1 %v1146_v15  ;;  %v223_v15 = vpack.c.bf16 %v33_v8, %v31_v7  ;;  %v56_v7 = vld [vmem:[%s2361_s0 + $0x148] sm:$0xff]  ;;  %v58_v8 = vld [vmem:[%s2361_s0 + $0x158] sm:$0xff] }
  0x23   :  { %468 = vmatprep.subr.bf16.mxu0 %v1154_v0  ;;  %1114 = vmatprep.subr.bf16.mxu1 %v1154_v0 }
  0x26   :  { %469 = vmatpush2.bf16.msra.mxu0 %v1147_v16  ;;  %1130 = vmatpush2.bf16.msra.mxu1 %v1147_v16  ;;  %v273_v16 = vpack.c.bf16 %v133_v10, %v131_v9  ;;  %v156_v9 = vld [vmem:[%s2361_s0 + $0x468] sm:$0xff]  ;;  %v158_v10 = vld [vmem:[%s2361_s0 + $0x478] sm:$0xff] }
  0x27   :  { %470 = vmatprep.subr.bf16.mxu0 %v1154_v0  ;;  %1115 = vmatprep.subr.bf16.mxu1 %v1154_v0 }
  0x2a   :  { %471 = vmatpush2.bf16.msra.mxu0 %v1148_v17  ;;  %1131 = vmatpush2.bf16.msra.mxu1 %v1148_v17  ;;  %v226_v17 = vpack.c.bf16 %v38_v12, %v36_v11 }
  0x2b   :  { %472 = vmatprep.subr.bf16.mxu0 %v1154_v0  ;;  %1116 = vmatprep.subr.bf16.mxu1 %v1154_v0 }
  0x2e   :  { %473 = vmatpush2.bf16.msra.mxu0 %v1149_v18  ;;  %1132 = vmatpush2.bf16.msra.mxu1 %v1149_v18  ;;  %v276_v18 = vpack.c.bf16 %v138_v14, %v136_v13  ;;  %v236_v13 = vpack.c.bf16 %v58_v8, %v56_v7  ;;  %v286_v14 = vpack.c.bf16 %v158_v10, %v156_v9 }
  0x2f   :  { %474 = vmatprep.subr.bf16.mxu0 %v1154_v0  ;;  %1117 = vmatprep.subr.bf16.mxu1 %v1154_v0 }
  0x32   :  { %475 = vmatpush2.bf16.msra.mxu0 %v1150_v19  ;;  %1133 = vmatpush2.bf16.msra.mxu1 %v1150_v19  ;;  %v35_v19 = vld [vmem:[%s2361_s0 + $0xa0] sm:$0xff] }
  0x33   :  { %476 = vmatprep.subr.bf16.mxu0 %v1154_v0  ;;  %1118 = vmatprep.subr.bf16.mxu1 %v1154_v0 }
  0x36   :  { %477 = vmatpush2.bf16.msra.mxu0 %v1151_v20  ;;  %1134 = vmatpush2.bf16.msra.mxu1 %v1151_v20  ;;  %v37_v20 = vld [vmem:[%s2361_s0 + $0xb0] sm:$0xff] }
  0x37   :  { %478 = vmatprep.subr.bf16.mxu0 %v1154_v0  ;;  %1119 = vmatprep.subr.bf16.mxu1 %v1154_v0  ;;  %v225_v27 = vpack.c.bf16 %v37_v20, %v35_v19  ;;  %v60_v19 = vld [vmem:[%s2361_s0 + $0x168] sm:$0xff]  ;;  %v62_v20 = vld [vmem:[%s2361_s0 + $0x178] sm:$0xff] }
  0x38   :  { %v238_v25 = vpack.c.bf16 %v62_v20, %v60_v19 }
  0x3a   :  { %479 = vmatpush2.bf16.msra.mxu0 %v1152_v21  ;;  %1135 = vmatpush2.bf16.msra.mxu1 %v1152_v21  ;;  %v135_v21 = vld [vmem:[%s2361_s0 + $0x3c0] sm:$0xff] }
  0x3b   :  { %480 = vmatprep.subr.bf16.mxu0 %v1154_v0  ;;  %1120 = vmatprep.subr.bf16.mxu1 %v1154_v0  ;;  %v34_v0 = vld [vmem:[%s2361_s0 + $0x98] sm:$0xff] }
  0x3c   :  { %v224_v5 = vpack.c.bf16 %v34_v0, %v32_v63 }
  0x3e   :  { %481 = vmatpush2.bf16.msra.mxu0 %v1153_v22  ;;  %1136 = vmatpush2.bf16.msra.mxu1 %v1153_v22  ;;  %v137_v22 = vld [vmem:[%s2361_s0 + $0x3d0] sm:$0xff] }
  0x3f   :  { %v275_v28 = vpack.c.bf16 %v137_v22, %v135_v21  ;;  %v160_v21 = vld [vmem:[%s2361_s0 + $0x488] sm:$0xff]  ;;  %v162_v22 = vld [vmem:[%s2361_s0 + $0x498] sm:$0xff] }
  0x40   :  { %v288_v26 = vpack.c.bf16 %v162_v22, %v160_v21 }
  0x41   :  { %483 = vmatmul.mubr.bf16.vlgmr.msra.gmra.mxu0 %v215_v31  ;;  %683 = vmatmul.mubr.bf16.vlgmr.msra.gmra.mxu1 %v265_v32  ;;  %v39_v31 = vld [vmem:[%s2361_s0 + $0xc0] sm:$0xff]  ;;  %v41_v32 = vld [vmem:[%s2361_s0 + $0xd0] sm:$0xff] }
  0x42   :  { %490 = vmatprep.mubr.bf16.mxu0 %v218_v33  ;;  %690 = vmatprep.mubr.bf16.mxu1 %v268_v34  ;;  %v139_v33 = vld [vmem:[%s2361_s0 + $0x3e0] sm:$0xff]  ;;  %v141_v34 = vld [vmem:[%s2361_s0 + $0x3f0] sm:$0xff]  ;;  %v227_v39 = vpack.c.bf16 %v41_v32, %v39_v31  ;;  %v64_v31 = vld [vmem:[%s2361_s0 + $0x188] sm:$0xff] }
  0x43   :  { %v277_v40 = vpack.c.bf16 %v141_v34, %v139_v33  ;;  %v66_v32 = vld [vmem:[%s2361_s0 + $0x198] sm:$0xff]  ;;  %v164_v33 = vld [vmem:[%s2361_s0 + $0x4a8] sm:$0xff] }
  0x44   :  { %v166_v34 = vld [vmem:[%s2361_s0 + $0x4b8] sm:$0xff]  ;;  %v240_v37 = vpack.c.bf16 %v66_v32, %v64_v31 }
  0x45   :  { %v290_v38 = vpack.c.bf16 %v166_v34, %v164_v33 }
  0x49   :  { %491 = vmatmul.mubr.bf16.gmra.mxu0 %v217_v43  ;;  %691 = vmatmul.mubr.bf16.gmra.mxu1 %v267_v44  ;;  %v43_v43 = vld [vmem:[%s2361_s0 + $0xe0] sm:$0xff]  ;;  %v45_v44 = vld [vmem:[%s2361_s0 + $0xf0] sm:$0xff] }
  0x4a   :  { %498 = vmatprep.mubr.bf16.mxu0 %v220_v45  ;;  %698 = vmatprep.mubr.bf16.mxu1 %v270_v46  ;;  %v143_v45 = vld [vmem:[%s2361_s0 + $0x400] sm:$0xff]  ;;  %v145_v46 = vld [vmem:[%s2361_s0 + $0x410] sm:$0xff]  ;;  %v229_v51 = vpack.c.bf16 %v45_v44, %v43_v43  ;;  %v68_v43 = vld [vmem:[%s2361_s0 + $0x1a8] sm:$0xff] }
  0x4b   :  { %v279_v52 = vpack.c.bf16 %v145_v46, %v143_v45  ;;  %v70_v44 = vld [vmem:[%s2361_s0 + $0x1b8] sm:$0xff]  ;;  %v168_v45 = vld [vmem:[%s2361_s0 + $0x4c8] sm:$0xff] }
  0x4c   :  { %v170_v46 = vld [vmem:[%s2361_s0 + $0x4d8] sm:$0xff]  ;;  %v242_v49 = vpack.c.bf16 %v70_v44, %v68_v43 }
  0x4d   :  { %v292_v50 = vpack.c.bf16 %v170_v46, %v168_v45 }
  0x51   :  { %499 = vmatmul.mubr.bf16.gmra.mxu0 %v219_v55  ;;  %699 = vmatmul.mubr.bf16.gmra.mxu1 %v269_v56  ;;  %v47_v55 = vld [vmem:[%s2361_s0 + $0x100] sm:$0xff]  ;;  %v49_v56 = vld [vmem:[%s2361_s0 + $0x110] sm:$0xff] }
  0x52   :  { %506 = vmatprep.mubr.bf16.mxu0 %v222_v57  ;;  %706 = vmatprep.mubr.bf16.mxu1 %v272_v58  ;;  %v147_v57 = vld [vmem:[%s2361_s0 + $0x420] sm:$0xff]  ;;  %v149_v58 = vld [vmem:[%s2361_s0 + $0x430] sm:$0xff]  ;;  %v231_v63 = vpack.c.bf16 %v49_v56, %v47_v55  ;;  %v72_v55 = vld [vmem:[%s2361_s0 + $0x1c8] sm:$0xff] }
  0x53   :  { %v281_v0 = vpack.c.bf16 %v149_v58, %v147_v57  ;;  %v74_v56 = vld [vmem:[%s2361_s0 + $0x1d8] sm:$0xff]  ;;  %v172_v57 = vld [vmem:[%s2361_s0 + $0x4e8] sm:$0xff] }
  0x54   :  { %v174_v58 = vld [vmem:[%s2361_s0 + $0x4f8] sm:$0xff]  ;;  %v244_v61 = vpack.c.bf16 %v74_v56, %v72_v55 }
  0x55   :  { %v294_v62 = vpack.c.bf16 %v174_v58, %v172_v57 }
  0x59   :  { %507 = vmatmul.mubr.bf16.gmra.mxu0 %v221_v3  ;;  %707 = vmatmul.mubr.bf16.gmra.mxu1 %v271_v4  ;;  %v51_v3 = vld [vmem:[%s2361_s0 + $0x120] sm:$0xff]  ;;  %v53_v4 = vld [vmem:[%s2361_s0 + $0x130] sm:$0xff] }
  0x5a   :  { %514 = vmatprep.mubr.bf16.mxu0 %v224_v5  ;;  %714 = vmatprep.mubr.bf16.mxu1 %v274_v6  ;;  %v151_v5 = vld [vmem:[%s2361_s0 + $0x440] sm:$0xff]  ;;  %v153_v6 = vld [vmem:[%s2361_s0 + $0x450] sm:$0xff]  ;;  %v233_v11 = vpack.c.bf16 %v53_v4, %v51_v3  ;;  %v76_v3 = vld [vmem:[%s2361_s0 + $0x1e8] sm:$0xff] }
  0x5b   :  { %v283_v12 = vpack.c.bf16 %v153_v6, %v151_v5  ;;  %v78_v4 = vld [vmem:[%s2361_s0 + $0x1f8] sm:$0xff]  ;;  %v176_v5 = vld [vmem:[%s2361_s0 + $0x508] sm:$0xff] }
  0x5c   :  { %v178_v6 = vld [vmem:[%s2361_s0 + $0x518] sm:$0xff]  ;;  %v246_v9 = vpack.c.bf16 %v78_v4, %v76_v3 }
  0x5d   :  { %v296_v10 = vpack.c.bf16 %v178_v6, %v176_v5 }
  0x61   :  { %515 = vmatmul.mubr.bf16.gmra.mxu0 %v223_v15  ;;  %715 = vmatmul.mubr.bf16.gmra.mxu1 %v273_v16  ;;  %v55_v15 = vld [vmem:[%s2361_s0 + $0x140] sm:$0xff]  ;;  %v57_v16 = vld [vmem:[%s2361_s0 + $0x150] sm:$0xff] }
  0x62   :  { %522 = vmatprep.mubr.bf16.mxu0 %v226_v17  ;;  %722 = vmatprep.mubr.bf16.mxu1 %v276_v18  ;;  %v155_v17 = vld [vmem:[%s2361_s0 + $0x460] sm:$0xff]  ;;  %v157_v18 = vld [vmem:[%s2361_s0 + $0x470] sm:$0xff]  ;;  %v235_v23 = vpack.c.bf16 %v57_v16, %v55_v15  ;;  %v80_v15 = vld [vmem:[%s2361_s0 + $0x208] sm:$0xff] }
  0x63   :  { %v285_v24 = vpack.c.bf16 %v157_v18, %v155_v17  ;;  %v82_v16 = vld [vmem:[%s2361_s0 + $0x218] sm:$0xff]  ;;  %v180_v17 = vld [vmem:[%s2361_s0 + $0x528] sm:$0xff] }
  0x64   :  { %v182_v18 = vld [vmem:[%s2361_s0 + $0x538] sm:$0xff]  ;;  %v248_v21 = vpack.c.bf16 %v82_v16, %v80_v15 }
  0x65   :  { %v298_v22 = vpack.c.bf16 %v182_v18, %v180_v17 }
  0x69   :  { %523 = vmatmul.mubr.bf16.gmra.mxu0 %v225_v27  ;;  %723 = vmatmul.mubr.bf16.gmra.mxu1 %v275_v28  ;;  %v59_v27 = vld [vmem:[%s2361_s0 + $0x160] sm:$0xff]  ;;  %v61_v28 = vld [vmem:[%s2361_s0 + $0x170] sm:$0xff] }
  0x6a   :  { %530 = vmatprep.mubr.bf16.mxu0 %v228_v29  ;;  %730 = vmatprep.mubr.bf16.mxu1 %v278_v30  ;;  %v159_v29 = vld [vmem:[%s2361_s0 + $0x480] sm:$0xff]  ;;  %v161_v30 = vld [vmem:[%s2361_s0 + $0x490] sm:$0xff]  ;;  %v237_v35 = vpack.c.bf16 %v61_v28, %v59_v27  ;;  %v84_v27 = vld [vmem:[%s2361_s0 + $0x228] sm:$0xff] }
  0x6b   :  { %v287_v36 = vpack.c.bf16 %v161_v30, %v159_v29  ;;  %v86_v28 = vld [vmem:[%s2361_s0 + $0x238] sm:$0xff]  ;;  %v184_v29 = vld [vmem:[%s2361_s0 + $0x548] sm:$0xff] }
  0x6c   :  { %v186_v30 = vld [vmem:[%s2361_s0 + $0x558] sm:$0xff]  ;;  %v250_v33 = vpack.c.bf16 %v86_v28, %v84_v27 }
  0x6d   :  { %v300_v34 = vpack.c.bf16 %v186_v30, %v184_v29 }
  0x71   :  { %531 = vmatmul.mubr.bf16.gmra.mxu0 %v227_v39  ;;  %731 = vmatmul.mubr.bf16.gmra.mxu1 %v277_v40  ;;  %v63_v39 = vld [vmem:[%s2361_s0 + $0x180] sm:$0xff]  ;;  %v65_v40 = vld [vmem:[%s2361_s0 + $0x190] sm:$0xff] }
  0x72   :  { %538 = vmatprep.mubr.bf16.mxu0 %v230_v41  ;;  %738 = vmatprep.mubr.bf16.mxu1 %v280_v42  ;;  %v163_v41 = vld [vmem:[%s2361_s0 + $0x4a0] sm:$0xff]  ;;  %v165_v42 = vld [vmem:[%s2361_s0 + $0x4b0] sm:$0xff]  ;;  %v239_v47 = vpack.c.bf16 %v65_v40, %v63_v39  ;;  %v88_v39 = vld [vmem:[%s2361_s0 + $0x248] sm:$0xff] }
  0x73   :  { %v289_v48 = vpack.c.bf16 %v165_v42, %v163_v41  ;;  %v90_v40 = vld [vmem:[%s2361_s0 + $0x258] sm:$0xff]  ;;  %v188_v41 = vld [vmem:[%s2361_s0 + $0x568] sm:$0xff] }
  0x74   :  { %v190_v42 = vld [vmem:[%s2361_s0 + $0x578] sm:$0xff]  ;;  %v252_v45 = vpack.c.bf16 %v90_v40, %v88_v39 }
  0x75   :  { %v302_v46 = vpack.c.bf16 %v190_v42, %v188_v41 }
  0x79   :  { %539 = vmatmul.mubr.bf16.gmra.mxu0 %v229_v51  ;;  %739 = vmatmul.mubr.bf16.gmra.mxu1 %v279_v52  ;;  %v67_v51 = vld [vmem:[%s2361_s0 + $0x1a0] sm:$0xff]  ;;  %v69_v52 = vld [vmem:[%s2361_s0 + $0x1b0] sm:$0xff] }
  0x7a   :  { %546 = vmatprep.mubr.bf16.mxu0 %v232_v53  ;;  %746 = vmatprep.mubr.bf16.mxu1 %v282_v54  ;;  %v167_v53 = vld [vmem:[%s2361_s0 + $0x4c0] sm:$0xff]  ;;  %v169_v54 = vld [vmem:[%s2361_s0 + $0x4d0] sm:$0xff]  ;;  %v241_v59 = vpack.c.bf16 %v69_v52, %v67_v51  ;;  %v92_v51 = vld [vmem:[%s2361_s0 + $0x268] sm:$0xff] }
  0x7b   :  { %v291_v60 = vpack.c.bf16 %v169_v54, %v167_v53  ;;  %v94_v52 = vld [vmem:[%s2361_s0 + $0x278] sm:$0xff]  ;;  %v192_v53 = vld [vmem:[%s2361_s0 + $0x588] sm:$0xff] }
  0x7c   :  { %v194_v54 = vld [vmem:[%s2361_s0 + $0x598] sm:$0xff]  ;;  %v254_v57 = vpack.c.bf16 %v94_v52, %v92_v51 }
  0x7d   :  { %v304_v58 = vpack.c.bf16 %v194_v54, %v192_v53 }
  0x81   :  { %547 = vmatmul.mubr.bf16.gmra.mxu0 %v231_v63  ;;  %747 = vmatmul.mubr.bf16.gmra.mxu1 %v281_v0  ;;  %v71_v63 = vld [vmem:[%s2361_s0 + $0x1c0] sm:$0xff]  ;;  %v73_v0 = vld [vmem:[%s2361_s0 + $0x1d0] sm:$0xff] }
  0x82   :  { %554 = vmatprep.mubr.bf16.mxu0 %v234_v1  ;;  %754 = vmatprep.mubr.bf16.mxu1 %v284_v2  ;;  %v171_v1 = vld [vmem:[%s2361_s0 + $0x4e0] sm:$0xff]  ;;  %v173_v2 = vld [vmem:[%s2361_s0 + $0x4f0] sm:$0xff]  ;;  %v243_v7 = vpack.c.bf16 %v73_v0, %v71_v63  ;;  %v96_v63 = vld [vmem:[%s2361_s0 + $0x288] sm:$0xff] }
  0x83   :  { %v293_v8 = vpack.c.bf16 %v173_v2, %v171_v1  ;;  %v98_v0 = vld [vmem:[%s2361_s0 + $0x298] sm:$0xff]  ;;  %v196_v1 = vld [vmem:[%s2361_s0 + $0x5a8] sm:$0xff] }
  0x84   :  { %v198_v2 = vld [vmem:[%s2361_s0 + $0x5b8] sm:$0xff]  ;;  %v256_v5 = vpack.c.bf16 %v98_v0, %v96_v63 }
  0x85   :  { %v306_v6 = vpack.c.bf16 %v198_v2, %v196_v1 }
  0x89   :  { %555 = vmatmul.mubr.bf16.gmra.mxu0 %v233_v11  ;;  %755 = vmatmul.mubr.bf16.gmra.mxu1 %v283_v12  ;;  %v75_v11 = vld [vmem:[%s2361_s0 + $0x1e0] sm:$0xff]  ;;  %v77_v12 = vld [vmem:[%s2361_s0 + $0x1f0] sm:$0xff] }
  0x8a   :  { %562 = vmatprep.mubr.bf16.mxu0 %v236_v13  ;;  %762 = vmatprep.mubr.bf16.mxu1 %v286_v14  ;;  %v175_v13 = vld [vmem:[%s2361_s0 + $0x500] sm:$0xff]  ;;  %v177_v14 = vld [vmem:[%s2361_s0 + $0x510] sm:$0xff]  ;;  %v245_v19 = vpack.c.bf16 %v77_v12, %v75_v11  ;;  %v100_v11 = vld [vmem:[%s2361_s0 + $0x2a8] sm:$0xff] }
  0x8b   :  { %v295_v20 = vpack.c.bf16 %v177_v14, %v175_v13  ;;  %v102_v12 = vld [vmem:[%s2361_s0 + $0x2b8] sm:$0xff]  ;;  %v200_v13 = vld [vmem:[%s2361_s0 + $0x5c8] sm:$0xff] }
  0x8c   :  { %v202_v14 = vld [vmem:[%s2361_s0 + $0x5d8] sm:$0xff]  ;;  %v258_v17 = vpack.c.bf16 %v102_v12, %v100_v11 }
  0x8d   :  { %v308_v18 = vpack.c.bf16 %v202_v14, %v200_v13 }
  0x91   :  { %563 = vmatmul.mubr.bf16.gmra.mxu0 %v235_v23  ;;  %763 = vmatmul.mubr.bf16.gmra.mxu1 %v285_v24  ;;  %v79_v23 = vld [vmem:[%s2361_s0 + $0x200] sm:$0xff]  ;;  %v81_v24 = vld [vmem:[%s2361_s0 + $0x210] sm:$0xff] }
  0x92   :  { %570 = vmatprep.mubr.bf16.mxu0 %v238_v25  ;;  %770 = vmatprep.mubr.bf16.mxu1 %v288_v26  ;;  %v179_v25 = vld [vmem:[%s2361_s0 + $0x520] sm:$0xff]  ;;  %v181_v26 = vld [vmem:[%s2361_s0 + $0x530] sm:$0xff]  ;;  %v247_v31 = vpack.c.bf16 %v81_v24, %v79_v23  ;;  %v104_v23 = vld [vmem:[%s2361_s0 + $0x2c8] sm:$0xff] }
  0x93   :  { %v297_v32 = vpack.c.bf16 %v181_v26, %v179_v25  ;;  %v106_v24 = vld [vmem:[%s2361_s0 + $0x2d8] sm:$0xff]  ;;  %v204_v25 = vld [vmem:[%s2361_s0 + $0x5e8] sm:$0xff] }
  0x94   :  { %v206_v26 = vld [vmem:[%s2361_s0 + $0x5f8] sm:$0xff]  ;;  %v260_v29 = vpack.c.bf16 %v106_v24, %v104_v23 }
  0x95   :  { %v310_v30 = vpack.c.bf16 %v206_v26, %v204_v25 }
  0x99   :  { %571 = vmatmul.mubr.bf16.gmra.mxu0 %v237_v35  ;;  %771 = vmatmul.mubr.bf16.gmra.mxu1 %v287_v36  ;;  %v83_v35 = vld [vmem:[%s2361_s0 + $0x220] sm:$0xff]  ;;  %v85_v36 = vld [vmem:[%s2361_s0 + $0x230] sm:$0xff] }
  0x9a   :  { %578 = vmatprep.mubr.bf16.mxu0 %v240_v37  ;;  %778 = vmatprep.mubr.bf16.mxu1 %v290_v38  ;;  %v183_v37 = vld [vmem:[%s2361_s0 + $0x540] sm:$0xff]  ;;  %v185_v38 = vld [vmem:[%s2361_s0 + $0x550] sm:$0xff]  ;;  %v249_v43 = vpack.c.bf16 %v85_v36, %v83_v35  ;;  %v108_v35 = vld [vmem:[%s2361_s0 + $0x2e8] sm:$0xff] }
  0x9b   :  { %v299_v44 = vpack.c.bf16 %v185_v38, %v183_v37  ;;  %v110_v36 = vld [vmem:[%s2361_s0 + $0x2f8] sm:$0xff]  ;;  %v208_v37 = vld [vmem:[%s2361_s0 + $0x608] sm:$0xff] }
  0x9c   :  { %v210_v38 = vld [vmem:[%s2361_s0 + $0x618] sm:$0xff]  ;;  %v262_v41 = vpack.c.bf16 %v110_v36, %v108_v35 }
  0x9d   :  { %v312_v42 = vpack.c.bf16 %v210_v38, %v208_v37 }
  0xa1   :  { %579 = vmatmul.mubr.bf16.gmra.mxu0 %v239_v47  ;;  %779 = vmatmul.mubr.bf16.gmra.mxu1 %v289_v48  ;;  %v87_v47 = vld [vmem:[%s2361_s0 + $0x240] sm:$0xff]  ;;  %v89_v48 = vld [vmem:[%s2361_s0 + $0x250] sm:$0xff] }
  0xa2   :  { %586 = vmatprep.mubr.bf16.mxu0 %v242_v49  ;;  %786 = vmatprep.mubr.bf16.mxu1 %v292_v50  ;;  %v187_v49 = vld [vmem:[%s2361_s0 + $0x560] sm:$0xff]  ;;  %v189_v50 = vld [vmem:[%s2361_s0 + $0x570] sm:$0xff]  ;;  %v251_v55 = vpack.c.bf16 %v89_v48, %v87_v47  ;;  %v112_v47 = vld [vmem:[%s2361_s0 + $0x308] sm:$0xff] }
  0xa3   :  { %v301_v56 = vpack.c.bf16 %v189_v50, %v187_v49  ;;  %v114_v48 = vld [vmem:[%s2361_s0 + $0x318] sm:$0xff]  ;;  %v212_v49 = vld [vmem:[%s2361_s0 + $0x628] sm:$0xff] }
  0xa4   :  { %v214_v50 = vld [vmem:[%s2361_s0 + $0x638] sm:$0xff]  ;;  %v264_v53 = vpack.c.bf16 %v114_v48, %v112_v47 }
  0xa5   :  { %v314_v54 = vpack.c.bf16 %v214_v50, %v212_v49 }
  0xa9   :  { %587 = vmatmul.mubr.bf16.gmra.mxu0 %v241_v59  ;;  %787 = vmatmul.mubr.bf16.gmra.mxu1 %v291_v60  ;;  %v91_v59 = vld [vmem:[%s2361_s0 + $0x260] sm:$0xff]  ;;  %v93_v60 = vld [vmem:[%s2361_s0 + $0x270] sm:$0xff] }
  0xaa   :  { %594 = vmatprep.mubr.bf16.mxu0 %v244_v61  ;;  %794 = vmatprep.mubr.bf16.mxu1 %v294_v62  ;;  %v191_v61 = vld [vmem:[%s2361_s0 + $0x580] sm:$0xff]  ;;  %v193_v62 = vld [vmem:[%s2361_s0 + $0x590] sm:$0xff]  ;;  %v253_v3 = vpack.c.bf16 %v93_v60, %v91_v59 }
  0xab   :  { %v303_v4 = vpack.c.bf16 %v193_v62, %v191_v61  ;;  %v1858_v61 = vld [vmem:[%s2362_s2] ss:$0 sm:$0xff] }
  0xb1   :  { %595 = vmatmul.mubr.bf16.gmra.mxu0 %v243_v7  ;;  %795 = vmatmul.mubr.bf16.gmra.mxu1 %v293_v8  ;;  %v95_v7 = vld [vmem:[%s2361_s0 + $0x280] sm:$0xff]  ;;  %v97_v8 = vld [vmem:[%s2361_s0 + $0x290] sm:$0xff] }
  0xb2   :  { %602 = vmatprep.mubr.bf16.mxu0 %v246_v9  ;;  %802 = vmatprep.mubr.bf16.mxu1 %v296_v10  ;;  %v195_v9 = vld [vmem:[%s2361_s0 + $0x5a0] sm:$0xff]  ;;  %v197_v10 = vld [vmem:[%s2361_s0 + $0x5b0] sm:$0xff]  ;;  %v255_v15 = vpack.c.bf16 %v97_v8, %v95_v7 }
  0xb3   :  { %v305_v16 = vpack.c.bf16 %v197_v10, %v195_v9 }
  0xb9   :  { %603 = vmatmul.mubr.bf16.gmra.mxu0 %v245_v19  ;;  %803 = vmatmul.mubr.bf16.gmra.mxu1 %v295_v20  ;;  %v99_v19 = vld [vmem:[%s2361_s0 + $0x2a0] sm:$0xff]  ;;  %v101_v20 = vld [vmem:[%s2361_s0 + $0x2b0] sm:$0xff] }
  0xba   :  { %610 = vmatprep.mubr.bf16.mxu0 %v248_v21  ;;  %810 = vmatprep.mubr.bf16.mxu1 %v298_v22  ;;  %v199_v21 = vld [vmem:[%s2361_s0 + $0x5c0] sm:$0xff]  ;;  %v201_v22 = vld [vmem:[%s2361_s0 + $0x5d0] sm:$0xff]  ;;  %v257_v27 = vpack.c.bf16 %v101_v20, %v99_v19 }
  0xbb   :  { %v307_v28 = vpack.c.bf16 %v201_v22, %v199_v21 }
  0xc1   :  { %611 = vmatmul.mubr.bf16.gmra.mxu0 %v247_v31  ;;  %811 = vmatmul.mubr.bf16.gmra.mxu1 %v297_v32  ;;  %v103_v31 = vld [vmem:[%s2361_s0 + $0x2c0] sm:$0xff]  ;;  %v105_v32 = vld [vmem:[%s2361_s0 + $0x2d0] sm:$0xff] }
  0xc2   :  { %618 = vmatprep.mubr.bf16.mxu0 %v250_v33  ;;  %818 = vmatprep.mubr.bf16.mxu1 %v300_v34  ;;  %v203_v33 = vld [vmem:[%s2361_s0 + $0x5e0] sm:$0xff]  ;;  %v205_v34 = vld [vmem:[%s2361_s0 + $0x5f0] sm:$0xff]  ;;  %v259_v39 = vpack.c.bf16 %v105_v32, %v103_v31 }
  0xc3   :  { %v309_v40 = vpack.c.bf16 %v205_v34, %v203_v33 }
  0xc9   :  { %619 = vmatmul.mubr.bf16.gmra.mxu0 %v249_v43  ;;  %819 = vmatmul.mubr.bf16.gmra.mxu1 %v299_v44  ;;  %v107_v43 = vld [vmem:[%s2361_s0 + $0x2e0] sm:$0xff]  ;;  %v109_v44 = vld [vmem:[%s2361_s0 + $0x2f0] sm:$0xff] }
  0xca   :  { %626 = vmatprep.mubr.bf16.mxu0 %v252_v45  ;;  %826 = vmatprep.mubr.bf16.mxu1 %v302_v46  ;;  %v207_v45 = vld [vmem:[%s2361_s0 + $0x600] sm:$0xff]  ;;  %v209_v46 = vld [vmem:[%s2361_s0 + $0x610] sm:$0xff]  ;;  %v261_v51 = vpack.c.bf16 %v109_v44, %v107_v43 }
  0xcb   :  { %v311_v52 = vpack.c.bf16 %v209_v46, %v207_v45 }
  0xd1   :  { %627 = vmatmul.mubr.bf16.gmra.mxu0 %v251_v55  ;;  %827 = vmatmul.mubr.bf16.gmra.mxu1 %v301_v56  ;;  %v111_v55 = vld [vmem:[%s2361_s0 + $0x300] sm:$0xff]  ;;  %v113_v56 = vld [vmem:[%s2361_s0 + $0x310] sm:$0xff] }
  0xd2   :  { %634 = vmatprep.mubr.bf16.mxu0 %v254_v57  ;;  %834 = vmatprep.mubr.bf16.mxu1 %v304_v58  ;;  %v211_v57 = vld [vmem:[%s2361_s0 + $0x620] sm:$0xff]  ;;  %v213_v58 = vld [vmem:[%s2361_s0 + $0x630] sm:$0xff]  ;;  %v263_v59 = vpack.c.bf16 %v113_v56, %v111_v55 }
  0xd3   :  { %v313_v60 = vpack.c.bf16 %v213_v58, %v211_v57 }
  0xd9   :  { %635 = vmatmul.mubr.bf16.gmra.mxu0 %v253_v3  ;;  %835 = vmatmul.mubr.bf16.gmra.mxu1 %v303_v4 }
  0xda   :  { %642 = vmatprep.mubr.bf16.mxu0 %v256_v5  ;;  %842 = vmatprep.mubr.bf16.mxu1 %v306_v6 }
  0xe1   :  { %643 = vmatmul.mubr.bf16.gmra.mxu0 %v255_v15  ;;  %843 = vmatmul.mubr.bf16.gmra.mxu1 %v305_v16 }
  0xe2   :  { %650 = vmatprep.mubr.bf16.mxu0 %v258_v17  ;;  %850 = vmatprep.mubr.bf16.mxu1 %v308_v18 }
  0xe9   :  { %651 = vmatmul.mubr.bf16.gmra.mxu0 %v257_v27  ;;  %851 = vmatmul.mubr.bf16.gmra.mxu1 %v307_v28 }
  0xea   :  { %658 = vmatprep.mubr.bf16.mxu0 %v260_v29  ;;  %858 = vmatprep.mubr.bf16.mxu1 %v310_v30 }
  0xf1   :  { %659 = vmatmul.mubr.bf16.gmra.mxu0 %v259_v39  ;;  %859 = vmatmul.mubr.bf16.gmra.mxu1 %v309_v40 }
  0xf2   :  { %666 = vmatprep.mubr.bf16.mxu0 %v262_v41  ;;  %866 = vmatprep.mubr.bf16.mxu1 %v312_v42 }
  0xf9   :  { %667 = vmatmul.mubr.bf16.gmra.mxu0 %v261_v51  ;;  %867 = vmatmul.mubr.bf16.gmra.mxu1 %v311_v52 }
  0xfa   :  { %674 = vmatprep.mubr.bf16.mxu0 %v264_v53  ;;  %874 = vmatprep.mubr.bf16.mxu1 %v314_v54 }
 0x101   :  { %v484_v62 = vpop.f32.mrf.mxu0  ;;  %675 = vmatmul.mubr.bf16.gmra.mxu0 %v263_v59  ;;  %v684_v63 = vpop.f32.mrf.mxu1  ;;  %875 = vmatmul.mubr.bf16.gmra.mxu1 %v313_v60 }
 0x102   :  { %v485_v0 = vadd.f32 %v1858_v61, %v484_v62  ;;  %v685_v1 = vadd.f32 %v1858_v61, %v684_v63 }
 0x103   :  { %v486_v2 = vpop.f32.mrf.mxu0  ;;  %v686_v3 = vpop.f32.mrf.mxu1 }
 0x104   :  { %v883_v4 = vmax.f32 %v485_v0, 0.0  ;;  %v933_v5 = vmax.f32 %v685_v1, 0.0 }
 0x105   :  { %v487_v6 = vpop.f32.mrf.mxu0  ;;  %v687_v7 = vpop.f32.mrf.mxu1 }
 0x106   :  { %984 = vst.msk [vmem:[%s2363_s3] sm:$0xff] %vm983_vm0, %v883_v4  ;;  %1034 = vst.msk [vmem:[%s2363_s3 + $0x190] sm:$0xff] %vm983_vm0, %v933_v5  ;;  %v488_v8 = vadd.f32 %v1858_v61, %v487_v6  ;;  %v688_v9 = vadd.f32 %v1858_v61, %v687_v7 }
 0x107   :  { %v489_v10 = vpop.f32.mrf.mxu0  ;;  %v689_v11 = vpop.f32.mrf.mxu1 }
 0x108   :  { %v884_v12 = vmax.f32 %v488_v8, 0.0  ;;  %v934_v13 = vmax.f32 %v688_v9, 0.0 }
 0x109   :  { %v492_v14 = vpop.f32.mrf.mxu0  ;;  %v692_v15 = vpop.f32.mrf.mxu1 }
 0x10a   :  { %985 = vst.msk [vmem:[%s2363_s3 + $0x8] sm:$0xff] %vm983_vm0, %v884_v12  ;;  %1035 = vst.msk [vmem:[%s2363_s3 + $0x198] sm:$0xff] %vm983_vm0, %v934_v13  ;;  %v493_v16 = vadd.f32 %v1858_v61, %v492_v14  ;;  %v693_v17 = vadd.f32 %v1858_v61, %v692_v15 }
 0x10b   :  { %v494_v18 = vpop.f32.mrf.mxu0  ;;  %v694_v19 = vpop.f32.mrf.mxu1 }
 0x10c   :  { %v885_v20 = vmax.f32 %v493_v16, 0.0  ;;  %v935_v21 = vmax.f32 %v693_v17, 0.0 }
 0x10d   :  { %v495_v22 = vpop.f32.mrf.mxu0  ;;  %v695_v23 = vpop.f32.mrf.mxu1 }
 0x10e   :  { %986 = vst.msk [vmem:[%s2363_s3 + $0x10] sm:$0xff] %vm983_vm0, %v885_v20  ;;  %1036 = vst.msk [vmem:[%s2363_s3 + $0x1a0] sm:$0xff] %vm983_vm0, %v935_v21  ;;  %v496_v24 = vadd.f32 %v1858_v61, %v495_v22  ;;  %v696_v25 = vadd.f32 %v1858_v61, %v695_v23 }
 0x10f   :  { %v497_v26 = vpop.f32.mrf.mxu0  ;;  %v697_v27 = vpop.f32.mrf.mxu1 }
 0x110   :  { %v886_v28 = vmax.f32 %v496_v24, 0.0  ;;  %v936_v29 = vmax.f32 %v696_v25, 0.0 }
 0x111   :  { %v500_v30 = vpop.f32.mrf.mxu0  ;;  %v700_v31 = vpop.f32.mrf.mxu1 }
 0x112   :  { %987 = vst.msk [vmem:[%s2363_s3 + $0x18] sm:$0xff] %vm983_vm0, %v886_v28  ;;  %1037 = vst.msk [vmem:[%s2363_s3 + $0x1a8] sm:$0xff] %vm983_vm0, %v936_v29  ;;  %v501_v32 = vadd.f32 %v1858_v61, %v500_v30  ;;  %v701_v33 = vadd.f32 %v1858_v61, %v700_v31 }
 0x113   :  { %v502_v34 = vpop.f32.mrf.mxu0  ;;  %v702_v35 = vpop.f32.mrf.mxu1 }
 0x114   :  { %v887_v36 = vmax.f32 %v501_v32, 0.0  ;;  %v937_v37 = vmax.f32 %v701_v33, 0.0 }
 0x115   :  { %v503_v38 = vpop.f32.mrf.mxu0  ;;  %v703_v39 = vpop.f32.mrf.mxu1 }
 0x116   :  { %988 = vst.msk [vmem:[%s2363_s3 + $0x20] sm:$0xff] %vm983_vm0, %v887_v36  ;;  %1038 = vst.msk [vmem:[%s2363_s3 + $0x1b0] sm:$0xff] %vm983_vm0, %v937_v37  ;;  %v504_v40 = vadd.f32 %v1858_v61, %v503_v38  ;;  %v704_v41 = vadd.f32 %v1858_v61, %v703_v39 }
 0x117   :  { %v505_v42 = vpop.f32.mrf.mxu0  ;;  %v705_v43 = vpop.f32.mrf.mxu1 }
 0x118   :  { %v888_v44 = vmax.f32 %v504_v40, 0.0  ;;  %v938_v45 = vmax.f32 %v704_v41, 0.0 }
 0x119   :  { %v508_v46 = vpop.f32.mrf.mxu0  ;;  %v708_v47 = vpop.f32.mrf.mxu1 }
 0x11a   :  { %989 = vst.msk [vmem:[%s2363_s3 + $0x28] sm:$0xff] %vm983_vm0, %v888_v44  ;;  %1039 = vst.msk [vmem:[%s2363_s3 + $0x1b8] sm:$0xff] %vm983_vm0, %v938_v45  ;;  %v509_v48 = vadd.f32 %v1858_v61, %v508_v46  ;;  %v709_v49 = vadd.f32 %v1858_v61, %v708_v47 }
 0x11b   :  { %v510_v50 = vpop.f32.mrf.mxu0  ;;  %v710_v51 = vpop.f32.mrf.mxu1 }
 0x11c   :  { %v889_v52 = vmax.f32 %v509_v48, 0.0  ;;  %v939_v53 = vmax.f32 %v709_v49, 0.0 }
 0x11d   :  { %v511_v54 = vpop.f32.mrf.mxu0  ;;  %v711_v55 = vpop.f32.mrf.mxu1 }
 0x11e   :  { %990 = vst.msk [vmem:[%s2363_s3 + $0x30] sm:$0xff] %vm983_vm0, %v889_v52  ;;  %1040 = vst.msk [vmem:[%s2363_s3 + $0x1c0] sm:$0xff] %vm983_vm0, %v939_v53  ;;  %v512_v56 = vadd.f32 %v1858_v61, %v511_v54  ;;  %v712_v57 = vadd.f32 %v1858_v61, %v711_v55 }
 0x11f   :  { %v513_v58 = vpop.f32.mrf.mxu0  ;;  %v713_v59 = vpop.f32.mrf.mxu1 }
 0x120   :  { %v890_v60 = vmax.f32 %v512_v56, 0.0  ;;  %v940_v62 = vmax.f32 %v712_v57, 0.0 }
 0x121   :  { %v516_v63 = vpop.f32.mrf.mxu0  ;;  %v716_v0 = vpop.f32.mrf.mxu1 }
 0x122   :  { %991 = vst.msk [vmem:[%s2363_s3 + $0x38] sm:$0xff] %vm983_vm0, %v890_v60  ;;  %1041 = vst.msk [vmem:[%s2363_s3 + $0x1c8] sm:$0xff] %vm983_vm0, %v940_v62  ;;  %v517_v1 = vadd.f32 %v1858_v61, %v516_v63  ;;  %v717_v2 = vadd.f32 %v1858_v61, %v716_v0 }
 0x123   :  { %v518_v3 = vpop.f32.mrf.mxu0  ;;  %v718_v4 = vpop.f32.mrf.mxu1 }
 0x124   :  { %v891_v5 = vmax.f32 %v517_v1, 0.0  ;;  %v941_v6 = vmax.f32 %v717_v2, 0.0 }
 0x125   :  { %v519_v7 = vpop.f32.mrf.mxu0  ;;  %v719_v8 = vpop.f32.mrf.mxu1 }
 0x126   :  { %992 = vst.msk [vmem:[%s2363_s3 + $0x40] sm:$0xff] %vm983_vm0, %v891_v5  ;;  %1042 = vst.msk [vmem:[%s2363_s3 + $0x1d0] sm:$0xff] %vm983_vm0, %v941_v6  ;;  %v520_v9 = vadd.f32 %v1858_v61, %v519_v7  ;;  %v720_v10 = vadd.f32 %v1858_v61, %v719_v8 }
 0x127   :  { %v521_v11 = vpop.f32.mrf.mxu0  ;;  %v721_v12 = vpop.f32.mrf.mxu1 }
 0x128   :  { %v892_v13 = vmax.f32 %v520_v9, 0.0  ;;  %v942_v14 = vmax.f32 %v720_v10, 0.0 }
 0x129   :  { %v524_v15 = vpop.f32.mrf.mxu0  ;;  %v724_v16 = vpop.f32.mrf.mxu1 }
 0x12a   :  { %993 = vst.msk [vmem:[%s2363_s3 + $0x48] sm:$0xff] %vm983_vm0, %v892_v13  ;;  %1043 = vst.msk [vmem:[%s2363_s3 + $0x1d8] sm:$0xff] %vm983_vm0, %v942_v14  ;;  %v525_v17 = vadd.f32 %v1858_v61, %v524_v15  ;;  %v725_v18 = vadd.f32 %v1858_v61, %v724_v16 }
 0x12b   :  { %v526_v19 = vpop.f32.mrf.mxu0  ;;  %v726_v20 = vpop.f32.mrf.mxu1 }
 0x12c   :  { %v893_v21 = vmax.f32 %v525_v17, 0.0  ;;  %v943_v22 = vmax.f32 %v725_v18, 0.0 }
 0x12d   :  { %v527_v23 = vpop.f32.mrf.mxu0  ;;  %v727_v24 = vpop.f32.mrf.mxu1 }
 0x12e   :  { %994 = vst.msk [vmem:[%s2363_s3 + $0x50] sm:$0xff] %vm983_vm0, %v893_v21  ;;  %1044 = vst.msk [vmem:[%s2363_s3 + $0x1e0] sm:$0xff] %vm983_vm0, %v943_v22  ;;  %v528_v25 = vadd.f32 %v1858_v61, %v527_v23  ;;  %v728_v26 = vadd.f32 %v1858_v61, %v727_v24 }
 0x12f   :  { %v529_v27 = vpop.f32.mrf.mxu0  ;;  %v729_v28 = vpop.f32.mrf.mxu1 }
 0x130   :  { %v894_v29 = vmax.f32 %v528_v25, 0.0  ;;  %v944_v30 = vmax.f32 %v728_v26, 0.0 }
 0x131   :  { %v532_v31 = vpop.f32.mrf.mxu0  ;;  %v732_v32 = vpop.f32.mrf.mxu1 }
 0x132   :  { %995 = vst.msk [vmem:[%s2363_s3 + $0x58] sm:$0xff] %vm983_vm0, %v894_v29  ;;  %1045 = vst.msk [vmem:[%s2363_s3 + $0x1e8] sm:$0xff] %vm983_vm0, %v944_v30  ;;  %v533_v33 = vadd.f32 %v1858_v61, %v532_v31  ;;  %v733_v34 = vadd.f32 %v1858_v61, %v732_v32 }
 0x133   :  { %v534_v35 = vpop.f32.mrf.mxu0  ;;  %v734_v36 = vpop.f32.mrf.mxu1 }
 0x134   :  { %v895_v37 = vmax.f32 %v533_v33, 0.0  ;;  %v945_v38 = vmax.f32 %v733_v34, 0.0 }
 0x135   :  { %v535_v39 = vpop.f32.mrf.mxu0  ;;  %v735_v40 = vpop.f32.mrf.mxu1 }
 0x136   :  { %996 = vst.msk [vmem:[%s2363_s3 + $0x60] sm:$0xff] %vm983_vm0, %v895_v37  ;;  %1046 = vst.msk [vmem:[%s2363_s3 + $0x1f0] sm:$0xff] %vm983_vm0, %v945_v38  ;;  %v536_v41 = vadd.f32 %v1858_v61, %v535_v39  ;;  %v736_v42 = vadd.f32 %v1858_v61, %v735_v40 }
 0x137   :  { %v537_v43 = vpop.f32.mrf.mxu0  ;;  %v737_v44 = vpop.f32.mrf.mxu1 }
 0x138   :  { %v896_v45 = vmax.f32 %v536_v41, 0.0  ;;  %v946_v46 = vmax.f32 %v736_v42, 0.0 }
 0x139   :  { %v540_v47 = vpop.f32.mrf.mxu0  ;;  %v740_v48 = vpop.f32.mrf.mxu1 }
 0x13a   :  { %997 = vst.msk [vmem:[%s2363_s3 + $0x68] sm:$0xff] %vm983_vm0, %v896_v45  ;;  %1047 = vst.msk [vmem:[%s2363_s3 + $0x1f8] sm:$0xff] %vm983_vm0, %v946_v46  ;;  %v541_v49 = vadd.f32 %v1858_v61, %v540_v47  ;;  %v741_v50 = vadd.f32 %v1858_v61, %v740_v48 }
 0x13b   :  { %v542_v51 = vpop.f32.mrf.mxu0  ;;  %v742_v52 = vpop.f32.mrf.mxu1 }
 0x13c   :  { %v897_v53 = vmax.f32 %v541_v49, 0.0  ;;  %v947_v54 = vmax.f32 %v741_v50, 0.0 }
 0x13d   :  { %v543_v55 = vpop.f32.mrf.mxu0  ;;  %v743_v56 = vpop.f32.mrf.mxu1 }
 0x13e   :  { %998 = vst.msk [vmem:[%s2363_s3 + $0x70] sm:$0xff] %vm983_vm0, %v897_v53  ;;  %1048 = vst.msk [vmem:[%s2363_s3 + $0x200] sm:$0xff] %vm983_vm0, %v947_v54  ;;  %v544_v57 = vadd.f32 %v1858_v61, %v543_v55  ;;  %v744_v58 = vadd.f32 %v1858_v61, %v743_v56 }
 0x13f   :  { %v545_v59 = vpop.f32.mrf.mxu0  ;;  %v745_v60 = vpop.f32.mrf.mxu1 }
 0x140   :  { %v898_v62 = vmax.f32 %v544_v57, 0.0  ;;  %v948_v63 = vmax.f32 %v744_v58, 0.0 }
 0x141   :  { %v548_v0 = vpop.f32.mrf.mxu0  ;;  %v748_v1 = vpop.f32.mrf.mxu1 }
 0x142   :  { %999 = vst.msk [vmem:[%s2363_s3 + $0x78] sm:$0xff] %vm983_vm0, %v898_v62  ;;  %1049 = vst.msk [vmem:[%s2363_s3 + $0x208] sm:$0xff] %vm983_vm0, %v948_v63  ;;  %v549_v2 = vadd.f32 %v1858_v61, %v548_v0  ;;  %v749_v3 = vadd.f32 %v1858_v61, %v748_v1 }
 0x143   :  { %v550_v4 = vpop.f32.mrf.mxu0  ;;  %v750_v5 = vpop.f32.mrf.mxu1 }
 0x144   :  { %v899_v6 = vmax.f32 %v549_v2, 0.0  ;;  %v949_v7 = vmax.f32 %v749_v3, 0.0 }
 0x145   :  { %v551_v8 = vpop.f32.mrf.mxu0  ;;  %v751_v9 = vpop.f32.mrf.mxu1 }
 0x146   :  { %1000 = vst.msk [vmem:[%s2363_s3 + $0x80] sm:$0xff] %vm983_vm0, %v899_v6  ;;  %1050 = vst.msk [vmem:[%s2363_s3 + $0x210] sm:$0xff] %vm983_vm0, %v949_v7  ;;  %v552_v10 = vadd.f32 %v1858_v61, %v551_v8  ;;  %v752_v11 = vadd.f32 %v1858_v61, %v751_v9 }
 0x147   :  { %v553_v12 = vpop.f32.mrf.mxu0  ;;  %v753_v13 = vpop.f32.mrf.mxu1 }
 0x148   :  { %v900_v14 = vmax.f32 %v552_v10, 0.0  ;;  %v950_v15 = vmax.f32 %v752_v11, 0.0 }
 0x149   :  { %v556_v16 = vpop.f32.mrf.mxu0  ;;  %v756_v17 = vpop.f32.mrf.mxu1 }
 0x14a   :  { %1001 = vst.msk [vmem:[%s2363_s3 + $0x88] sm:$0xff] %vm983_vm0, %v900_v14  ;;  %1051 = vst.msk [vmem:[%s2363_s3 + $0x218] sm:$0xff] %vm983_vm0, %v950_v15  ;;  %v557_v18 = vadd.f32 %v1858_v61, %v556_v16  ;;  %v757_v19 = vadd.f32 %v1858_v61, %v756_v17 }
 0x14b   :  { %v558_v20 = vpop.f32.mrf.mxu0  ;;  %v758_v21 = vpop.f32.mrf.mxu1 }
 0x14c   :  { %v901_v22 = vmax.f32 %v557_v18, 0.0  ;;  %v951_v23 = vmax.f32 %v757_v19, 0.0 }
 0x14d   :  { %v559_v24 = vpop.f32.mrf.mxu0  ;;  %v759_v25 = vpop.f32.mrf.mxu1 }
 0x14e   :  { %1002 = vst.msk [vmem:[%s2363_s3 + $0x90] sm:$0xff] %vm983_vm0, %v901_v22  ;;  %1052 = vst.msk [vmem:[%s2363_s3 + $0x220] sm:$0xff] %vm983_vm0, %v951_v23  ;;  %v560_v26 = vadd.f32 %v1858_v61, %v559_v24  ;;  %v760_v27 = vadd.f32 %v1858_v61, %v759_v25 }
 0x14f   :  { %v561_v28 = vpop.f32.mrf.mxu0  ;;  %v761_v29 = vpop.f32.mrf.mxu1 }
 0x150   :  { %v902_v30 = vmax.f32 %v560_v26, 0.0  ;;  %v952_v31 = vmax.f32 %v760_v27, 0.0 }
 0x151   :  { %v564_v32 = vpop.f32.mrf.mxu0  ;;  %v764_v33 = vpop.f32.mrf.mxu1 }
 0x152   :  { %1003 = vst.msk [vmem:[%s2363_s3 + $0x98] sm:$0xff] %vm983_vm0, %v902_v30  ;;  %1053 = vst.msk [vmem:[%s2363_s3 + $0x228] sm:$0xff] %vm983_vm0, %v952_v31  ;;  %v565_v34 = vadd.f32 %v1858_v61, %v564_v32  ;;  %v765_v35 = vadd.f32 %v1858_v61, %v764_v33 }
 0x153   :  { %v566_v36 = vpop.f32.mrf.mxu0  ;;  %v766_v37 = vpop.f32.mrf.mxu1 }
 0x154   :  { %v903_v38 = vmax.f32 %v565_v34, 0.0  ;;  %v953_v39 = vmax.f32 %v765_v35, 0.0 }
 0x155   :  { %v567_v40 = vpop.f32.mrf.mxu0  ;;  %v767_v41 = vpop.f32.mrf.mxu1 }
 0x156   :  { %1004 = vst.msk [vmem:[%s2363_s3 + $0xa0] sm:$0xff] %vm983_vm0, %v903_v38  ;;  %1054 = vst.msk [vmem:[%s2363_s3 + $0x230] sm:$0xff] %vm983_vm0, %v953_v39  ;;  %v568_v42 = vadd.f32 %v1858_v61, %v567_v40  ;;  %v768_v43 = vadd.f32 %v1858_v61, %v767_v41 }
 0x157   :  { %v569_v44 = vpop.f32.mrf.mxu0  ;;  %v769_v45 = vpop.f32.mrf.mxu1 }
 0x158   :  { %v904_v46 = vmax.f32 %v568_v42, 0.0  ;;  %v954_v47 = vmax.f32 %v768_v43, 0.0 }
 0x159   :  { %v572_v48 = vpop.f32.mrf.mxu0  ;;  %v772_v49 = vpop.f32.mrf.mxu1 }
 0x15a   :  { %1005 = vst.msk [vmem:[%s2363_s3 + $0xa8] sm:$0xff] %vm983_vm0, %v904_v46  ;;  %1055 = vst.msk [vmem:[%s2363_s3 + $0x238] sm:$0xff] %vm983_vm0, %v954_v47  ;;  %v573_v50 = vadd.f32 %v1858_v61, %v572_v48  ;;  %v773_v51 = vadd.f32 %v1858_v61, %v772_v49 }
 0x15b   :  { %v574_v52 = vpop.f32.mrf.mxu0  ;;  %v774_v53 = vpop.f32.mrf.mxu1 }
 0x15c   :  { %v905_v54 = vmax.f32 %v573_v50, 0.0  ;;  %v955_v55 = vmax.f32 %v773_v51, 0.0 }
 0x15d   :  { %v575_v56 = vpop.f32.mrf.mxu0  ;;  %v775_v57 = vpop.f32.mrf.mxu1 }
 0x15e   :  { %1006 = vst.msk [vmem:[%s2363_s3 + $0xb0] sm:$0xff] %vm983_vm0, %v905_v54  ;;  %1056 = vst.msk [vmem:[%s2363_s3 + $0x240] sm:$0xff] %vm983_vm0, %v955_v55  ;;  %v576_v58 = vadd.f32 %v1858_v61, %v575_v56  ;;  %v776_v59 = vadd.f32 %v1858_v61, %v775_v57 }
 0x15f   :  { %v577_v60 = vpop.f32.mrf.mxu0  ;;  %v777_v62 = vpop.f32.mrf.mxu1 }
 0x160   :  { %v906_v63 = vmax.f32 %v576_v58, 0.0  ;;  %v956_v0 = vmax.f32 %v776_v59, 0.0 }
 0x161   :  { %v580_v1 = vpop.f32.mrf.mxu0  ;;  %v780_v2 = vpop.f32.mrf.mxu1 }
 0x162   :  { %1007 = vst.msk [vmem:[%s2363_s3 + $0xb8] sm:$0xff] %vm983_vm0, %v906_v63  ;;  %1057 = vst.msk [vmem:[%s2363_s3 + $0x248] sm:$0xff] %vm983_vm0, %v956_v0  ;;  %v581_v3 = vadd.f32 %v1858_v61, %v580_v1  ;;  %v781_v4 = vadd.f32 %v1858_v61, %v780_v2 }
 0x163   :  { %v582_v5 = vpop.f32.mrf.mxu0  ;;  %v782_v6 = vpop.f32.mrf.mxu1 }
 0x164   :  { %v907_v7 = vmax.f32 %v581_v3, 0.0  ;;  %v957_v8 = vmax.f32 %v781_v4, 0.0 }
 0x165   :  { %v583_v9 = vpop.f32.mrf.mxu0  ;;  %v783_v10 = vpop.f32.mrf.mxu1 }
 0x166   :  { %1008 = vst.msk [vmem:[%s2363_s3 + $0xc0] sm:$0xff] %vm983_vm0, %v907_v7  ;;  %1058 = vst.msk [vmem:[%s2363_s3 + $0x250] sm:$0xff] %vm983_vm0, %v957_v8  ;;  %v584_v11 = vadd.f32 %v1858_v61, %v583_v9  ;;  %v784_v12 = vadd.f32 %v1858_v61, %v783_v10 }
 0x167   :  { %v585_v13 = vpop.f32.mrf.mxu0  ;;  %v785_v14 = vpop.f32.mrf.mxu1 }
 0x168   :  { %v908_v15 = vmax.f32 %v584_v11, 0.0  ;;  %v958_v16 = vmax.f32 %v784_v12, 0.0 }
 0x169   :  { %v588_v17 = vpop.f32.mrf.mxu0  ;;  %v788_v18 = vpop.f32.mrf.mxu1 }
 0x16a   :  { %1009 = vst.msk [vmem:[%s2363_s3 + $0xc8] sm:$0xff] %vm983_vm0, %v908_v15  ;;  %1059 = vst.msk [vmem:[%s2363_s3 + $0x258] sm:$0xff] %vm983_vm0, %v958_v16  ;;  %v589_v19 = vadd.f32 %v1858_v61, %v588_v17  ;;  %v789_v20 = vadd.f32 %v1858_v61, %v788_v18 }
 0x16b   :  { %v590_v21 = vpop.f32.mrf.mxu0  ;;  %v790_v22 = vpop.f32.mrf.mxu1 }
 0x16c   :  { %v909_v23 = vmax.f32 %v589_v19, 0.0  ;;  %v959_v24 = vmax.f32 %v789_v20, 0.0 }
 0x16d   :  { %v591_v25 = vpop.f32.mrf.mxu0  ;;  %v791_v26 = vpop.f32.mrf.mxu1 }
 0x16e   :  { %1010 = vst.msk [vmem:[%s2363_s3 + $0xd0] sm:$0xff] %vm983_vm0, %v909_v23  ;;  %1060 = vst.msk [vmem:[%s2363_s3 + $0x260] sm:$0xff] %vm983_vm0, %v959_v24  ;;  %v592_v27 = vadd.f32 %v1858_v61, %v591_v25  ;;  %v792_v28 = vadd.f32 %v1858_v61, %v791_v26 }
 0x16f   :  { %v593_v29 = vpop.f32.mrf.mxu0  ;;  %v793_v30 = vpop.f32.mrf.mxu1 }
 0x170   :  { %v910_v31 = vmax.f32 %v592_v27, 0.0  ;;  %v960_v32 = vmax.f32 %v792_v28, 0.0 }
 0x171   :  { %v596_v33 = vpop.f32.mrf.mxu0  ;;  %v796_v34 = vpop.f32.mrf.mxu1 }
 0x172   :  { %1011 = vst.msk [vmem:[%s2363_s3 + $0xd8] sm:$0xff] %vm983_vm0, %v910_v31  ;;  %1061 = vst.msk [vmem:[%s2363_s3 + $0x268] sm:$0xff] %vm983_vm0, %v960_v32  ;;  %v597_v35 = vadd.f32 %v1858_v61, %v596_v33  ;;  %v797_v36 = vadd.f32 %v1858_v61, %v796_v34 }
 0x173   :  { %v598_v37 = vpop.f32.mrf.mxu0  ;;  %v798_v38 = vpop.f32.mrf.mxu1 }
 0x174   :  { %v911_v39 = vmax.f32 %v597_v35, 0.0  ;;  %v961_v40 = vmax.f32 %v797_v36, 0.0 }
 0x175   :  { %v599_v41 = vpop.f32.mrf.mxu0  ;;  %v799_v42 = vpop.f32.mrf.mxu1 }
 0x176   :  { %1012 = vst.msk [vmem:[%s2363_s3 + $0xe0] sm:$0xff] %vm983_vm0, %v911_v39  ;;  %1062 = vst.msk [vmem:[%s2363_s3 + $0x270] sm:$0xff] %vm983_vm0, %v961_v40  ;;  %v600_v43 = vadd.f32 %v1858_v61, %v599_v41  ;;  %v800_v44 = vadd.f32 %v1858_v61, %v799_v42 }
 0x177   :  { %v601_v45 = vpop.f32.mrf.mxu0  ;;  %v801_v46 = vpop.f32.mrf.mxu1 }
 0x178   :  { %v912_v47 = vmax.f32 %v600_v43, 0.0  ;;  %v962_v48 = vmax.f32 %v800_v44, 0.0 }
 0x179   :  { %v604_v49 = vpop.f32.mrf.mxu0  ;;  %v804_v50 = vpop.f32.mrf.mxu1 }
 0x17a   :  { %1013 = vst.msk [vmem:[%s2363_s3 + $0xe8] sm:$0xff] %vm983_vm0, %v912_v47  ;;  %1063 = vst.msk [vmem:[%s2363_s3 + $0x278] sm:$0xff] %vm983_vm0, %v962_v48  ;;  %v605_v51 = vadd.f32 %v1858_v61, %v604_v49  ;;  %v805_v52 = vadd.f32 %v1858_v61, %v804_v50 }
 0x17b   :  { %v606_v53 = vpop.f32.mrf.mxu0  ;;  %v806_v54 = vpop.f32.mrf.mxu1 }
 0x17c   :  { %v913_v55 = vmax.f32 %v605_v51, 0.0  ;;  %v963_v56 = vmax.f32 %v805_v52, 0.0 }
 0x17d   :  { %v607_v57 = vpop.f32.mrf.mxu0  ;;  %v807_v58 = vpop.f32.mrf.mxu1 }
 0x17e   :  { %1014 = vst.msk [vmem:[%s2363_s3 + $0xf0] sm:$0xff] %vm983_vm0, %v913_v55  ;;  %1064 = vst.msk [vmem:[%s2363_s3 + $0x280] sm:$0xff] %vm983_vm0, %v963_v56  ;;  %v608_v59 = vadd.f32 %v1858_v61, %v607_v57  ;;  %v808_v60 = vadd.f32 %v1858_v61, %v807_v58 }
 0x17f   :  { %v609_v62 = vpop.f32.mrf.mxu0  ;;  %v809_v63 = vpop.f32.mrf.mxu1 }
 0x180   :  { %v914_v0 = vmax.f32 %v608_v59, 0.0  ;;  %v964_v1 = vmax.f32 %v808_v60, 0.0 }
 0x181   :  { %v612_v2 = vpop.f32.mrf.mxu0  ;;  %v812_v3 = vpop.f32.mrf.mxu1 }
 0x182   :  { %1015 = vst.msk [vmem:[%s2363_s3 + $0xf8] sm:$0xff] %vm983_vm0, %v914_v0  ;;  %1065 = vst.msk [vmem:[%s2363_s3 + $0x288] sm:$0xff] %vm983_vm0, %v964_v1  ;;  %v613_v4 = vadd.f32 %v1858_v61, %v612_v2  ;;  %v813_v5 = vadd.f32 %v1858_v61, %v812_v3 }
 0x183   :  { %v614_v6 = vpop.f32.mrf.mxu0  ;;  %v814_v7 = vpop.f32.mrf.mxu1 }
 0x184   :  { %v915_v8 = vmax.f32 %v613_v4, 0.0  ;;  %v965_v9 = vmax.f32 %v813_v5, 0.0 }
 0x185   :  { %v615_v10 = vpop.f32.mrf.mxu0  ;;  %v815_v11 = vpop.f32.mrf.mxu1 }
 0x186   :  { %1016 = vst.msk [vmem:[%s2363_s3 + $0x100] sm:$0xff] %vm983_vm0, %v915_v8  ;;  %1066 = vst.msk [vmem:[%s2363_s3 + $0x290] sm:$0xff] %vm983_vm0, %v965_v9  ;;  %v616_v12 = vadd.f32 %v1858_v61, %v615_v10  ;;  %v816_v13 = vadd.f32 %v1858_v61, %v815_v11 }
 0x187   :  { %v617_v14 = vpop.f32.mrf.mxu0  ;;  %v817_v15 = vpop.f32.mrf.mxu1 }
 0x188   :  { %v916_v16 = vmax.f32 %v616_v12, 0.0  ;;  %v966_v17 = vmax.f32 %v816_v13, 0.0 }
 0x189   :  { %v620_v18 = vpop.f32.mrf.mxu0  ;;  %v820_v19 = vpop.f32.mrf.mxu1 }
 0x18a   :  { %1017 = vst.msk [vmem:[%s2363_s3 + $0x108] sm:$0xff] %vm983_vm0, %v916_v16  ;;  %1067 = vst.msk [vmem:[%s2363_s3 + $0x298] sm:$0xff] %vm983_vm0, %v966_v17  ;;  %v621_v20 = vadd.f32 %v1858_v61, %v620_v18  ;;  %v821_v21 = vadd.f32 %v1858_v61, %v820_v19 }
 0x18b   :  { %v622_v22 = vpop.f32.mrf.mxu0  ;;  %v822_v23 = vpop.f32.mrf.mxu1 }
 0x18c   :  { %v917_v24 = vmax.f32 %v621_v20, 0.0  ;;  %v967_v25 = vmax.f32 %v821_v21, 0.0 }
 0x18d   :  { %v623_v26 = vpop.f32.mrf.mxu0  ;;  %v823_v27 = vpop.f32.mrf.mxu1 }
 0x18e   :  { %1018 = vst.msk [vmem:[%s2363_s3 + $0x110] sm:$0xff] %vm983_vm0, %v917_v24  ;;  %1068 = vst.msk [vmem:[%s2363_s3 + $0x2a0] sm:$0xff] %vm983_vm0, %v967_v25  ;;  %v624_v28 = vadd.f32 %v1858_v61, %v623_v26  ;;  %v824_v29 = vadd.f32 %v1858_v61, %v823_v27 }
 0x18f   :  { %v625_v30 = vpop.f32.mrf.mxu0  ;;  %v825_v31 = vpop.f32.mrf.mxu1 }
 0x190   :  { %v918_v32 = vmax.f32 %v624_v28, 0.0  ;;  %v968_v33 = vmax.f32 %v824_v29, 0.0 }
 0x191   :  { %v628_v34 = vpop.f32.mrf.mxu0  ;;  %v828_v35 = vpop.f32.mrf.mxu1 }
 0x192   :  { %1019 = vst.msk [vmem:[%s2363_s3 + $0x118] sm:$0xff] %vm983_vm0, %v918_v32  ;;  %1069 = vst.msk [vmem:[%s2363_s3 + $0x2a8] sm:$0xff] %vm983_vm0, %v968_v33  ;;  %v629_v36 = vadd.f32 %v1858_v61, %v628_v34  ;;  %v829_v37 = vadd.f32 %v1858_v61, %v828_v35 }
 0x193   :  { %v630_v38 = vpop.f32.mrf.mxu0  ;;  %v830_v39 = vpop.f32.mrf.mxu1 }
 0x194   :  { %v919_v40 = vmax.f32 %v629_v36, 0.0  ;;  %v969_v41 = vmax.f32 %v829_v37, 0.0 }
 0x195   :  { %v631_v42 = vpop.f32.mrf.mxu0  ;;  %v831_v43 = vpop.f32.mrf.mxu1 }
 0x196   :  { %1020 = vst.msk [vmem:[%s2363_s3 + $0x120] sm:$0xff] %vm983_vm0, %v919_v40  ;;  %1070 = vst.msk [vmem:[%s2363_s3 + $0x2b0] sm:$0xff] %vm983_vm0, %v969_v41  ;;  %v632_v44 = vadd.f32 %v1858_v61, %v631_v42  ;;  %v832_v45 = vadd.f32 %v1858_v61, %v831_v43 }
 0x197   :  { %v633_v46 = vpop.f32.mrf.mxu0  ;;  %v833_v47 = vpop.f32.mrf.mxu1 }
 0x198   :  { %v920_v48 = vmax.f32 %v632_v44, 0.0  ;;  %v970_v49 = vmax.f32 %v832_v45, 0.0 }
 0x199   :  { %v636_v50 = vpop.f32.mrf.mxu0  ;;  %v836_v51 = vpop.f32.mrf.mxu1 }
 0x19a   :  { %1021 = vst.msk [vmem:[%s2363_s3 + $0x128] sm:$0xff] %vm983_vm0, %v920_v48  ;;  %1071 = vst.msk [vmem:[%s2363_s3 + $0x2b8] sm:$0xff] %vm983_vm0, %v970_v49  ;;  %v637_v52 = vadd.f32 %v1858_v61, %v636_v50  ;;  %v837_v53 = vadd.f32 %v1858_v61, %v836_v51 }
 0x19b   :  { %v638_v54 = vpop.f32.mrf.mxu0  ;;  %v838_v55 = vpop.f32.mrf.mxu1 }
 0x19c   :  { %v921_v56 = vmax.f32 %v637_v52, 0.0  ;;  %v971_v57 = vmax.f32 %v837_v53, 0.0 }
 0x19d   :  { %v639_v58 = vpop.f32.mrf.mxu0  ;;  %v839_v59 = vpop.f32.mrf.mxu1 }
 0x19e   :  { %1022 = vst.msk [vmem:[%s2363_s3 + $0x130] sm:$0xff] %vm983_vm0, %v921_v56  ;;  %1072 = vst.msk [vmem:[%s2363_s3 + $0x2c0] sm:$0xff] %vm983_vm0, %v971_v57  ;;  %v640_v60 = vadd.f32 %v1858_v61, %v639_v58  ;;  %v840_v62 = vadd.f32 %v1858_v61, %v839_v59 }
 0x19f   :  { %v641_v63 = vpop.f32.mrf.mxu0  ;;  %v841_v0 = vpop.f32.mrf.mxu1 }
 0x1a0   :  { %v922_v1 = vmax.f32 %v640_v60, 0.0  ;;  %v972_v2 = vmax.f32 %v840_v62, 0.0 }
 0x1a1   :  { %v644_v3 = vpop.f32.mrf.mxu0  ;;  %v844_v4 = vpop.f32.mrf.mxu1 }
 0x1a2   :  { %1023 = vst.msk [vmem:[%s2363_s3 + $0x138] sm:$0xff] %vm983_vm0, %v922_v1  ;;  %1073 = vst.msk [vmem:[%s2363_s3 + $0x2c8] sm:$0xff] %vm983_vm0, %v972_v2  ;;  %v645_v5 = vadd.f32 %v1858_v61, %v644_v3  ;;  %v845_v6 = vadd.f32 %v1858_v61, %v844_v4 }
 0x1a3   :  { %v646_v7 = vpop.f32.mrf.mxu0  ;;  %v846_v8 = vpop.f32.mrf.mxu1 }
 0x1a4   :  { %v923_v9 = vmax.f32 %v645_v5, 0.0  ;;  %v973_v10 = vmax.f32 %v845_v6, 0.0 }
 0x1a5   :  { %v647_v11 = vpop.f32.mrf.mxu0  ;;  %v847_v12 = vpop.f32.mrf.mxu1 }
 0x1a6   :  { %1024 = vst.msk [vmem:[%s2363_s3 + $0x140] sm:$0xff] %vm983_vm0, %v923_v9  ;;  %1074 = vst.msk [vmem:[%s2363_s3 + $0x2d0] sm:$0xff] %vm983_vm0, %v973_v10  ;;  %v648_v13 = vadd.f32 %v1858_v61, %v647_v11  ;;  %v848_v14 = vadd.f32 %v1858_v61, %v847_v12 }
 0x1a7   :  { %v649_v15 = vpop.f32.mrf.mxu0  ;;  %v849_v16 = vpop.f32.mrf.mxu1 }
 0x1a8   :  { %v924_v17 = vmax.f32 %v648_v13, 0.0  ;;  %v974_v18 = vmax.f32 %v848_v14, 0.0 }
 0x1a9   :  { %v652_v19 = vpop.f32.mrf.mxu0  ;;  %v852_v20 = vpop.f32.mrf.mxu1 }
 0x1aa   :  { %1025 = vst.msk [vmem:[%s2363_s3 + $0x148] sm:$0xff] %vm983_vm0, %v924_v17  ;;  %1075 = vst.msk [vmem:[%s2363_s3 + $0x2d8] sm:$0xff] %vm983_vm0, %v974_v18  ;;  %v653_v21 = vadd.f32 %v1858_v61, %v652_v19  ;;  %v853_v22 = vadd.f32 %v1858_v61, %v852_v20 }
 0x1ab   :  { %v654_v23 = vpop.f32.mrf.mxu0  ;;  %v854_v24 = vpop.f32.mrf.mxu1 }
 0x1ac   :  { %v925_v25 = vmax.f32 %v653_v21, 0.0  ;;  %v975_v26 = vmax.f32 %v853_v22, 0.0 }
 0x1ad   :  { %v655_v27 = vpop.f32.mrf.mxu0  ;;  %v855_v28 = vpop.f32.mrf.mxu1 }
 0x1ae   :  { %1026 = vst.msk [vmem:[%s2363_s3 + $0x150] sm:$0xff] %vm983_vm0, %v925_v25  ;;  %1076 = vst.msk [vmem:[%s2363_s3 + $0x2e0] sm:$0xff] %vm983_vm0, %v975_v26  ;;  %v656_v29 = vadd.f32 %v1858_v61, %v655_v27  ;;  %v856_v30 = vadd.f32 %v1858_v61, %v855_v28 }
 0x1af   :  { %v657_v31 = vpop.f32.mrf.mxu0  ;;  %v857_v32 = vpop.f32.mrf.mxu1 }
 0x1b0   :  { %v926_v33 = vmax.f32 %v656_v29, 0.0  ;;  %v976_v34 = vmax.f32 %v856_v30, 0.0 }
 0x1b1   :  { %v660_v35 = vpop.f32.mrf.mxu0  ;;  %v860_v36 = vpop.f32.mrf.mxu1 }
 0x1b2   :  { %1027 = vst.msk [vmem:[%s2363_s3 + $0x158] sm:$0xff] %vm983_vm0, %v926_v33  ;;  %1077 = vst.msk [vmem:[%s2363_s3 + $0x2e8] sm:$0xff] %vm983_vm0, %v976_v34  ;;  %v661_v37 = vadd.f32 %v1858_v61, %v660_v35  ;;  %v861_v38 = vadd.f32 %v1858_v61, %v860_v36 }
 0x1b3   :  { %v662_v39 = vpop.f32.mrf.mxu0  ;;  %v862_v40 = vpop.f32.mrf.mxu1 }
 0x1b4   :  { %v927_v41 = vmax.f32 %v661_v37, 0.0  ;;  %v977_v42 = vmax.f32 %v861_v38, 0.0 }
 0x1b5   :  { %v663_v43 = vpop.f32.mrf.mxu0  ;;  %v863_v44 = vpop.f32.mrf.mxu1 }
 0x1b6   :  { %1028 = vst.msk [vmem:[%s2363_s3 + $0x160] sm:$0xff] %vm983_vm0, %v927_v41  ;;  %1078 = vst.msk [vmem:[%s2363_s3 + $0x2f0] sm:$0xff] %vm983_vm0, %v977_v42  ;;  %v664_v45 = vadd.f32 %v1858_v61, %v663_v43  ;;  %v864_v46 = vadd.f32 %v1858_v61, %v863_v44 }
 0x1b7   :  { %v665_v47 = vpop.f32.mrf.mxu0  ;;  %v865_v48 = vpop.f32.mrf.mxu1 }
 0x1b8   :  { %v928_v49 = vmax.f32 %v664_v45, 0.0  ;;  %v978_v50 = vmax.f32 %v864_v46, 0.0 }
 0x1b9   :  { %v668_v51 = vpop.f32.mrf.mxu0  ;;  %v868_v52 = vpop.f32.mrf.mxu1 }
 0x1ba   :  { %1029 = vst.msk [vmem:[%s2363_s3 + $0x168] sm:$0xff] %vm983_vm0, %v928_v49  ;;  %1079 = vst.msk [vmem:[%s2363_s3 + $0x2f8] sm:$0xff] %vm983_vm0, %v978_v50  ;;  %v669_v53 = vadd.f32 %v1858_v61, %v668_v51  ;;  %v869_v54 = vadd.f32 %v1858_v61, %v868_v52 }
 0x1bb   :  { %v670_v55 = vpop.f32.mrf.mxu0  ;;  %v870_v56 = vpop.f32.mrf.mxu1 }
 0x1bc   :  { %v929_v57 = vmax.f32 %v669_v53, 0.0  ;;  %v979_v58 = vmax.f32 %v869_v54, 0.0 }
 0x1bd   :  { %v671_v59 = vpop.f32.mrf.mxu0  ;;  %v871_v60 = vpop.f32.mrf.mxu1 }
 0x1be   :  { %1030 = vst.msk [vmem:[%s2363_s3 + $0x170] sm:$0xff] %vm983_vm0, %v929_v57  ;;  %1080 = vst.msk [vmem:[%s2363_s3 + $0x300] sm:$0xff] %vm983_vm0, %v979_v58  ;;  %v672_v62 = vadd.f32 %v1858_v61, %v671_v59  ;;  %v872_v63 = vadd.f32 %v1858_v61, %v871_v60 }
 0x1bf   :  { %v673_v0 = vpop.f32.mrf.mxu0  ;;  %v873_v1 = vpop.f32.mrf.mxu1 }
 0x1c0   :  { %v930_v2 = vmax.f32 %v672_v62, 0.0  ;;  %v980_v3 = vmax.f32 %v872_v63, 0.0 }
 0x1c1   :  { %v676_v4 = vpop.f32.mrf.mxu0  ;;  %v876_v5 = vpop.f32.mrf.mxu1 }
 0x1c2   :  { %1031 = vst.msk [vmem:[%s2363_s3 + $0x178] sm:$0xff] %vm983_vm0, %v930_v2  ;;  %1081 = vst.msk [vmem:[%s2363_s3 + $0x308] sm:$0xff] %vm983_vm0, %v980_v3  ;;  %v677_v6 = vadd.f32 %v1858_v61, %v676_v4  ;;  %v877_v7 = vadd.f32 %v1858_v61, %v876_v5 }
 0x1c3   :  { %v678_v8 = vpop.f32.mrf.mxu0  ;;  %v878_v9 = vpop.f32.mrf.mxu1 }
 0x1c4   :  { %v931_v10 = vmax.f32 %v677_v6, 0.0  ;;  %v981_v11 = vmax.f32 %v877_v7, 0.0 }
 0x1c5   :  { %v679_v12 = vpop.f32.mrf.mxu0  ;;  %v879_v13 = vpop.f32.mrf.mxu1 }
 0x1c6   :  { %1032 = vst.msk [vmem:[%s2363_s3 + $0x180] sm:$0xff] %vm983_vm0, %v931_v10  ;;  %1082 = vst.msk [vmem:[%s2363_s3 + $0x310] sm:$0xff] %vm983_vm0, %v981_v11  ;;  %v680_v14 = vadd.f32 %v1858_v61, %v679_v12  ;;  %v880_v15 = vadd.f32 %v1858_v61, %v879_v13 }
 0x1c7   :  { %v681_v16 = vpop.f32.mrf.mxu0  ;;  %v881_v17 = vpop.f32.mrf.mxu1 }
 0x1c8   :  { %v932_v18 = vmax.f32 %v680_v14, 0.0  ;;  %v982_v19 = vmax.f32 %v880_v15, 0.0 }
 0x1ca   :  { %1033 = vst.msk [vmem:[%s2363_s3 + $0x188] sm:$0xff] %vm983_vm0, %v932_v18  ;;  %1083 = vst.msk [vmem:[%s2363_s3 + $0x318] sm:$0xff] %vm983_vm0, %v982_v19 }

// kernel: dpin_forward.5
= control target key start
LH: loop header
LB: loop body
LE: loop exit
PB: predicated region body
PF: predicated region fallthrough
CT: control target
= control target key end

     0   :  { %vm727_vm0 = vcmask 523264   ;;  %s1556_s1 = inlined_call_operand.vmem [shape: bf16[512,64], index: 1, kind: input, shape index: {}]   ;;  %s1557_s0 = inlined_call_operand.vmem [shape: f32[200,512], index: 0, kind: input, shape index: {}]   ;;  %s1558_s2 = inlined_call_operand.vmem [shape: f32[1,64], index: 2, kind: input, shape index: {}]   ;;  %s1559_s3 = inlined_call_operand.vmem [shape: f32[200,64], index: 3, kind: output, shape index: {}]  }
   0x1   :  { %v978_v0 = vld [vmem:[%s1556_s1 + $0x78] sm:$0xff]   ;;  %v982_v4 = vld [vmem:[%s1556_s1 + $0x70] sm:$0xff]   ;;  %v986_v8 = vld [vmem:[%s1556_s1 + $0x68] sm:$0xff]  }
   0x2   :  { %v979_v1 = vld [vmem:[%s1556_s1 + $0xf8] sm:$0xff]   ;;  %790 = vmatprep.subr.bf16.mxu0 %v978_v0  ;;  %v983_v5 = vld [vmem:[%s1556_s1 + $0xf0] sm:$0xff]   ;;  %v987_v9 = vld [vmem:[%s1556_s1 + $0xe8] sm:$0xff]  }
   0x3   :  { %v980_v2 = vld [vmem:[%s1556_s1 + $0x38] sm:$0xff]   ;;  %884 = vmatprep.subr.bf16.mxu1 %v979_v1  ;;  %v984_v6 = vld [vmem:[%s1556_s1 + $0x30] sm:$0xff]   ;;  %v988_v10 = vld [vmem:[%s1556_s1 + $0x28] sm:$0xff]  }
   0x4   :  { %v981_v3 = vld [vmem:[%s1556_s1 + $0xb8] sm:$0xff]   ;;  %791 = vmatpush3.bf16.msra.mxu0 %v980_v2  ;;  %v985_v7 = vld [vmem:[%s1556_s1 + $0xb0] sm:$0xff]   ;;  %v989_v11 = vld [vmem:[%s1556_s1 + $0xa8] sm:$0xff]  }
   0x5   :  { %885 = vmatpush3.bf16.msra.mxu1 %v981_v3  ;;  %792 = vmatprep.subr.bf16.mxu0 %v982_v4  ;;  %v990_v12 = vld [vmem:[%s1556_s1 + $0x60] sm:$0xff]   ;;  %v994_v16 = vld [vmem:[%s1556_s1 + $0x58] sm:$0xff]   ;;  %v998_v20 = vld [vmem:[%s1556_s1 + $0x50] sm:$0xff]  }
   0x6   :  { %886 = vmatprep.subr.bf16.mxu1 %v983_v5  ;;  %v991_v13 = vld [vmem:[%s1556_s1 + $0xe0] sm:$0xff]   ;;  %v995_v17 = vld [vmem:[%s1556_s1 + $0xd8] sm:$0xff]   ;;  %v999_v21 = vld [vmem:[%s1556_s1 + $0xd0] sm:$0xff]  }
   0x7   :  { %v992_v14 = vld [vmem:[%s1556_s1 + $0x20] sm:$0xff]   ;;  %v996_v18 = vld [vmem:[%s1556_s1 + $0x18] sm:$0xff]   ;;  %v1000_v22 = vld [vmem:[%s1556_s1 + $0x10] sm:$0xff]  }
   0x8   :  { %793 = vmatpush3.bf16.msra.mxu0 %v984_v6  ;;  %v993_v15 = vld [vmem:[%s1556_s1 + $0xa0] sm:$0xff]   ;;  %v997_v19 = vld [vmem:[%s1556_s1 + $0x98] sm:$0xff]   ;;  %v1001_v23 = vld [vmem:[%s1556_s1 + $0x90] sm:$0xff]  }
   0x9   :  { %887 = vmatpush3.bf16.msra.mxu1 %v985_v7  ;;  %794 = vmatprep.subr.bf16.mxu0 %v986_v8  ;;  %v1002_v24 = vld [vmem:[%s1556_s1 + $0x48] sm:$0xff]   ;;  %v1006_v28 = vld [vmem:[%s1556_s1 + $0x40] sm:$0xff]   ;;  %v18_v34 = vld [vmem:[%s1557_s0 + $0x18] sm:$0xff] }
   0xa   :  { %888 = vmatprep.subr.bf16.mxu1 %v987_v9  ;;  %v1003_v25 = vld [vmem:[%s1556_s1 + $0xc8] sm:$0xff]   ;;  %v1007_v29 = vld [vmem:[%s1556_s1 + $0xc0] sm:$0xff]   ;;  %v22_v36 = vld [vmem:[%s1557_s0 + $0x38] sm:$0xff] }
   0xb   :  { %v1004_v26 = vld [vmem:[%s1556_s1 + $0x8] sm:$0xff]   ;;  %v1008_v30 = vld [vmem:[%s1556_s1] sm:$0xff]   ;;  %v118_v39 = vpack.c.bf16 %v22_v36, %v18_v34  ;;  %v17_v41 = vld [vmem:[%s1557_s0 + $0x10] sm:$0xff] }
   0xc   :  { %795 = vmatpush3.bf16.msra.mxu0 %v988_v10  ;;  %v1005_v27 = vld [vmem:[%s1556_s1 + $0x88] sm:$0xff]   ;;  %v1009_v31 = vld [vmem:[%s1556_s1 + $0x80] sm:$0xff]   ;;  %v21_v42 = vld [vmem:[%s1557_s0 + $0x30] sm:$0xff] }
   0xd   :  { %889 = vmatpush3.bf16.msra.mxu1 %v989_v11  ;;  %796 = vmatprep.subr.bf16.mxu0 %v990_v12  ;;  %v16_v32 = vld [vmem:[%s1557_s0 + $0x8] sm:$0xff]  ;;  %v15_v37 = vld [vmem:[%s1557_s0] sm:$0xff]  ;;  %v117_v44 = vpack.c.bf16 %v21_v42, %v17_v41  ;;  %v26_v46 = vld [vmem:[%s1557_s0 + $0x58] sm:$0xff] }
   0xe   :  { %890 = vmatprep.subr.bf16.mxu1 %v991_v13  ;;  %v20_v33 = vld [vmem:[%s1557_s0 + $0x28] sm:$0xff]  ;;  %v19_v38 = vld [vmem:[%s1557_s0 + $0x20] sm:$0xff]  ;;  %v30_v47 = vld [vmem:[%s1557_s0 + $0x78] sm:$0xff]  ;;  %598 = vmatprep.mubr.bf16.mxu1 %v118_v39 }
   0xf   :  { %v116_v35 = vpack.c.bf16 %v20_v33, %v16_v32  ;;  %v115_v40 = vpack.c.bf16 %v19_v38, %v15_v37  ;;  %v24_v43 = vld [vmem:[%s1557_s0 + $0x48] sm:$0xff]  ;;  %v122_v49 = vpack.c.bf16 %v30_v47, %v26_v46  ;;  %v23_v50 = vld [vmem:[%s1557_s0 + $0x40] sm:$0xff]  ;;  %v25_v52 = vld [vmem:[%s1557_s0 + $0x50] sm:$0xff] }
  0x10   :  { %797 = vmatpush3.bf16.msra.mxu0 %v992_v14  ;;  %v28_v45 = vld [vmem:[%s1557_s0 + $0x68] sm:$0xff]  ;;  %v27_v51 = vld [vmem:[%s1557_s0 + $0x60] sm:$0xff]  ;;  %v29_v53 = vld [vmem:[%s1557_s0 + $0x70] sm:$0xff] }
  0x11   :  { %891 = vmatpush3.bf16.msra.mxu1 %v993_v15  ;;  %798 = vmatprep.subr.bf16.mxu0 %v994_v16  ;;  %v120_v48 = vpack.c.bf16 %v28_v45, %v24_v43  ;;  %v32_v54 = vld [vmem:[%s1557_s0 + $0x88] sm:$0xff]  ;;  %v34_v56 = vld [vmem:[%s1557_s0 + $0x98] sm:$0xff]  ;;  %v119_v58 = vpack.c.bf16 %v27_v51, %v23_v50  ;;  %v121_v59 = vpack.c.bf16 %v29_v53, %v25_v52  ;;  %v31_v62 = vld [vmem:[%s1557_s0 + $0x80] sm:$0xff] }
  0x12   :  { %892 = vmatprep.subr.bf16.mxu1 %v995_v17  ;;  %462 = vmatprep.mubr.bf16.mxu0 %v116_v35  ;;  %v36_v55 = vld [vmem:[%s1557_s0 + $0xa8] sm:$0xff]  ;;  %v38_v57 = vld [vmem:[%s1557_s0 + $0xb8] sm:$0xff]  ;;  %v35_v63 = vld [vmem:[%s1557_s0 + $0xa0] sm:$0xff] }
  0x13   :  { %v124_v60 = vpack.c.bf16 %v36_v55, %v32_v54  ;;  %v126_v61 = vpack.c.bf16 %v38_v57, %v34_v56  ;;  %v33_v0 = vld [vmem:[%s1557_s0 + $0x90] sm:$0xff]  ;;  %v40_v2 = vld [vmem:[%s1557_s0 + $0xc8] sm:$0xff]  ;;  %v42_v4 = vld [vmem:[%s1557_s0 + $0xd8] sm:$0xff]  ;;  %v123_v6 = vpack.c.bf16 %v35_v63, %v31_v62 }
  0x14   :  { %799 = vmatpush3.bf16.msra.mxu0 %v996_v18  ;;  %v37_v1 = vld [vmem:[%s1557_s0 + $0xb0] sm:$0xff]  ;;  %v44_v3 = vld [vmem:[%s1557_s0 + $0xe8] sm:$0xff]  ;;  %v46_v5 = vld [vmem:[%s1557_s0 + $0xf8] sm:$0xff] }
  0x15   :  { %893 = vmatpush3.bf16.msra.mxu1 %v997_v19  ;;  %800 = vmatprep.subr.bf16.mxu0 %v998_v20  ;;  %v125_v7 = vpack.c.bf16 %v37_v1, %v33_v0  ;;  %v128_v8 = vpack.c.bf16 %v44_v3, %v40_v2  ;;  %v130_v9 = vpack.c.bf16 %v46_v5, %v42_v4  ;;  %v39_v10 = vld [vmem:[%s1557_s0 + $0xc0] sm:$0xff]  ;;  %v41_v12 = vld [vmem:[%s1557_s0 + $0xd0] sm:$0xff]  ;;  %v48_v14 = vld [vmem:[%s1557_s0 + $0x108] sm:$0xff] }
  0x16   :  { %894 = vmatprep.subr.bf16.mxu1 %v999_v21  ;;  %v43_v11 = vld [vmem:[%s1557_s0 + $0xe0] sm:$0xff]  ;;  %v45_v13 = vld [vmem:[%s1557_s0 + $0xf0] sm:$0xff]  ;;  %v52_v15 = vld [vmem:[%s1557_s0 + $0x128] sm:$0xff] }
  0x17   :  { %v50_v16 = vld [vmem:[%s1557_s0 + $0x118] sm:$0xff]  ;;  %v127_v18 = vpack.c.bf16 %v43_v11, %v39_v10  ;;  %v129_v19 = vpack.c.bf16 %v45_v13, %v41_v12  ;;  %v132_v20 = vpack.c.bf16 %v52_v15, %v48_v14  ;;  %v55_v34 = vld [vmem:[%s1557_s0 + $0x140] sm:$0xff]  ;;  %v57_v36 = vld [vmem:[%s1557_s0 + $0x150] sm:$0xff] }
  0x18   :  { %801 = vmatpush3.bf16.msra.mxu0 %v1000_v22  ;;  %v54_v17 = vld [vmem:[%s1557_s0 + $0x138] sm:$0xff]  ;;  %v47_v22 = vld [vmem:[%s1557_s0 + $0x100] sm:$0xff]  ;;  %v61_v37 = vld [vmem:[%s1557_s0 + $0x170] sm:$0xff] }
  0x19   :  { %895 = vmatpush3.bf16.msra.mxu1 %v1001_v23  ;;  %802 = vmatprep.subr.bf16.mxu0 %v1002_v24  ;;  %v134_v21 = vpack.c.bf16 %v54_v17, %v50_v16  ;;  %v51_v23 = vld [vmem:[%s1557_s0 + $0x120] sm:$0xff]  ;;  %v49_v24 = vld [vmem:[%s1557_s0 + $0x110] sm:$0xff]  ;;  %v64_v38 = vld [vmem:[%s1557_s0 + $0x188] sm:$0xff]  ;;  %v137_v43 = vpack.c.bf16 %v61_v37, %v57_v36 }
  0x1a   :  { %896 = vmatprep.subr.bf16.mxu1 %v1003_v25  ;;  %v53_v25 = vld [vmem:[%s1557_s0 + $0x130] sm:$0xff]  ;;  %v59_v35 = vld [vmem:[%s1557_s0 + $0x160] sm:$0xff]  ;;  %v68_v39 = vld [vmem:[%s1557_s0 + $0x1a8] sm:$0xff] }
  0x1b   :  { %v70_v41 = vld [vmem:[%s1557_s0 + $0x1b8] sm:$0xff]  ;;  %v135_v42 = vpack.c.bf16 %v59_v35, %v55_v34  ;;  %v63_v46 = vld [vmem:[%s1557_s0 + $0x180] sm:$0xff]  ;;  %v72_v50 = vld [vmem:[%s1557_s0 + $0x1c8] sm:$0xff] }
  0x1c   :  { %803 = vmatpush3.bf16.msra.mxu0 %v1004_v26  ;;  %v56_v26 = vld [vmem:[%s1557_s0 + $0x148] sm:$0xff]  ;;  %v67_v47 = vld [vmem:[%s1557_s0 + $0x1a0] sm:$0xff]  ;;  %v74_v52 = vld [vmem:[%s1557_s0 + $0x1d8] sm:$0xff] }
  0x1d   :  { %897 = vmatpush3.bf16.msra.mxu1 %v1005_v27  ;;  %804 = vmatprep.subr.bf16.mxu0 %v1006_v28  ;;  %v60_v27 = vld [vmem:[%s1557_s0 + $0x168] sm:$0xff]  ;;  %v58_v28 = vld [vmem:[%s1557_s0 + $0x158] sm:$0xff]  ;;  %v139_v54 = vpack.c.bf16 %v67_v47, %v63_v46 }
  0x1e   :  { %898 = vmatprep.subr.bf16.mxu1 %v1007_v29  ;;  %v62_v29 = vld [vmem:[%s1557_s0 + $0x178] sm:$0xff]  ;;  %v136_v32 = vpack.c.bf16 %v60_v27, %v56_v26  ;;  %v76_v51 = vld [vmem:[%s1557_s0 + $0x1e8] sm:$0xff] }
  0x1f   :  { %v138_v33 = vpack.c.bf16 %v62_v29, %v58_v28  ;;  %v78_v53 = vld [vmem:[%s1557_s0 + $0x1f8] sm:$0xff]  ;;  %v144_v56 = vpack.c.bf16 %v76_v51, %v72_v50  ;;  %v80_v62 = vld [vmem:[%s1557_s0 + $0x208] sm:$0xff] }
  0x20   :  { %805 = vmatpush3.bf16.msra.mxu0 %v1008_v30  ;;  %v131_v30 = vpack.c.bf16 %v51_v23, %v47_v22  ;;  %v146_v57 = vpack.c.bf16 %v78_v53, %v74_v52  ;;  %v84_v63 = vld [vmem:[%s1557_s0 + $0x228] sm:$0xff]  ;;  %v82_v0 = vld [vmem:[%s1557_s0 + $0x218] sm:$0xff]  ;;  %v111_v52 = vld [vmem:[%s1557_s0 + $0x300] sm:$0xff] }
  0x21   :  { %899 = vmatpush3.bf16.msra.mxu1 %v1009_v31  ;;  %v133_v31 = vpack.c.bf16 %v53_v25, %v49_v24  ;;  %v86_v1 = vld [vmem:[%s1557_s0 + $0x238] sm:$0xff]  ;;  %v148_v4 = vpack.c.bf16 %v84_v63, %v80_v62  ;;  %v88_v10 = vld [vmem:[%s1557_s0 + $0x248] sm:$0xff]  ;;  %v113_v53 = vld [vmem:[%s1557_s0 + $0x310] sm:$0xff] }
  0x22   :  { %v150_v5 = vpack.c.bf16 %v86_v1, %v82_v0  ;;  %v92_v11 = vld [vmem:[%s1557_s0 + $0x268] sm:$0xff]  ;;  %v90_v12 = vld [vmem:[%s1557_s0 + $0x258] sm:$0xff] }
  0x23   :  { %463 = vmatmul.mubr.bf16.vlgmr.msra.gmra.mxu0 %v115_v40  ;;  %v66_v40 = vld [vmem:[%s1557_s0 + $0x198] sm:$0xff]  ;;  %v152_v16 = vpack.c.bf16 %v92_v11, %v88_v10  ;;  %v96_v22 = vld [vmem:[%s1557_s0 + $0x288] sm:$0xff] }
  0x24   :  { %599 = vmatmul.mubr.bf16.vlgmr.msra.gmra.mxu1 %v117_v44  ;;  %470 = vmatprep.mubr.bf16.mxu0 %v120_v48  ;;  %v140_v44 = vpack.c.bf16 %v68_v39, %v64_v38  ;;  %v142_v45 = vpack.c.bf16 %v70_v41, %v66_v40  ;;  %v65_v48 = vld [vmem:[%s1557_s0 + $0x190] sm:$0xff]  ;;  %v94_v13 = vld [vmem:[%s1557_s0 + $0x278] sm:$0xff]  ;;  %v100_v23 = vld [vmem:[%s1557_s0 + $0x2a8] sm:$0xff] }
  0x25   :  { %606 = vmatprep.mubr.bf16.mxu1 %v122_v49  ;;  %v69_v49 = vld [vmem:[%s1557_s0 + $0x1b0] sm:$0xff]  ;;  %v154_v17 = vpack.c.bf16 %v94_v13, %v90_v12  ;;  %v98_v24 = vld [vmem:[%s1557_s0 + $0x298] sm:$0xff]  ;;  %v156_v28 = vpack.c.bf16 %v100_v23, %v96_v22  ;;  %v104_v34 = vld [vmem:[%s1557_s0 + $0x2c8] sm:$0xff] }
  0x26   :  { %v141_v55 = vpack.c.bf16 %v69_v49, %v65_v48  ;;  %v102_v25 = vld [vmem:[%s1557_s0 + $0x2b8] sm:$0xff]  ;;  %v108_v35 = vld [vmem:[%s1557_s0 + $0x2e8] sm:$0xff] }
  0x27   :  { %v158_v29 = vpack.c.bf16 %v102_v25, %v98_v24  ;;  %v106_v36 = vld [vmem:[%s1557_s0 + $0x2d8] sm:$0xff]  ;;  %v160_v40 = vpack.c.bf16 %v108_v35, %v104_v34  ;;  %v112_v46 = vld [vmem:[%s1557_s0 + $0x308] sm:$0xff] }
  0x28   :  { %v110_v37 = vld [vmem:[%s1557_s0 + $0x2f8] sm:$0xff]  ;;  %v164_v50 = vpack.c.bf16 %v112_v46, %v112_v46 }
  0x29   :  { %v162_v41 = vpack.c.bf16 %v110_v37, %v106_v36  ;;  %v114_v47 = vld [vmem:[%s1557_s0 + $0x318] sm:$0xff] }
  0x2a   :  { %v166_v51 = vpack.c.bf16 %v114_v47, %v114_v47 }
  0x2b   :  { %471 = vmatmul.mubr.bf16.gmra.mxu0 %v119_v58  ;;  %v71_v58 = vld [vmem:[%s1557_s0 + $0x1c0] sm:$0xff] }
  0x2c   :  { %607 = vmatmul.mubr.bf16.gmra.mxu1 %v121_v59  ;;  %478 = vmatprep.mubr.bf16.mxu0 %v124_v60  ;;  %v75_v59 = vld [vmem:[%s1557_s0 + $0x1e0] sm:$0xff]  ;;  %v73_v60 = vld [vmem:[%s1557_s0 + $0x1d0] sm:$0xff] }
  0x2d   :  { %614 = vmatprep.mubr.bf16.mxu1 %v126_v61  ;;  %v77_v61 = vld [vmem:[%s1557_s0 + $0x1f0] sm:$0xff]  ;;  %v143_v2 = vpack.c.bf16 %v75_v59, %v71_v58  ;;  %v1429_v58 = vld [vmem:[%s1558_s2] ss:$0 sm:$0xff] }
  0x2e   :  { %v145_v3 = vpack.c.bf16 %v77_v61, %v73_v60 }
  0x33   :  { %479 = vmatmul.mubr.bf16.gmra.mxu0 %v123_v6  ;;  %v79_v6 = vld [vmem:[%s1557_s0 + $0x200] sm:$0xff] }
  0x34   :  { %615 = vmatmul.mubr.bf16.gmra.mxu1 %v125_v7  ;;  %486 = vmatprep.mubr.bf16.mxu0 %v128_v8  ;;  %v83_v7 = vld [vmem:[%s1557_s0 + $0x220] sm:$0xff]  ;;  %v81_v8 = vld [vmem:[%s1557_s0 + $0x210] sm:$0xff] }
  0x35   :  { %622 = vmatprep.mubr.bf16.mxu1 %v130_v9  ;;  %v85_v9 = vld [vmem:[%s1557_s0 + $0x230] sm:$0xff]  ;;  %v147_v14 = vpack.c.bf16 %v83_v7, %v79_v6 }
  0x36   :  { %v149_v15 = vpack.c.bf16 %v85_v9, %v81_v8 }
  0x3b   :  { %487 = vmatmul.mubr.bf16.gmra.mxu0 %v127_v18  ;;  %v87_v18 = vld [vmem:[%s1557_s0 + $0x240] sm:$0xff] }
  0x3c   :  { %623 = vmatmul.mubr.bf16.gmra.mxu1 %v129_v19  ;;  %494 = vmatprep.mubr.bf16.mxu0 %v132_v20  ;;  %v91_v19 = vld [vmem:[%s1557_s0 + $0x260] sm:$0xff]  ;;  %v89_v20 = vld [vmem:[%s1557_s0 + $0x250] sm:$0xff] }
  0x3d   :  { %630 = vmatprep.mubr.bf16.mxu1 %v134_v21  ;;  %v93_v21 = vld [vmem:[%s1557_s0 + $0x270] sm:$0xff]  ;;  %v151_v26 = vpack.c.bf16 %v91_v19, %v87_v18 }
  0x3e   :  { %v153_v27 = vpack.c.bf16 %v93_v21, %v89_v20 }
  0x43   :  { %495 = vmatmul.mubr.bf16.gmra.mxu0 %v131_v30  ;;  %v95_v30 = vld [vmem:[%s1557_s0 + $0x280] sm:$0xff] }
  0x44   :  { %631 = vmatmul.mubr.bf16.gmra.mxu1 %v133_v31  ;;  %502 = vmatprep.mubr.bf16.mxu0 %v136_v32  ;;  %v99_v31 = vld [vmem:[%s1557_s0 + $0x2a0] sm:$0xff]  ;;  %v97_v32 = vld [vmem:[%s1557_s0 + $0x290] sm:$0xff] }
  0x45   :  { %638 = vmatprep.mubr.bf16.mxu1 %v138_v33  ;;  %v101_v33 = vld [vmem:[%s1557_s0 + $0x2b0] sm:$0xff]  ;;  %v155_v38 = vpack.c.bf16 %v99_v31, %v95_v30 }
  0x46   :  { %v157_v39 = vpack.c.bf16 %v101_v33, %v97_v32 }
  0x4b   :  { %503 = vmatmul.mubr.bf16.gmra.mxu0 %v135_v42  ;;  %v103_v42 = vld [vmem:[%s1557_s0 + $0x2c0] sm:$0xff] }
  0x4c   :  { %639 = vmatmul.mubr.bf16.gmra.mxu1 %v137_v43  ;;  %510 = vmatprep.mubr.bf16.mxu0 %v140_v44  ;;  %v107_v43 = vld [vmem:[%s1557_s0 + $0x2e0] sm:$0xff]  ;;  %v105_v44 = vld [vmem:[%s1557_s0 + $0x2d0] sm:$0xff] }
  0x4d   :  { %646 = vmatprep.mubr.bf16.mxu1 %v142_v45  ;;  %v109_v45 = vld [vmem:[%s1557_s0 + $0x2f0] sm:$0xff]  ;;  %v159_v48 = vpack.c.bf16 %v107_v43, %v103_v42 }
  0x4e   :  { %v161_v49 = vpack.c.bf16 %v109_v45, %v105_v44 }
  0x53   :  { %511 = vmatmul.mubr.bf16.gmra.mxu0 %v139_v54  ;;  %v163_v54 = vpack.c.bf16 %v111_v52, %v111_v52 }
  0x54   :  { %647 = vmatmul.mubr.bf16.gmra.mxu1 %v141_v55  ;;  %518 = vmatprep.mubr.bf16.mxu0 %v144_v56  ;;  %v165_v55 = vpack.c.bf16 %v113_v53, %v113_v53 }
  0x55   :  { %654 = vmatprep.mubr.bf16.mxu1 %v146_v57 }
  0x5b   :  { %519 = vmatmul.mubr.bf16.gmra.mxu0 %v143_v2 }
  0x5c   :  { %655 = vmatmul.mubr.bf16.gmra.mxu1 %v145_v3  ;;  %526 = vmatprep.mubr.bf16.mxu0 %v148_v4 }
  0x5d   :  { %662 = vmatprep.mubr.bf16.mxu1 %v150_v5 }
  0x63   :  { %527 = vmatmul.mubr.bf16.gmra.mxu0 %v147_v14 }
  0x64   :  { %663 = vmatmul.mubr.bf16.gmra.mxu1 %v149_v15  ;;  %534 = vmatprep.mubr.bf16.mxu0 %v152_v16 }
  0x65   :  { %670 = vmatprep.mubr.bf16.mxu1 %v154_v17 }
  0x6b   :  { %535 = vmatmul.mubr.bf16.gmra.mxu0 %v151_v26 }
  0x6c   :  { %671 = vmatmul.mubr.bf16.gmra.mxu1 %v153_v27  ;;  %542 = vmatprep.mubr.bf16.mxu0 %v156_v28 }
  0x6d   :  { %678 = vmatprep.mubr.bf16.mxu1 %v158_v29 }
  0x73   :  { %543 = vmatmul.mubr.bf16.gmra.mxu0 %v155_v38 }
  0x74   :  { %679 = vmatmul.mubr.bf16.gmra.mxu1 %v157_v39  ;;  %550 = vmatprep.mubr.bf16.mxu0 %v160_v40 }
  0x75   :  { %686 = vmatprep.mubr.bf16.mxu1 %v162_v41 }
  0x7b   :  { %551 = vmatmul.mubr.bf16.gmra.mxu0 %v159_v48 }
  0x7c   :  { %687 = vmatmul.mubr.bf16.gmra.mxu1 %v161_v49  ;;  %558 = vmatprep.mubr.bf16.mxu0 %v164_v50 }
  0x7d   :  { %694 = vmatprep.mubr.bf16.mxu1 %v166_v51 }
  0x83   :  { %559 = vmatmul.mubr.bf16.gmra.mxu0 %v163_v54 }
  0x84   :  { %695 = vmatmul.mubr.bf16.gmra.mxu1 %v165_v55 }
  0xe3   :  { %v806_v56 = vpop.f32.mrf.mxu0 }
  0xe4   :  { %v900_v57 = vpop.f32.mrf.mxu1 }
  0xe5   :  { %v807_v59 = vpop.f32.mrf.mxu0 }
  0xe6   :  { %v808_v60 = vadd.f32 %v807_v59, %v806_v56  ;;  %v901_v61 = vpop.f32.mrf.mxu1 }
  0xe7   :  { %v809_v62 = vpop.f32.mrf.mxu0  ;;  %v902_v0 = vadd.f32 %v901_v61, %v900_v57 }
  0xe8   :  { %v465_v63 = vadd.f32 %v808_v60, %v1429_v58  ;;  %v903_v1 = vpop.f32.mrf.mxu1 }
  0xe9   :  { %v810_v2 = vpop.f32.mrf.mxu0 }
  0xea   :  { %v601_v3 = vadd.f32 %v902_v0, %v465_v63  ;;  %v811_v4 = vadd.f32 %v810_v2, %v809_v62  ;;  %v904_v5 = vpop.f32.mrf.mxu1 }
  0xeb   :  { %v812_v6 = vpop.f32.mrf.mxu0  ;;  %v905_v9 = vadd.f32 %v904_v5, %v903_v1 }
  0xec   :  { %v702_v7 = vmax.f32 %v601_v3, 0.0  ;;  %v468_v8 = vadd.f32 %v811_v4, %v1429_v58  ;;  %v906_v10 = vpop.f32.mrf.mxu1 }
  0xed   :  { %v813_v11 = vpop.f32.mrf.mxu0 }
  0xee   :  { %728 = vst.msk [vmem:[%s1559_s3] sm:$0xff] %vm727_vm0, %v702_v7  ;;  %v604_v12 = vadd.f32 %v905_v9, %v468_v8  ;;  %v814_v13 = vadd.f32 %v813_v11, %v812_v6  ;;  %v907_v14 = vpop.f32.mrf.mxu1 }
  0xef   :  { %v815_v15 = vpop.f32.mrf.mxu0  ;;  %v908_v18 = vadd.f32 %v907_v14, %v906_v10 }
  0xf0   :  { %v703_v16 = vmax.f32 %v604_v12, 0.0  ;;  %v473_v17 = vadd.f32 %v814_v13, %v1429_v58  ;;  %v909_v19 = vpop.f32.mrf.mxu1 }
  0xf1   :  { %v816_v20 = vpop.f32.mrf.mxu0 }
  0xf2   :  { %729 = vst.msk [vmem:[%s1559_s3 + $0x8] sm:$0xff] %vm727_vm0, %v703_v16  ;;  %v609_v21 = vadd.f32 %v908_v18, %v473_v17  ;;  %v817_v22 = vadd.f32 %v816_v20, %v815_v15  ;;  %v910_v23 = vpop.f32.mrf.mxu1 }
  0xf3   :  { %v818_v24 = vpop.f32.mrf.mxu0  ;;  %v911_v27 = vadd.f32 %v910_v23, %v909_v19 }
  0xf4   :  { %v704_v25 = vmax.f32 %v609_v21, 0.0  ;;  %v476_v26 = vadd.f32 %v817_v22, %v1429_v58  ;;  %v912_v28 = vpop.f32.mrf.mxu1 }
  0xf5   :  { %v819_v29 = vpop.f32.mrf.mxu0 }
  0xf6   :  { %730 = vst.msk [vmem:[%s1559_s3 + $0x10] sm:$0xff] %vm727_vm0, %v704_v25  ;;  %v612_v30 = vadd.f32 %v911_v27, %v476_v26  ;;  %v820_v31 = vadd.f32 %v819_v29, %v818_v24  ;;  %v913_v32 = vpop.f32.mrf.mxu1 }
  0xf7   :  { %v821_v33 = vpop.f32.mrf.mxu0  ;;  %v914_v36 = vadd.f32 %v913_v32, %v912_v28 }
  0xf8   :  { %v705_v34 = vmax.f32 %v612_v30, 0.0  ;;  %v481_v35 = vadd.f32 %v820_v31, %v1429_v58  ;;  %v915_v37 = vpop.f32.mrf.mxu1 }
  0xf9   :  { %v822_v38 = vpop.f32.mrf.mxu0 }
  0xfa   :  { %731 = vst.msk [vmem:[%s1559_s3 + $0x18] sm:$0xff] %vm727_vm0, %v705_v34  ;;  %v617_v39 = vadd.f32 %v914_v36, %v481_v35  ;;  %v823_v40 = vadd.f32 %v822_v38, %v821_v33  ;;  %v916_v41 = vpop.f32.mrf.mxu1 }
  0xfb   :  { %v824_v42 = vpop.f32.mrf.mxu0  ;;  %v917_v45 = vadd.f32 %v916_v41, %v915_v37 }
  0xfc   :  { %v706_v43 = vmax.f32 %v617_v39, 0.0  ;;  %v484_v44 = vadd.f32 %v823_v40, %v1429_v58  ;;  %v918_v46 = vpop.f32.mrf.mxu1 }
  0xfd   :  { %v825_v47 = vpop.f32.mrf.mxu0 }
  0xfe   :  { %732 = vst.msk [vmem:[%s1559_s3 + $0x20] sm:$0xff] %vm727_vm0, %v706_v43  ;;  %v620_v48 = vadd.f32 %v917_v45, %v484_v44  ;;  %v826_v49 = vadd.f32 %v825_v47, %v824_v42  ;;  %v919_v50 = vpop.f32.mrf.mxu1 }
  0xff   :  { %v827_v51 = vpop.f32.mrf.mxu0  ;;  %v920_v54 = vadd.f32 %v919_v50, %v918_v46 }
 0x100   :  { %v707_v52 = vmax.f32 %v620_v48, 0.0  ;;  %v489_v53 = vadd.f32 %v826_v49, %v1429_v58  ;;  %v921_v55 = vpop.f32.mrf.mxu1 }
 0x101   :  { %v828_v56 = vpop.f32.mrf.mxu0 }
 0x102   :  { %733 = vst.msk [vmem:[%s1559_s3 + $0x28] sm:$0xff] %vm727_vm0, %v707_v52  ;;  %v625_v57 = vadd.f32 %v920_v54, %v489_v53  ;;  %v829_v59 = vadd.f32 %v828_v56, %v827_v51  ;;  %v922_v60 = vpop.f32.mrf.mxu1 }
 0x103   :  { %v830_v61 = vpop.f32.mrf.mxu0  ;;  %v923_v0 = vadd.f32 %v922_v60, %v921_v55 }
 0x104   :  { %v708_v62 = vmax.f32 %v625_v57, 0.0  ;;  %v492_v63 = vadd.f32 %v829_v59, %v1429_v58  ;;  %v924_v1 = vpop.f32.mrf.mxu1 }
 0x105   :  { %v831_v2 = vpop.f32.mrf.mxu0 }
 0x106   :  { %734 = vst.msk [vmem:[%s1559_s3 + $0x30] sm:$0xff] %vm727_vm0, %v708_v62  ;;  %v628_v3 = vadd.f32 %v923_v0, %v492_v63  ;;  %v832_v4 = vadd.f32 %v831_v2, %v830_v61  ;;  %v925_v5 = vpop.f32.mrf.mxu1 }
 0x107   :  { %v833_v6 = vpop.f32.mrf.mxu0  ;;  %v926_v9 = vadd.f32 %v925_v5, %v924_v1 }
 0x108   :  { %v709_v7 = vmax.f32 %v628_v3, 0.0  ;;  %v497_v8 = vadd.f32 %v832_v4, %v1429_v58  ;;  %v927_v10 = vpop.f32.mrf.mxu1 }
 0x109   :  { %v834_v11 = vpop.f32.mrf.mxu0 }
 0x10a   :  { %735 = vst.msk [vmem:[%s1559_s3 + $0x38] sm:$0xff] %vm727_vm0, %v709_v7  ;;  %v633_v12 = vadd.f32 %v926_v9, %v497_v8  ;;  %v835_v13 = vadd.f32 %v834_v11, %v833_v6  ;;  %v928_v14 = vpop.f32.mrf.mxu1 }
 0x10b   :  { %v836_v15 = vpop.f32.mrf.mxu0  ;;  %v929_v18 = vadd.f32 %v928_v14, %v927_v10 }
 0x10c   :  { %v710_v16 = vmax.f32 %v633_v12, 0.0  ;;  %v500_v17 = vadd.f32 %v835_v13, %v1429_v58  ;;  %v930_v19 = vpop.f32.mrf.mxu1 }
 0x10d   :  { %v837_v20 = vpop.f32.mrf.mxu0 }
 0x10e   :  { %736 = vst.msk [vmem:[%s1559_s3 + $0x40] sm:$0xff] %vm727_vm0, %v710_v16  ;;  %v636_v21 = vadd.f32 %v929_v18, %v500_v17  ;;  %v838_v22 = vadd.f32 %v837_v20, %v836_v15  ;;  %v931_v23 = vpop.f32.mrf.mxu1 }
 0x10f   :  { %v839_v24 = vpop.f32.mrf.mxu0  ;;  %v932_v27 = vadd.f32 %v931_v23, %v930_v19 }
 0x110   :  { %v711_v25 = vmax.f32 %v636_v21, 0.0  ;;  %v505_v26 = vadd.f32 %v838_v22, %v1429_v58  ;;  %v933_v28 = vpop.f32.mrf.mxu1 }
 0x111   :  { %v840_v29 = vpop.f32.mrf.mxu0 }
 0x112   :  { %737 = vst.msk [vmem:[%s1559_s3 + $0x48] sm:$0xff] %vm727_vm0, %v711_v25  ;;  %v641_v30 = vadd.f32 %v932_v27, %v505_v26  ;;  %v841_v31 = vadd.f32 %v840_v29, %v839_v24  ;;  %v934_v32 = vpop.f32.mrf.mxu1 }
 0x113   :  { %v842_v33 = vpop.f32.mrf.mxu0  ;;  %v935_v36 = vadd.f32 %v934_v32, %v933_v28 }
 0x114   :  { %v712_v34 = vmax.f32 %v641_v30, 0.0  ;;  %v508_v35 = vadd.f32 %v841_v31, %v1429_v58  ;;  %v936_v37 = vpop.f32.mrf.mxu1 }
 0x115   :  { %v843_v38 = vpop.f32.mrf.mxu0 }
 0x116   :  { %738 = vst.msk [vmem:[%s1559_s3 + $0x50] sm:$0xff] %vm727_vm0, %v712_v34  ;;  %v644_v39 = vadd.f32 %v935_v36, %v508_v35  ;;  %v844_v40 = vadd.f32 %v843_v38, %v842_v33  ;;  %v937_v41 = vpop.f32.mrf.mxu1 }
 0x117   :  { %v845_v42 = vpop.f32.mrf.mxu0  ;;  %v938_v45 = vadd.f32 %v937_v41, %v936_v37 }
 0x118   :  { %v713_v43 = vmax.f32 %v644_v39, 0.0  ;;  %v513_v44 = vadd.f32 %v844_v40, %v1429_v58  ;;  %v939_v46 = vpop.f32.mrf.mxu1 }
 0x119   :  { %v846_v47 = vpop.f32.mrf.mxu0 }
 0x11a   :  { %739 = vst.msk [vmem:[%s1559_s3 + $0x58] sm:$0xff] %vm727_vm0, %v713_v43  ;;  %v649_v48 = vadd.f32 %v938_v45, %v513_v44  ;;  %v847_v49 = vadd.f32 %v846_v47, %v845_v42  ;;  %v940_v50 = vpop.f32.mrf.mxu1 }
 0x11b   :  { %v848_v51 = vpop.f32.mrf.mxu0  ;;  %v941_v54 = vadd.f32 %v940_v50, %v939_v46 }
 0x11c   :  { %v714_v52 = vmax.f32 %v649_v48, 0.0  ;;  %v516_v53 = vadd.f32 %v847_v49, %v1429_v58  ;;  %v942_v55 = vpop.f32.mrf.mxu1 }
 0x11d   :  { %v849_v56 = vpop.f32.mrf.mxu0 }
 0x11e   :  { %740 = vst.msk [vmem:[%s1559_s3 + $0x60] sm:$0xff] %vm727_vm0, %v714_v52  ;;  %v652_v57 = vadd.f32 %v941_v54, %v516_v53  ;;  %v850_v59 = vadd.f32 %v849_v56, %v848_v51  ;;  %v943_v60 = vpop.f32.mrf.mxu1 }
 0x11f   :  { %v851_v61 = vpop.f32.mrf.mxu0  ;;  %v944_v0 = vadd.f32 %v943_v60, %v942_v55 }
 0x120   :  { %v715_v62 = vmax.f32 %v652_v57, 0.0  ;;  %v521_v63 = vadd.f32 %v850_v59, %v1429_v58  ;;  %v945_v1 = vpop.f32.mrf.mxu1 }
 0x121   :  { %v852_v2 = vpop.f32.mrf.mxu0 }
 0x122   :  { %741 = vst.msk [vmem:[%s1559_s3 + $0x68] sm:$0xff] %vm727_vm0, %v715_v62  ;;  %v657_v3 = vadd.f32 %v944_v0, %v521_v63  ;;  %v853_v4 = vadd.f32 %v852_v2, %v851_v61  ;;  %v946_v5 = vpop.f32.mrf.mxu1 }
 0x123   :  { %v854_v6 = vpop.f32.mrf.mxu0  ;;  %v947_v9 = vadd.f32 %v946_v5, %v945_v1 }
 0x124   :  { %v716_v7 = vmax.f32 %v657_v3, 0.0  ;;  %v524_v8 = vadd.f32 %v853_v4, %v1429_v58  ;;  %v948_v10 = vpop.f32.mrf.mxu1 }
 0x125   :  { %v855_v11 = vpop.f32.mrf.mxu0 }
 0x126   :  { %742 = vst.msk [vmem:[%s1559_s3 + $0x70] sm:$0xff] %vm727_vm0, %v716_v7  ;;  %v660_v12 = vadd.f32 %v947_v9, %v524_v8  ;;  %v856_v13 = vadd.f32 %v855_v11, %v854_v6  ;;  %v949_v14 = vpop.f32.mrf.mxu1 }
 0x127   :  { %v857_v15 = vpop.f32.mrf.mxu0  ;;  %v950_v18 = vadd.f32 %v949_v14, %v948_v10 }
 0x128   :  { %v717_v16 = vmax.f32 %v660_v12, 0.0  ;;  %v529_v17 = vadd.f32 %v856_v13, %v1429_v58  ;;  %v951_v19 = vpop.f32.mrf.mxu1 }
 0x129   :  { %v858_v20 = vpop.f32.mrf.mxu0 }
 0x12a   :  { %743 = vst.msk [vmem:[%s1559_s3 + $0x78] sm:$0xff] %vm727_vm0, %v717_v16  ;;  %v665_v21 = vadd.f32 %v950_v18, %v529_v17  ;;  %v859_v22 = vadd.f32 %v858_v20, %v857_v15  ;;  %v952_v23 = vpop.f32.mrf.mxu1 }
 0x12b   :  { %v860_v24 = vpop.f32.mrf.mxu0  ;;  %v953_v27 = vadd.f32 %v952_v23, %v951_v19 }
 0x12c   :  { %v718_v25 = vmax.f32 %v665_v21, 0.0  ;;  %v532_v26 = vadd.f32 %v859_v22, %v1429_v58  ;;  %v954_v28 = vpop.f32.mrf.mxu1 }
 0x12d   :  { %v861_v29 = vpop.f32.mrf.mxu0 }
 0x12e   :  { %744 = vst.msk [vmem:[%s1559_s3 + $0x80] sm:$0xff] %vm727_vm0, %v718_v25  ;;  %v668_v30 = vadd.f32 %v953_v27, %v532_v26  ;;  %v862_v31 = vadd.f32 %v861_v29, %v860_v24  ;;  %v955_v32 = vpop.f32.mrf.mxu1 }
 0x12f   :  { %v863_v33 = vpop.f32.mrf.mxu0  ;;  %v956_v36 = vadd.f32 %v955_v32, %v954_v28 }
 0x130   :  { %v719_v34 = vmax.f32 %v668_v30, 0.0  ;;  %v537_v35 = vadd.f32 %v862_v31, %v1429_v58  ;;  %v957_v37 = vpop.f32.mrf.mxu1 }
 0x131   :  { %v864_v38 = vpop.f32.mrf.mxu0 }
 0x132   :  { %745 = vst.msk [vmem:[%s1559_s3 + $0x88] sm:$0xff] %vm727_vm0, %v719_v34  ;;  %v673_v39 = vadd.f32 %v956_v36, %v537_v35  ;;  %v865_v40 = vadd.f32 %v864_v38, %v863_v33  ;;  %v958_v41 = vpop.f32.mrf.mxu1 }
 0x133   :  { %v866_v42 = vpop.f32.mrf.mxu0  ;;  %v959_v45 = vadd.f32 %v958_v41, %v957_v37 }
 0x134   :  { %v720_v43 = vmax.f32 %v673_v39, 0.0  ;;  %v540_v44 = vadd.f32 %v865_v40, %v1429_v58  ;;  %v960_v46 = vpop.f32.mrf.mxu1 }
 0x135   :  { %v867_v47 = vpop.f32.mrf.mxu0 }
 0x136   :  { %746 = vst.msk [vmem:[%s1559_s3 + $0x90] sm:$0xff] %vm727_vm0, %v720_v43  ;;  %v676_v48 = vadd.f32 %v959_v45, %v540_v44  ;;  %v868_v49 = vadd.f32 %v867_v47, %v866_v42  ;;  %v961_v50 = vpop.f32.mrf.mxu1 }
 0x137   :  { %v869_v51 = vpop.f32.mrf.mxu0  ;;  %v962_v54 = vadd.f32 %v961_v50, %v960_v46 }
 0x138   :  { %v721_v52 = vmax.f32 %v676_v48, 0.0  ;;  %v545_v53 = vadd.f32 %v868_v49, %v1429_v58  ;;  %v963_v55 = vpop.f32.mrf.mxu1 }
 0x139   :  { %v870_v56 = vpop.f32.mrf.mxu0 }
 0x13a   :  { %747 = vst.msk [vmem:[%s1559_s3 + $0x98] sm:$0xff] %vm727_vm0, %v721_v52  ;;  %v681_v57 = vadd.f32 %v962_v54, %v545_v53  ;;  %v871_v59 = vadd.f32 %v870_v56, %v869_v51  ;;  %v964_v60 = vpop.f32.mrf.mxu1 }
 0x13b   :  { %v872_v61 = vpop.f32.mrf.mxu0  ;;  %v965_v0 = vadd.f32 %v964_v60, %v963_v55 }
 0x13c   :  { %v722_v62 = vmax.f32 %v681_v57, 0.0  ;;  %v548_v63 = vadd.f32 %v871_v59, %v1429_v58  ;;  %v966_v1 = vpop.f32.mrf.mxu1 }
 0x13d   :  { %v873_v2 = vpop.f32.mrf.mxu0 }
 0x13e   :  { %748 = vst.msk [vmem:[%s1559_s3 + $0xa0] sm:$0xff] %vm727_vm0, %v722_v62  ;;  %v684_v3 = vadd.f32 %v965_v0, %v548_v63  ;;  %v874_v4 = vadd.f32 %v873_v2, %v872_v61  ;;  %v967_v5 = vpop.f32.mrf.mxu1 }
 0x13f   :  { %v875_v6 = vpop.f32.mrf.mxu0  ;;  %v968_v9 = vadd.f32 %v967_v5, %v966_v1 }
 0x140   :  { %v723_v7 = vmax.f32 %v684_v3, 0.0  ;;  %v553_v8 = vadd.f32 %v874_v4, %v1429_v58  ;;  %v969_v10 = vpop.f32.mrf.mxu1 }
 0x141   :  { %v876_v11 = vpop.f32.mrf.mxu0 }
 0x142   :  { %749 = vst.msk [vmem:[%s1559_s3 + $0xa8] sm:$0xff] %vm727_vm0, %v723_v7  ;;  %v689_v12 = vadd.f32 %v968_v9, %v553_v8  ;;  %v877_v13 = vadd.f32 %v876_v11, %v875_v6  ;;  %v970_v14 = vpop.f32.mrf.mxu1 }
 0x143   :  { %v878_v15 = vpop.f32.mrf.mxu0  ;;  %v971_v18 = vadd.f32 %v970_v14, %v969_v10 }
 0x144   :  { %v724_v16 = vmax.f32 %v689_v12, 0.0  ;;  %v556_v17 = vadd.f32 %v877_v13, %v1429_v58  ;;  %v972_v19 = vpop.f32.mrf.mxu1 }
 0x145   :  { %v879_v20 = vpop.f32.mrf.mxu0 }
 0x146   :  { %750 = vst.msk [vmem:[%s1559_s3 + $0xb0] sm:$0xff] %vm727_vm0, %v724_v16  ;;  %v692_v21 = vadd.f32 %v971_v18, %v556_v17  ;;  %v880_v22 = vadd.f32 %v879_v20, %v878_v15  ;;  %v973_v23 = vpop.f32.mrf.mxu1 }
 0x147   :  { %v881_v24 = vpop.f32.mrf.mxu0  ;;  %v974_v27 = vadd.f32 %v973_v23, %v972_v19 }
 0x148   :  { %v725_v25 = vmax.f32 %v692_v21, 0.0  ;;  %v561_v26 = vadd.f32 %v880_v22, %v1429_v58  ;;  %v975_v28 = vpop.f32.mrf.mxu1 }
 0x149   :  { %v882_v29 = vpop.f32.mrf.mxu0 }
 0x14a   :  { %751 = vst.msk [vmem:[%s1559_s3 + $0xb8] sm:$0xff] %vm727_vm0, %v725_v25  ;;  %v697_v30 = vadd.f32 %v974_v27, %v561_v26  ;;  %v976_v31 = vpop.f32.mrf.mxu1 }
 0x14c   :  { %v726_v32 = vmax.f32 %v697_v30, 0.0 }
 0x14e   :  { %752 = vst.msk [vmem:[%s1559_s3 + $0xc0] sm:$0xff] %vm727_vm0, %v726_v32 }

// kernel: dpin_forward.6
= control target key start
LH: loop header
LB: loop body
LE: loop exit
PB: predicated region body
PF: predicated region fallthrough
CT: control target
= control target key end

     0   :  { %v1371_v35 = vmov 0.0   ;;  %vm1372_vm0 = vmmov 0   ;;  %vm500_vm1 = vcmask 523264   ;;  %s2166_s1 = inlined_call_operand.vmem [shape: bf16[576,64], index: 1, kind: input, shape index: {}]   ;;  %s2167_s0 = inlined_call_operand.vmem [shape: f32[200,576], index: 0, kind: input, shape index: {}]   ;;  %s2168_s2 = inlined_call_operand.vmem [shape: f32[1,64], index: 2, kind: input, shape index: {}]   ;;  %s2169_s3 = inlined_call_operand.vmem [shape: f32[200,64], index: 3, kind: output, shape index: {}]  }
   0x1   :  { %v1335_v0 = vld [vmem:[%s2166_s1 + $0x78] sm:$0xff]   ;;  %v1337_v2 = vld [vmem:[%s2166_s1 + $0x70] sm:$0xff]   ;;  %v1339_v4 = vld [vmem:[%s2166_s1 + $0x68] sm:$0xff]  }
   0x2   :  { %v1336_v1 = vld [vmem:[%s2166_s1 + $0x38] sm:$0xff]   ;;  %1052 = vmatprep.subr.bf16.mxu0 %v1335_v0  ;;  %1317 = vmatprep.subr.bf16.mxu1 %v1335_v0  ;;  %v1338_v3 = vld [vmem:[%s2166_s1 + $0x30] sm:$0xff]   ;;  %v1340_v5 = vld [vmem:[%s2166_s1 + $0x28] sm:$0xff]  }
   0x3   :  { %1053 = vmatpush3.bf16.msra.mxu0 %v1336_v1  ;;  %1325 = vmatpush3.bf16.msra.mxu1 %v1336_v1  ;;  %v1341_v6 = vld [vmem:[%s2166_s1 + $0x60] sm:$0xff]   ;;  %v1343_v8 = vld [vmem:[%s2166_s1 + $0x58] sm:$0xff]   ;;  %v1345_v10 = vld [vmem:[%s2166_s1 + $0x50] sm:$0xff]  }
   0x4   :  { %1054 = vmatprep.subr.bf16.mxu0 %v1337_v2  ;;  %1318 = vmatprep.subr.bf16.mxu1 %v1337_v2  ;;  %v1342_v7 = vld [vmem:[%s2166_s1 + $0x20] sm:$0xff]   ;;  %v1344_v9 = vld [vmem:[%s2166_s1 + $0x18] sm:$0xff]   ;;  %v16_v11 = vld [vmem:[%s2167_s0 + $0x8] sm:$0xff] }
   0x5   :  { %v21_v12 = vld [vmem:[%s2167_s0 + $0x30] sm:$0xff]  ;;  %v86_v13 = vld [vmem:[%s2167_s0 + $0x238] sm:$0xff]  ;;  %v91_v15 = vld [vmem:[%s2167_s0 + $0x260] sm:$0xff] }
   0x6   :  { %v141_v14 = vpack.c.bf16 %v21_v12, %v16_v11  ;;  %v176_v16 = vpack.c.bf16 %v91_v15, %v86_v13  ;;  %v1346_v17 = vld [vmem:[%s2166_s1 + $0x10] sm:$0xff]   ;;  %v1347_v18 = vld [vmem:[%s2166_s1 + $0x48] sm:$0xff]   ;;  %v1349_v20 = vld [vmem:[%s2166_s1 + $0x40] sm:$0xff]  }
   0x7   :  { %1055 = vmatpush3.bf16.msra.mxu0 %v1338_v3  ;;  %1326 = vmatpush3.bf16.msra.mxu1 %v1338_v3  ;;  %v1348_v19 = vld [vmem:[%s2166_s1 + $0x8] sm:$0xff]   ;;  %v1350_v21 = vld [vmem:[%s2166_s1] sm:$0xff]   ;;  %v85_v24 = vld [vmem:[%s2167_s0 + $0x230] sm:$0xff] }
   0x8   :  { %1056 = vmatprep.subr.bf16.mxu0 %v1339_v4  ;;  %1319 = vmatprep.subr.bf16.mxu1 %v1339_v4  ;;  %v15_v22 = vld [vmem:[%s2167_s0] sm:$0xff]  ;;  %v20_v23 = vld [vmem:[%s2167_s0 + $0x28] sm:$0xff]  ;;  %v90_v25 = vld [vmem:[%s2167_s0 + $0x258] sm:$0xff] }
   0x9   :  { %572 = vmatprep.mubr.bf16.mxu0 %v141_v14  ;;  %628 = vmatprep.mubr.bf16.mxu1 %v176_v16  ;;  %v1352_v26 = vld [vmem:[%s2166_s1 + $0xf8] sm:$0xff]   ;;  %v31_v28 = vld [vmem:[%s2167_s0 + $0x80] sm:$0xff]  ;;  %v96_v29 = vld [vmem:[%s2167_s0 + $0x288] sm:$0xff]  ;;  %v140_v31 = vpack.c.bf16 %v20_v23, %v15_v22  ;;  %v175_v32 = vpack.c.bf16 %v90_v25, %v85_v24 }
   0xa   :  { %v26_v27 = vld [vmem:[%s2167_s0 + $0x58] sm:$0xff]  ;;  %v101_v30 = vld [vmem:[%s2167_s0 + $0x2b0] sm:$0xff]  ;;  %v95_v40 = vld [vmem:[%s2167_s0 + $0x280] sm:$0xff] }
   0xb   :  { %1057 = vmatpush3.bf16.msra.mxu0 %v1340_v5  ;;  %1327 = vmatpush3.bf16.msra.mxu1 %v1340_v5  ;;  %v1351_v33 = vld [vmem:[%s2166_s1 + $0x118] sm:$0xff]   ;;  %v146_v36 = vpack.c.bf16 %v31_v28, %v26_v27  ;;  %v181_v37 = vpack.c.bf16 %v101_v30, %v96_v29  ;;  %v25_v38 = vld [vmem:[%s2167_s0 + $0x50] sm:$0xff]  ;;  %v100_v42 = vld [vmem:[%s2167_s0 + $0x2a8] sm:$0xff] }
   0xc   :  { %1058 = vmatprep.subr.bf16.mxu0 %v1341_v6  ;;  %1320 = vmatprep.subr.bf16.mxu1 %v1341_v6  ;;  %v1353_v34 = vld [vmem:[%s2166_s1 + $0xb8] sm:$0xff]   ;;  %v1354_v41 = vld [vmem:[%s2166_s1 + $0xf0] sm:$0xff]   ;;  %v36_v44 = vld [vmem:[%s2167_s0 + $0xa8] sm:$0xff]  ;;  %v180_v51 = vpack.c.bf16 %v100_v42, %v95_v40 }
   0xd   :  { %v30_v39 = vld [vmem:[%s2167_s0 + $0x78] sm:$0xff]  ;;  %v1355_v43 = vld [vmem:[%s2166_s1 + $0xb0] sm:$0xff]   ;;  %v111_v48 = vld [vmem:[%s2167_s0 + $0x300] sm:$0xff] }
   0xe   :  { %v41_v45 = vld [vmem:[%s2167_s0 + $0xd0] sm:$0xff]  ;;  %v106_v46 = vld [vmem:[%s2167_s0 + $0x2d8] sm:$0xff]  ;;  %v1356_v49 = vld [vmem:[%s2166_s1 + $0xe8] sm:$0xff]   ;;  %v145_v50 = vpack.c.bf16 %v30_v39, %v25_v38 }
   0xf   :  { %1059 = vmatpush3.bf16.msra.mxu0 %v1342_v7  ;;  %1328 = vmatpush3.bf16.msra.mxu1 %v1342_v7  ;;  %v1357_v47 = vld [vmem:[%s2166_s1 + $0x110] sm:$0xff]   ;;  %v151_v52 = vpack.c.bf16 %v41_v45, %v36_v44  ;;  %v186_v53 = vpack.c.bf16 %v111_v48, %v106_v46  ;;  %v1358_v54 = vld [vmem:[%s2166_s1 + $0xa8] sm:$0xff]   ;;  %v35_v56 = vld [vmem:[%s2167_s0 + $0xa0] sm:$0xff] }
  0x10   :  { %1060 = vmatprep.subr.bf16.mxu0 %v1343_v8  ;;  %1321 = vmatprep.subr.bf16.mxu1 %v1343_v8  ;;  %v1363_v55 = vld [vmem:[%s2166_s1 + $0x108] sm:$0xff]   ;;  %v105_v58 = vld [vmem:[%s2167_s0 + $0x2d0] sm:$0xff]  ;;  %v110_v59 = vld [vmem:[%s2167_s0 + $0x2f8] sm:$0xff] }
  0x11   :  { %v40_v57 = vld [vmem:[%s2167_s0 + $0xc8] sm:$0xff]  ;;  %v1359_v60 = vld [vmem:[%s2166_s1 + $0xe0] sm:$0xff]   ;;  %v46_v62 = vld [vmem:[%s2167_s0 + $0xf8] sm:$0xff]  ;;  %v185_v4 = vpack.c.bf16 %v110_v59, %v105_v58 }
  0x12   :  { %v1360_v61 = vld [vmem:[%s2166_s1 + $0xa0] sm:$0xff]   ;;  %v116_v0 = vld [vmem:[%s2167_s0 + $0x328] sm:$0xff]  ;;  %v121_v1 = vld [vmem:[%s2167_s0 + $0x350] sm:$0xff]  ;;  %v150_v3 = vpack.c.bf16 %v40_v57, %v35_v56 }
  0x13   :  { %1061 = vmatpush3.bf16.msra.mxu0 %v1344_v9  ;;  %1329 = vmatpush3.bf16.msra.mxu1 %v1344_v9  ;;  %v51_v63 = vld [vmem:[%s2167_s0 + $0x120] sm:$0xff]  ;;  %v1361_v2 = vld [vmem:[%s2166_s1 + $0xd8] sm:$0xff]   ;;  %v191_v6 = vpack.c.bf16 %v121_v1, %v116_v0  ;;  %v1364_v8 = vld [vmem:[%s2166_s1 + $0xd0] sm:$0xff]  }
  0x14   :  { %1062 = vmatprep.subr.bf16.mxu0 %v1345_v10  ;;  %1322 = vmatprep.subr.bf16.mxu1 %v1345_v10  ;;  %v156_v5 = vpack.c.bf16 %v51_v63, %v46_v62  ;;  %v1362_v7 = vld [vmem:[%s2166_s1 + $0x98] sm:$0xff]   ;;  %v45_v9 = vld [vmem:[%s2167_s0 + $0xf0] sm:$0xff]  ;;  %v1368_v11 = vld [vmem:[%s2166_s1 + $0x100] sm:$0xff]  }
  0x15   :  { %v50_v10 = vld [vmem:[%s2167_s0 + $0x118] sm:$0xff]  ;;  %v115_v12 = vld [vmem:[%s2167_s0 + $0x320] sm:$0xff]  ;;  %v120_v13 = vld [vmem:[%s2167_s0 + $0x348] sm:$0xff] }
  0x16   :  { %v56_v14 = vld [vmem:[%s2167_s0 + $0x148] sm:$0xff]  ;;  %v61_v15 = vld [vmem:[%s2167_s0 + $0x170] sm:$0xff]  ;;  %v126_v16 = vld [vmem:[%s2167_s0 + $0x378] sm:$0xff] }
  0x17   :  { %1063 = vmatpush3.bf16.msra.mxu0 %v1346_v17  ;;  %1330 = vmatpush3.bf16.msra.mxu1 %v1346_v17  ;;  %v131_v17 = vld [vmem:[%s2167_s0 + $0x3a0] sm:$0xff]  ;;  %v161_v22 = vpack.c.bf16 %v61_v15, %v56_v14  ;;  %v1367_v24 = vld [vmem:[%s2166_s1 + $0x88] sm:$0xff]   ;;  %v125_v28 = vld [vmem:[%s2167_s0 + $0x370] sm:$0xff] }
  0x18   :  { %1064 = vmatprep.subr.bf16.mxu0 %v1347_v18  ;;  %1323 = vmatprep.subr.bf16.mxu1 %v1347_v18  ;;  %v1365_v18 = vld [vmem:[%s2166_s1 + $0x90] sm:$0xff]   ;;  %v196_v23 = vpack.c.bf16 %v131_v17, %v126_v16  ;;  %v1369_v25 = vld [vmem:[%s2166_s1 + $0xc0] sm:$0xff]   ;;  %v60_v27 = vld [vmem:[%s2167_s0 + $0x168] sm:$0xff] }
  0x19   :  { %v130_v29 = vld [vmem:[%s2167_s0 + $0x398] sm:$0xff]  ;;  %v65_v39 = vld [vmem:[%s2167_s0 + $0x190] sm:$0xff]  ;;  %v76_v42 = vld [vmem:[%s2167_s0 + $0x1e8] sm:$0xff] }
  0x1a   :  { %v66_v30 = vld [vmem:[%s2167_s0 + $0x198] sm:$0xff]  ;;  %v23_v45 = vld [vmem:[%s2167_s0 + $0x40] sm:$0xff]  ;;  %v24_v62 = vld [vmem:[%s2167_s0 + $0x48] sm:$0xff] }
  0x1b   :  { %1065 = vmatpush3.bf16.msra.mxu0 %v1348_v19  ;;  %1331 = vmatpush3.bf16.msra.mxu1 %v1348_v19  ;;  %v1366_v19 = vld [vmem:[%s2166_s1 + $0xc8] sm:$0xff]   ;;  %v70_v40 = vld [vmem:[%s2167_s0 + $0x1b8] sm:$0xff]  ;;  %v27_v59 = vld [vmem:[%s2167_s0 + $0x60] sm:$0xff] }
  0x1c   :  { %1066 = vmatprep.subr.bf16.mxu0 %v1349_v20  ;;  %1324 = vmatprep.subr.bf16.mxu1 %v1349_v20  ;;  %v155_v20 = vpack.c.bf16 %v50_v10, %v45_v9  ;;  %v18_v44 = vld [vmem:[%s2167_s0 + $0x18] sm:$0xff]  ;;  %v165_v46 = vpack.c.bf16 %v70_v40, %v65_v39  ;;  %v43_v0 = vld [vmem:[%s2167_s0 + $0xe0] sm:$0xff]  ;;  %v53_v9 = vld [vmem:[%s2167_s0 + $0x130] sm:$0xff] }
  0x1d   :  { %v38_v63 = vld [vmem:[%s2167_s0 + $0xb8] sm:$0xff]  ;;  %v52_v14 = vld [vmem:[%s2167_s0 + $0x128] sm:$0xff]  ;;  %v39_v15 = vld [vmem:[%s2167_s0 + $0xc0] sm:$0xff] }
  0x1e   :  { %v44_v16 = vld [vmem:[%s2167_s0 + $0xe8] sm:$0xff]  ;;  %v58_v17 = vld [vmem:[%s2167_s0 + $0x158] sm:$0xff] }
  0x1f   :  { %1067 = vmatpush3.bf16.msra.mxu0 %v1350_v21  ;;  %1332 = vmatpush3.bf16.msra.mxu1 %v1350_v21  ;;  %v190_v21 = vpack.c.bf16 %v120_v13, %v115_v12  ;;  %v47_v13 = vld [vmem:[%s2167_s0 + $0x100] sm:$0xff] }
  0x20   :  { %1257 = vmatprep.subr.bf16.mxu0 %v1371_v35  ;;  %1146 = vmatprep.subr.bf16.mxu1 %v1352_v26  ;;  %v55_v26 = vld [vmem:[%s2167_s0 + $0x140] sm:$0xff] }
  0x22   :  { %573 = vmatmul.mubr.bf16.vlgmr.msra.gmra.mxu0 %v140_v31  ;;  %629 = vmatmul.mubr.bf16.vlgmr.msra.gmra.mxu1 %v175_v32  ;;  %v71_v31 = vld [vmem:[%s2167_s0 + $0x1c0] sm:$0xff]  ;;  %v136_v32 = vld [vmem:[%s2167_s0 + $0x3c8] sm:$0xff] }
  0x23   :  { %1258 = vmatpush3.bf16.msra.mxu0 %v1351_v33  ;;  %1147 = vmatpush3.bf16.msra.mxu1 %v1353_v34  ;;  %v1370_v33 = vld [vmem:[%s2166_s1 + $0x80] sm:$0xff]   ;;  %v160_v34 = vpack.c.bf16 %v60_v27, %v55_v26  ;;  %v201_v38 = vpack.c.bf16 %v136_v32, %v136_v32  ;;  %v68_v26 = vld [vmem:[%s2167_s0 + $0x1a8] sm:$0xff]  ;;  %v73_v27 = vld [vmem:[%s2167_s0 + $0x1d0] sm:$0xff] }
  0x24   :  { %580 = vmatprep.mubr.bf16.mxu0 %v146_v36  ;;  %636 = vmatprep.mubr.bf16.mxu1 %v181_v37  ;;  %v195_v36 = vpack.c.bf16 %v130_v29, %v125_v28  ;;  %v166_v37 = vpack.c.bf16 %v71_v31, %v66_v30  ;;  %v168_v30 = vpack.c.bf16 %v73_v27, %v68_v26  ;;  %v67_v31 = vld [vmem:[%s2167_s0 + $0x1a0] sm:$0xff]  ;;  %v72_v32 = vld [vmem:[%s2167_s0 + $0x1c8] sm:$0xff]  ;;  %v138_v26 = vld [vmem:[%s2167_s0 + $0x3d8] sm:$0xff] }
  0x25   :  { %1148 = vmatprep.subr.bf16.mxu1 %v1354_v41  ;;  %1259 = vmatprep.subr.bf16.mxu0 %v1371_v35  ;;  %v135_v41 = vld [vmem:[%s2167_s0 + $0x3c0] sm:$0xff] }
  0x27   :  { %1149 = vmatpush3.bf16.msra.mxu1 %v1355_v43  ;;  %1260 = vmatpush3.bf16.msra.mxu0 %v1357_v47  ;;  %v81_v43 = vld [vmem:[%s2167_s0 + $0x210] sm:$0xff]  ;;  %v200_v47 = vpack.c.bf16 %v135_v41, %v135_v41 }
  0x28   :  { %1150 = vmatprep.subr.bf16.mxu1 %v1356_v49  ;;  %1261 = vmatprep.subr.bf16.mxu0 %v1371_v35  ;;  %v171_v48 = vpack.c.bf16 %v81_v43, %v76_v42  ;;  %v143_v49 = vpack.c.bf16 %v23_v45, %v18_v44  ;;  %v77_v41 = vld [vmem:[%s2167_s0 + $0x1f0] sm:$0xff]  ;;  %v82_v42 = vld [vmem:[%s2167_s0 + $0x218] sm:$0xff]  ;;  %v88_v45 = vld [vmem:[%s2167_s0 + $0x248] sm:$0xff] }
  0x29   :  { %v69_v43 = vld [vmem:[%s2167_s0 + $0x1b0] sm:$0xff]  ;;  %v74_v44 = vld [vmem:[%s2167_s0 + $0x1d8] sm:$0xff] }
  0x2a   :  { %581 = vmatmul.mubr.bf16.gmra.mxu0 %v145_v50  ;;  %637 = vmatmul.mubr.bf16.gmra.mxu1 %v180_v51  ;;  %v75_v50 = vld [vmem:[%s2167_s0 + $0x1e0] sm:$0xff]  ;;  %v80_v51 = vld [vmem:[%s2167_s0 + $0x208] sm:$0xff] }
  0x2b   :  { %588 = vmatprep.mubr.bf16.mxu0 %v151_v52  ;;  %644 = vmatprep.mubr.bf16.mxu1 %v186_v53  ;;  %v17_v52 = vld [vmem:[%s2167_s0 + $0x10] sm:$0xff]  ;;  %v22_v53 = vld [vmem:[%s2167_s0 + $0x38] sm:$0xff]  ;;  %v170_v56 = vpack.c.bf16 %v80_v51, %v75_v50  ;;  %v87_v50 = vld [vmem:[%s2167_s0 + $0x240] sm:$0xff] }
  0x2c   :  { %1151 = vmatpush3.bf16.msra.mxu1 %v1358_v54  ;;  %1262 = vmatpush3.bf16.msra.mxu0 %v1363_v55  ;;  %v28_v54 = vld [vmem:[%s2167_s0 + $0x68] sm:$0xff]  ;;  %v33_v55 = vld [vmem:[%s2167_s0 + $0x90] sm:$0xff]  ;;  %v142_v57 = vpack.c.bf16 %v22_v53, %v17_v52  ;;  %v79_v52 = vld [vmem:[%s2167_s0 + $0x200] sm:$0xff] }
  0x2d   :  { %1152 = vmatprep.subr.bf16.mxu1 %v1359_v60  ;;  %1263 = vmatprep.subr.bf16.mxu0 %v1371_v35  ;;  %v148_v58 = vpack.c.bf16 %v33_v55, %v28_v54  ;;  %v32_v60 = vld [vmem:[%s2167_s0 + $0x88] sm:$0xff]  ;;  %v98_v54 = vld [vmem:[%s2167_s0 + $0x298] sm:$0xff]  ;;  %v103_v55 = vld [vmem:[%s2167_s0 + $0x2c0] sm:$0xff] }
  0x2e   :  { %v147_v1 = vpack.c.bf16 %v32_v60, %v27_v59  ;;  %v92_v51 = vld [vmem:[%s2167_s0 + $0x268] sm:$0xff]  ;;  %v97_v59 = vld [vmem:[%s2167_s0 + $0x290] sm:$0xff]  ;;  %v102_v60 = vld [vmem:[%s2167_s0 + $0x2b8] sm:$0xff] }
  0x2f   :  { %v84_v53 = vld [vmem:[%s2167_s0 + $0x228] sm:$0xff] }
  0x30   :  { %1153 = vmatpush3.bf16.msra.mxu1 %v1360_v61  ;;  %1264 = vmatpush3.bf16.msra.mxu0 %v1368_v11  ;;  %v19_v61 = vld [vmem:[%s2167_s0 + $0x20] sm:$0xff] }
  0x31   :  { %1154 = vmatprep.subr.bf16.mxu1 %v1361_v2  ;;  %v144_v2 = vpack.c.bf16 %v24_v62, %v19_v61  ;;  %v89_v61 = vld [vmem:[%s2167_s0 + $0x250] sm:$0xff]  ;;  %v94_v62 = vld [vmem:[%s2167_s0 + $0x278] sm:$0xff] }
  0x32   :  { %589 = vmatmul.mubr.bf16.gmra.mxu0 %v150_v3  ;;  %645 = vmatmul.mubr.bf16.gmra.mxu1 %v185_v4  ;;  %v153_v3 = vpack.c.bf16 %v43_v0, %v38_v63  ;;  %v37_v4 = vld [vmem:[%s2167_s0 + $0xb0] sm:$0xff]  ;;  %v108_v63 = vld [vmem:[%s2167_s0 + $0x2e8] sm:$0xff] }
  0x33   :  { %596 = vmatprep.mubr.bf16.mxu0 %v156_v5  ;;  %652 = vmatprep.mubr.bf16.mxu1 %v191_v6  ;;  %v42_v5 = vld [vmem:[%s2167_s0 + $0xd8] sm:$0xff]  ;;  %v29_v6 = vld [vmem:[%s2167_s0 + $0x70] sm:$0xff] }
  0x34   :  { %1155 = vmatpush3.bf16.msra.mxu1 %v1362_v7  ;;  %v34_v7 = vld [vmem:[%s2167_s0 + $0x98] sm:$0xff]  ;;  %v152_v10 = vpack.c.bf16 %v42_v5, %v37_v4  ;;  %v113_v0 = vld [vmem:[%s2167_s0 + $0x310] sm:$0xff]  ;;  %v107_v4 = vld [vmem:[%s2167_s0 + $0x2e0] sm:$0xff] }
  0x35   :  { %1156 = vmatprep.subr.bf16.mxu1 %v1364_v8  ;;  %v48_v8 = vld [vmem:[%s2167_s0 + $0x108] sm:$0xff]  ;;  %v149_v11 = vpack.c.bf16 %v34_v7, %v29_v6  ;;  %v99_v6 = vld [vmem:[%s2167_s0 + $0x2a0] sm:$0xff] }
  0x36   :  { %v158_v12 = vpack.c.bf16 %v53_v9, %v48_v8  ;;  %v112_v5 = vld [vmem:[%s2167_s0 + $0x308] sm:$0xff]  ;;  %v118_v8 = vld [vmem:[%s2167_s0 + $0x338] sm:$0xff]  ;;  %v123_v9 = vld [vmem:[%s2167_s0 + $0x360] sm:$0xff] }
  0x37   :  { %v104_v7 = vld [vmem:[%s2167_s0 + $0x2c8] sm:$0xff] }
  0x38   :  { %1157 = vmatpush3.bf16.msra.mxu1 %v1365_v18  ;;  %v63_v18 = vld [vmem:[%s2167_s0 + $0x180] sm:$0xff] }
  0x39   :  { %1158 = vmatprep.subr.bf16.mxu1 %v1366_v19  ;;  %v157_v19 = vpack.c.bf16 %v52_v14, %v47_v13  ;;  %v117_v13 = vld [vmem:[%s2167_s0 + $0x330] sm:$0xff]  ;;  %v122_v14 = vld [vmem:[%s2167_s0 + $0x358] sm:$0xff] }
  0x3a   :  { %597 = vmatmul.mubr.bf16.gmra.mxu0 %v155_v20  ;;  %653 = vmatmul.mubr.bf16.gmra.mxu1 %v190_v21  ;;  %v154_v20 = vpack.c.bf16 %v44_v16, %v39_v15  ;;  %v163_v21 = vpack.c.bf16 %v63_v18, %v58_v17  ;;  %v109_v15 = vld [vmem:[%s2167_s0 + $0x2f0] sm:$0xff]  ;;  %v114_v16 = vld [vmem:[%s2167_s0 + $0x318] sm:$0xff]  ;;  %v128_v17 = vld [vmem:[%s2167_s0 + $0x388] sm:$0xff] }
  0x3b   :  { %604 = vmatprep.mubr.bf16.mxu0 %v161_v22  ;;  %660 = vmatprep.mubr.bf16.mxu1 %v196_v23  ;;  %v57_v22 = vld [vmem:[%s2167_s0 + $0x150] sm:$0xff]  ;;  %v62_v23 = vld [vmem:[%s2167_s0 + $0x178] sm:$0xff] }
  0x3c   :  { %1159 = vmatpush3.bf16.msra.mxu1 %v1367_v24  ;;  %v49_v24 = vld [vmem:[%s2167_s0 + $0x110] sm:$0xff]  ;;  %v162_v28 = vpack.c.bf16 %v62_v23, %v57_v22  ;;  %v127_v22 = vld [vmem:[%s2167_s0 + $0x380] sm:$0xff]  ;;  %v132_v23 = vld [vmem:[%s2167_s0 + $0x3a8] sm:$0xff] }
  0x3d   :  { %1160 = vmatprep.subr.bf16.mxu1 %v1369_v25  ;;  %v54_v25 = vld [vmem:[%s2167_s0 + $0x138] sm:$0xff]  ;;  %v133_v18 = vld [vmem:[%s2167_s0 + $0x3b0] sm:$0xff]  ;;  %v197_v27 = vpack.c.bf16 %v132_v23, %v127_v22 }
  0x3e   :  { %v159_v29 = vpack.c.bf16 %v54_v25, %v49_v24  ;;  %v119_v24 = vld [vmem:[%s2167_s0 + $0x340] sm:$0xff]  ;;  %v124_v25 = vld [vmem:[%s2167_s0 + $0x368] sm:$0xff] }
  0x40   :  { %1161 = vmatpush3.bf16.msra.mxu1 %v1370_v33  ;;  %v59_v33 = vld [vmem:[%s2167_s0 + $0x160] sm:$0xff] }
  0x42   :  { %605 = vmatmul.mubr.bf16.gmra.mxu0 %v160_v34  ;;  %661 = vmatmul.mubr.bf16.gmra.mxu1 %v195_v36  ;;  %v64_v34 = vld [vmem:[%s2167_s0 + $0x188] sm:$0xff]  ;;  %v78_v36 = vld [vmem:[%s2167_s0 + $0x1f8] sm:$0xff] }
  0x43   :  { %612 = vmatprep.mubr.bf16.mxu0 %v166_v37  ;;  %668 = vmatprep.mubr.bf16.mxu1 %v201_v38  ;;  %v83_v37 = vld [vmem:[%s2167_s0 + $0x220] sm:$0xff]  ;;  %v167_v38 = vpack.c.bf16 %v72_v32, %v67_v31  ;;  %v164_v39 = vpack.c.bf16 %v64_v34, %v59_v33  ;;  %v129_v31 = vld [vmem:[%s2167_s0 + $0x390] sm:$0xff]  ;;  %v134_v32 = vld [vmem:[%s2167_s0 + $0x3b8] sm:$0xff] }
  0x44   :  { %v173_v40 = vpack.c.bf16 %v83_v37, %v78_v36  ;;  %v199_v34 = vpack.c.bf16 %v134_v32, %v129_v31  ;;  %v139_v36 = vld [vmem:[%s2167_s0 + $0x3e0] sm:$0xff] }
  0x45   :  { %v204_v37 = vpack.c.bf16 %v139_v36, %v139_v36 }
  0x4a   :  { %613 = vmatmul.mubr.bf16.gmra.mxu0 %v165_v46  ;;  %669 = vmatmul.mubr.bf16.gmra.mxu1 %v200_v47  ;;  %v93_v46 = vld [vmem:[%s2167_s0 + $0x270] sm:$0xff]  ;;  %v172_v47 = vpack.c.bf16 %v82_v42, %v77_v41 }
  0x4b   :  { %620 = vmatprep.mubr.bf16.mxu0 %v171_v48  ;;  %708 = vmatprep.mubr.bf16.mxu1 %v143_v49  ;;  %v169_v48 = vpack.c.bf16 %v74_v44, %v69_v43  ;;  %v178_v49 = vpack.c.bf16 %v93_v46, %v88_v45 }
  0x52   :  { %621 = vmatmul.mubr.bf16.gmra.mxu0 %v170_v56  ;;  %709 = vmatmul.mubr.bf16.vlgmr.msra.gmra.mxu1 %v142_v57  ;;  %v177_v56 = vpack.c.bf16 %v92_v51, %v87_v50  ;;  %v174_v57 = vpack.c.bf16 %v84_v53, %v79_v52  ;;  %v1938_v52 = vld [vmem:[%s2168_s2] ss:$0 sm:$0xff] }
  0x53   :  { %716 = vmatprep.mubr.bf16.mxu1 %v148_v58  ;;  %1265 = vmatprep.mubr.msk.bf16.mxu0 %vm1372_vm0, %v1371_v35  ;;  %v183_v58 = vpack.c.bf16 %v103_v55, %v98_v54 }
  0x5a   :  { %717 = vmatmul.mubr.bf16.gmra.mxu1 %v147_v1  ;;  %1266 = vmatmul.mubr.msk.bf16.vlgmr.msra.gmra.mxu0 %vm500_vm1, %v144_v2  ;;  %v182_v1 = vpack.c.bf16 %v102_v60, %v97_v59  ;;  %v179_v2 = vpack.c.bf16 %v94_v62, %v89_v61 }
  0x5b   :  { %724 = vmatprep.mubr.bf16.mxu1 %v153_v3  ;;  %1269 = vmatprep.mubr.msk.bf16.mxu0 %vm1372_vm0, %v1371_v35  ;;  %v188_v3 = vpack.c.bf16 %v113_v0, %v108_v63 }
  0x62   :  { %725 = vmatmul.mubr.bf16.gmra.mxu1 %v152_v10  ;;  %1270 = vmatmul.mubr.msk.bf16.gmra.mxu0 %vm500_vm1, %v149_v11  ;;  %v187_v10 = vpack.c.bf16 %v112_v5, %v107_v4  ;;  %v184_v11 = vpack.c.bf16 %v104_v7, %v99_v6 }
  0x63   :  { %732 = vmatprep.mubr.bf16.mxu1 %v158_v12  ;;  %1273 = vmatprep.mubr.msk.bf16.mxu0 %vm1372_vm0, %v1371_v35  ;;  %v193_v12 = vpack.c.bf16 %v123_v9, %v118_v8 }
  0x6a   :  { %733 = vmatmul.mubr.bf16.gmra.mxu1 %v157_v19  ;;  %1274 = vmatmul.mubr.msk.bf16.gmra.mxu0 %vm500_vm1, %v154_v20  ;;  %v192_v19 = vpack.c.bf16 %v122_v14, %v117_v13  ;;  %v189_v20 = vpack.c.bf16 %v114_v16, %v109_v15 }
  0x6b   :  { %740 = vmatprep.mubr.bf16.mxu1 %v163_v21  ;;  %1277 = vmatprep.mubr.msk.bf16.mxu0 %vm1372_vm0, %v1371_v35  ;;  %v198_v21 = vpack.c.bf16 %v133_v18, %v128_v17 }
  0x72   :  { %741 = vmatmul.mubr.bf16.gmra.mxu1 %v162_v28  ;;  %1278 = vmatmul.mubr.msk.bf16.gmra.mxu0 %vm500_vm1, %v159_v29  ;;  %v194_v28 = vpack.c.bf16 %v124_v25, %v119_v24  ;;  %v203_v29 = vpack.c.bf16 %v138_v26, %v138_v26 }
  0x73   :  { %748 = vmatprep.mubr.bf16.mxu1 %v168_v30  ;;  %1281 = vmatprep.mubr.msk.bf16.mxu0 %vm1372_vm0, %v1371_v35  ;;  %v137_v30 = vld [vmem:[%s2167_s0 + $0x3d0] sm:$0xff] }
  0x74   :  { %v202_v33 = vpack.c.bf16 %v137_v30, %v137_v30 }
  0x7a   :  { %749 = vmatmul.mubr.bf16.gmra.mxu1 %v167_v38  ;;  %1282 = vmatmul.mubr.msk.bf16.gmra.mxu0 %vm500_vm1, %v164_v39 }
  0x7b   :  { %756 = vmatprep.mubr.bf16.mxu1 %v173_v40  ;;  %1285 = vmatprep.mubr.msk.bf16.mxu0 %vm1372_vm0, %v1371_v35 }
  0x82   :  { %757 = vmatmul.mubr.bf16.gmra.mxu1 %v172_v47  ;;  %1286 = vmatmul.mubr.msk.bf16.gmra.mxu0 %vm500_vm1, %v169_v48 }
  0x83   :  { %764 = vmatprep.mubr.bf16.mxu1 %v178_v49  ;;  %1289 = vmatprep.mubr.msk.bf16.mxu0 %vm1372_vm0, %v1371_v35 }
  0x8a   :  { %765 = vmatmul.mubr.bf16.gmra.mxu1 %v177_v56  ;;  %1290 = vmatmul.mubr.msk.bf16.gmra.mxu0 %vm500_vm1, %v174_v57 }
  0x8b   :  { %772 = vmatprep.mubr.bf16.mxu1 %v183_v58  ;;  %1293 = vmatprep.mubr.msk.bf16.mxu0 %vm1372_vm0, %v1371_v35 }
  0x92   :  { %773 = vmatmul.mubr.bf16.gmra.mxu1 %v182_v1  ;;  %1294 = vmatmul.mubr.msk.bf16.gmra.mxu0 %vm500_vm1, %v179_v2 }
  0x93   :  { %780 = vmatprep.mubr.bf16.mxu1 %v188_v3  ;;  %1297 = vmatprep.mubr.msk.bf16.mxu0 %vm1372_vm0, %v1371_v35 }
  0x9a   :  { %781 = vmatmul.mubr.bf16.gmra.mxu1 %v187_v10  ;;  %1298 = vmatmul.mubr.msk.bf16.gmra.mxu0 %vm500_vm1, %v184_v11 }
  0x9b   :  { %788 = vmatprep.mubr.bf16.mxu1 %v193_v12  ;;  %1301 = vmatprep.mubr.msk.bf16.mxu0 %vm1372_vm0, %v1371_v35 }
  0xa2   :  { %789 = vmatmul.mubr.bf16.gmra.mxu1 %v192_v19  ;;  %1302 = vmatmul.mubr.msk.bf16.gmra.mxu0 %vm500_vm1, %v189_v20 }
  0xa3   :  { %796 = vmatprep.mubr.bf16.mxu1 %v198_v21  ;;  %1305 = vmatprep.mubr.msk.bf16.mxu0 %vm1372_vm0, %v1371_v35 }
  0xaa   :  { %797 = vmatmul.mubr.bf16.gmra.mxu1 %v197_v27  ;;  %1306 = vmatmul.mubr.msk.bf16.gmra.mxu0 %vm500_vm1, %v194_v28 }
  0xab   :  { %804 = vmatprep.mubr.bf16.mxu1 %v203_v29  ;;  %1309 = vmatprep.mubr.msk.bf16.mxu0 %vm1372_vm0, %v1371_v35 }
  0xb2   :  { %805 = vmatmul.mubr.bf16.gmra.mxu1 %v202_v33  ;;  %1310 = vmatmul.mubr.msk.bf16.gmra.mxu0 %vm500_vm1, %v199_v34 }
  0xb3   :  { %1313 = vmatprep.mubr.msk.bf16.mxu0 %vm1372_vm0, %v1371_v35 }
  0xba   :  { %1314 = vmatmul.mubr.msk.bf16.gmra.mxu0 %vm500_vm1, %v204_v37 }
  0xe2   :  { %v1919_v38 = vpop.f32.mrf.mxu0  ;;  %v1110_v39 = vpop.f32.mrf.mxu1 }
  0xe4   :  { %v1921_v40 = vpop.f32.mrf.mxu0  ;;  %v1111_v41 = vpop.f32.mrf.mxu1 }
  0xe5   :  { %v1923_v42 = vadd.f32 %v1111_v41, %v1110_v39 }
  0xe6   :  { %v1925_v43 = vpop.f32.mrf.mxu0  ;;  %v1113_v44 = vpop.f32.mrf.mxu1 }
  0xe8   :  { %v1927_v45 = vpop.f32.mrf.mxu0  ;;  %v1114_v35 = vpop.f32.mrf.mxu1 }
  0xe9   :  { %v1929_v46 = vadd.f32 %v1114_v35, %v1113_v44 }
  0xea   :  { %v1931_v47 = vpop.f32.mrf.mxu0  ;;  %v1116_v48 = vpop.f32.mrf.mxu1 }
  0xec   :  { %v1933_v49 = vpop.f32.mrf.mxu0  ;;  %v1117_v50 = vpop.f32.mrf.mxu1 }
  0xed   :  { %v1118_v51 = vadd.f32 %v1117_v50, %v1116_v48 }
  0xee   :  { %v1940_v53 = vpop.f32.mrf.mxu0  ;;  %v1119_v54 = vpop.f32.mrf.mxu1 }
  0xef   :  { %v1943_v55 = vadd.f32 %v1118_v51, %v1938_v52 }
  0xf0   :  { %v1945_v56 = vpop.f32.mrf.mxu0  ;;  %v1120_v57 = vpop.f32.mrf.mxu1 }
  0xf1   :  { %v1121_v58 = vadd.f32 %v1120_v57, %v1119_v54  ;;  %v1070_v54 = vadd.f32 %v1921_v40, %v1919_v38  ;;  %v1076_v40 = vadd.f32 %v1933_v49, %v1931_v47 }
  0xf2   :  { %v1947_v59 = vpop.f32.mrf.mxu0  ;;  %v1122_v60 = vpop.f32.mrf.mxu1 }
  0xf3   :  { %v1950_v61 = vadd.f32 %v1121_v58, %v1938_v52 }
  0xf4   :  { %v1952_v62 = vpop.f32.mrf.mxu0  ;;  %v1123_v63 = vpop.f32.mrf.mxu1 }
  0xf5   :  { %v1124_v0 = vadd.f32 %v1123_v63, %v1122_v60 }
  0xf6   :  { %v1954_v1 = vpop.f32.mrf.mxu0  ;;  %v1125_v2 = vpop.f32.mrf.mxu1 }
  0xf7   :  { %v1957_v3 = vadd.f32 %v1124_v0, %v1938_v52 }
  0xf8   :  { %v1959_v4 = vpop.f32.mrf.mxu0  ;;  %v1126_v5 = vpop.f32.mrf.mxu1 }
  0xf9   :  { %v1127_v6 = vadd.f32 %v1126_v5, %v1125_v2  ;;  %v575_v2 = vadd.f32 %v1070_v54, %v1938_v52  ;;  %v1073_v5 = vadd.f32 %v1927_v45, %v1925_v43  ;;  %v583_v45 = vadd.f32 %v1076_v40, %v1938_v52 }
  0xfa   :  { %v1961_v7 = vpop.f32.mrf.mxu0  ;;  %v1128_v8 = vpop.f32.mrf.mxu1 }
  0xfb   :  { %v1964_v9 = vadd.f32 %v1127_v6, %v1938_v52  ;;  %v578_v38 = vadd.f32 %v1073_v5, %v1938_v52 }
  0xfc   :  { %v1966_v10 = vpop.f32.mrf.mxu0  ;;  %v1129_v11 = vpop.f32.mrf.mxu1 }
  0xfd   :  { %v1130_v12 = vadd.f32 %v1129_v11, %v1128_v8 }
  0xfe   :  { %v1968_v13 = vpop.f32.mrf.mxu0  ;;  %v1131_v14 = vpop.f32.mrf.mxu1 }
  0xff   :  { %v1971_v15 = vadd.f32 %v1130_v12, %v1938_v52 }
 0x100   :  { %v1973_v16 = vpop.f32.mrf.mxu0  ;;  %v1132_v17 = vpop.f32.mrf.mxu1 }
 0x101   :  { %v1133_v18 = vadd.f32 %v1132_v17, %v1131_v14 }
 0x102   :  { %v1975_v19 = vpop.f32.mrf.mxu0  ;;  %v1134_v20 = vpop.f32.mrf.mxu1 }
 0x103   :  { %v1978_v21 = vadd.f32 %v1133_v18, %v1938_v52 }
 0x104   :  { %v1980_v22 = vpop.f32.mrf.mxu0  ;;  %v1135_v23 = vpop.f32.mrf.mxu1 }
 0x105   :  { %v1136_v24 = vadd.f32 %v1135_v23, %v1134_v20 }
 0x106   :  { %v1982_v25 = vpop.f32.mrf.mxu0  ;;  %v1137_v26 = vpop.f32.mrf.mxu1 }
 0x107   :  { %v1985_v27 = vadd.f32 %v1136_v24, %v1938_v52 }
 0x108   :  { %v1987_v28 = vpop.f32.mrf.mxu0  ;;  %v1138_v29 = vpop.f32.mrf.mxu1 }
 0x109   :  { %v1139_v30 = vadd.f32 %v1138_v29, %v1137_v26 }
 0x10a   :  { %v1989_v31 = vpop.f32.mrf.mxu0  ;;  %v1140_v32 = vpop.f32.mrf.mxu1 }
 0x10b   :  { %v1992_v33 = vadd.f32 %v1139_v30, %v1938_v52 }
 0x10c   :  { %v1994_v34 = vpop.f32.mrf.mxu0  ;;  %v1141_v36 = vpop.f32.mrf.mxu1 }
 0x10d   :  { %v1142_v37 = vadd.f32 %v1141_v36, %v1140_v32  ;;  %v1079_v32 = vadd.f32 %v1945_v56, %v1940_v53 }
 0x10e   :  { %v1996_v39 = vpop.f32.mrf.mxu0  ;;  %v1143_v41 = vpop.f32.mrf.mxu1 }
 0x10f   :  { %v1999_v44 = vadd.f32 %v1142_v37, %v1938_v52 }
 0x110   :  { %v2001_v35 = vpop.f32.mrf.mxu0  ;;  %v1144_v48 = vpop.f32.mrf.mxu1 }
 0x112   :  { %v2003_v50 = vpop.f32.mrf.mxu0  ;;  %v1162_v51 = vpop.f32.mrf.mxu1 }
 0x114   :  { %v2007_v57 = vpop.f32.mrf.mxu0  ;;  %v1163_v58 = vpop.f32.mrf.mxu1 }
 0x115   :  { %v1164_v60 = vadd.f32 %v1163_v58, %v1162_v51  ;;  %v586_v58 = vadd.f32 %v1079_v32, %v1938_v52 }
 0x116   :  { %v2009_v63 = vpop.f32.mrf.mxu0  ;;  %v1165_v0 = vpop.f32.mrf.mxu1 }
 0x117   :  { %v711_v12 = vadd.f32 %v1164_v60, %v575_v2  ;;  %v1082_v60 = vadd.f32 %v1952_v62, %v1947_v59 }
 0x118   :  { %v2014_v6 = vpop.f32.mrf.mxu0  ;;  %v1166_v8 = vpop.f32.mrf.mxu1 }
 0x119   :  { %v1167_v11 = vadd.f32 %v1166_v8, %v1165_v0 }
 0x11a   :  { %v1168_v14 = vpop.f32.mrf.mxu1  ;;  %v846_v17 = vpop.f32.mrf.mxu0 }
 0x11b   :  { %v847_v18 = vadd.f32 %v846_v17, %v711_v12  ;;  %v714_v29 = vadd.f32 %v1167_v11, %v578_v38  ;;  %v1085_v17 = vadd.f32 %v1959_v4, %v1954_v1 }
 0x11c   :  { %v1169_v20 = vpop.f32.mrf.mxu1  ;;  %v1267_v23 = vpop.f32.mrf.mxu0 }
 0x11d   :  { %v948_v24 = vmax.f32 %v847_v18, 0.0  ;;  %v1170_v26 = vadd.f32 %v1169_v20, %v1168_v14  ;;  %v591_v14 = vadd.f32 %v1082_v60, %v1938_v52 }
 0x11e   :  { %v1171_v30 = vpop.f32.mrf.mxu1  ;;  %v849_v43 = vpop.f32.mrf.mxu0 }
 0x11f   :  { %973 = vst.msk [vmem:[%s2169_s3] sm:$0xff] %vm500_vm1, %v948_v24  ;;  %v850_v36 = vadd.f32 %v849_v43, %v714_v29  ;;  %v719_v48 = vadd.f32 %v1170_v26, %v583_v45  ;;  %v594_v26 = vadd.f32 %v1085_v17, %v1938_v52  ;;  %v1088_v29 = vadd.f32 %v1966_v10, %v1961_v7 }
 0x120   :  { %v1172_v47 = vpop.f32.mrf.mxu1  ;;  %v1268_v49 = vpop.f32.mrf.mxu0  ;;  %v1097_v17 = vadd.f32 %v1987_v28, %v1982_v25 }
 0x121   :  { %v949_v37 = vmax.f32 %v850_v36, 0.0  ;;  %v1173_v41 = vadd.f32 %v1172_v47, %v1171_v30  ;;  %v599_v49 = vadd.f32 %v1088_v29, %v1938_v52 }
 0x122   :  { %v1174_v51 = vpop.f32.mrf.mxu1  ;;  %v854_v54 = vpop.f32.mrf.mxu0 }
 0x123   :  { %974 = vst.msk [vmem:[%s2169_s3 + $0x8] sm:$0xff] %vm500_vm1, %v949_v37  ;;  %v855_v53 = vadd.f32 %v854_v54, %v719_v48  ;;  %v722_v8 = vadd.f32 %v1173_v41, %v586_v58  ;;  %v1091_v37 = vadd.f32 %v1973_v16, %v1968_v13 }
 0x124   :  { %v1175_v56 = vpop.f32.mrf.mxu1  ;;  %v1271_v0 = vpop.f32.mrf.mxu0 }
 0x125   :  { %v950_v2 = vmax.f32 %v855_v53, 0.0  ;;  %v1176_v5 = vadd.f32 %v1175_v56, %v1174_v51  ;;  %v602_v53 = vadd.f32 %v1091_v37, %v1938_v52  ;;  %v1094_v56 = vadd.f32 %v1980_v22, %v1975_v19 }
 0x126   :  { %v1177_v11 = vpop.f32.mrf.mxu1  ;;  %v857_v12 = vpop.f32.mrf.mxu0 }
 0x127   :  { %975 = vst.msk [vmem:[%s2169_s3 + $0x10] sm:$0xff] %vm500_vm1, %v950_v2  ;;  %v858_v59 = vadd.f32 %v857_v12, %v722_v8  ;;  %v727_v20 = vadd.f32 %v1176_v5, %v591_v14  ;;  %v607_v14 = vadd.f32 %v1094_v56, %v1938_v52 }
 0x128   :  { %v1178_v62 = vpop.f32.mrf.mxu1  ;;  %v1272_v38 = vpop.f32.mrf.mxu0 }
 0x129   :  { %v951_v40 = vmax.f32 %v858_v59, 0.0  ;;  %v1179_v18 = vadd.f32 %v1178_v62, %v1177_v11 }
 0x12a   :  { %v1180_v23 = vpop.f32.mrf.mxu1  ;;  %v862_v24 = vpop.f32.mrf.mxu0 }
 0x12b   :  { %976 = vst.msk [vmem:[%s2169_s3 + $0x18] sm:$0xff] %vm500_vm1, %v951_v40  ;;  %v863_v1 = vadd.f32 %v862_v24, %v727_v20  ;;  %v730_v32 = vadd.f32 %v1179_v18, %v594_v26  ;;  %v1100_v24 = vadd.f32 %v1994_v34, %v1989_v31 }
 0x12c   :  { %v1181_v4 = vpop.f32.mrf.mxu1  ;;  %v1275_v30 = vpop.f32.mrf.mxu0 }
 0x12d   :  { %v952_v43 = vmax.f32 %v863_v1, 0.0  ;;  %v1182_v45 = vadd.f32 %v1181_v4, %v1180_v23  ;;  %v610_v23 = vadd.f32 %v1097_v17, %v1938_v52 }
 0x12e   :  { %v1183_v36 = vpop.f32.mrf.mxu1  ;;  %v865_v47 = vpop.f32.mrf.mxu0 }
 0x12f   :  { %977 = vst.msk [vmem:[%s2169_s3 + $0x20] sm:$0xff] %vm500_vm1, %v952_v43  ;;  %v866_v7 = vadd.f32 %v865_v47, %v730_v32  ;;  %v735_v54 = vadd.f32 %v1182_v45, %v599_v49  ;;  %v615_v45 = vadd.f32 %v1100_v24, %v1938_v52  ;;  %v1103_v32 = vadd.f32 %v2001_v35, %v1996_v39 }
 0x130   :  { %v1184_v10 = vpop.f32.mrf.mxu1  ;;  %v1276_v41 = vpop.f32.mrf.mxu0 }
 0x131   :  { %v953_v48 = vmax.f32 %v866_v7, 0.0  ;;  %v1185_v51 = vadd.f32 %v1184_v10, %v1183_v36  ;;  %v618_v41 = vadd.f32 %v1103_v32, %v1938_v52 }
 0x132   :  { %v1186_v58 = vpop.f32.mrf.mxu1  ;;  %v870_v60 = vpop.f32.mrf.mxu0 }
 0x133   :  { %978 = vst.msk [vmem:[%s2169_s3 + $0x28] sm:$0xff] %vm500_vm1, %v953_v48  ;;  %v871_v13 = vadd.f32 %v870_v60, %v735_v54  ;;  %v738_v8 = vadd.f32 %v1185_v51, %v602_v53  ;;  %v1106_v48 = vadd.f32 %v2007_v57, %v2003_v50 }
 0x134   :  { %v1187_v16 = vpop.f32.mrf.mxu1  ;;  %v1279_v0 = vpop.f32.mrf.mxu0 }
 0x135   :  { %v954_v2 = vmax.f32 %v871_v13, 0.0  ;;  %v1188_v5 = vadd.f32 %v1187_v16, %v1186_v58  ;;  %v623_v13 = vadd.f32 %v1106_v48, %v1938_v52  ;;  %v1109_v16 = vadd.f32 %v2014_v6, %v2009_v63 }
 0x136   :  { %v1189_v11 = vpop.f32.mrf.mxu1  ;;  %v873_v12 = vpop.f32.mrf.mxu0 }
 0x137   :  { %979 = vst.msk [vmem:[%s2169_s3 + $0x30] sm:$0xff] %vm500_vm1, %v954_v2  ;;  %v874_v19 = vadd.f32 %v873_v12, %v738_v8  ;;  %v743_v40 = vadd.f32 %v1188_v5, %v607_v14  ;;  %v626_v14 = vadd.f32 %v1109_v16, %v1938_v52 }
 0x138   :  { %v1190_v22 = vpop.f32.mrf.mxu1  ;;  %v1280_v59 = vpop.f32.mrf.mxu0 }
 0x139   :  { %v955_v62 = vmax.f32 %v874_v19, 0.0  ;;  %v1191_v38 = vadd.f32 %v1190_v22, %v1189_v11 }
 0x13a   :  { %v1192_v18 = vpop.f32.mrf.mxu1  ;;  %v878_v20 = vpop.f32.mrf.mxu0 }
 0x13b   :  { %980 = vst.msk [vmem:[%s2169_s3 + $0x38] sm:$0xff] %vm500_vm1, %v955_v62  ;;  %v879_v25 = vadd.f32 %v878_v20, %v743_v40  ;;  %v746_v4 = vadd.f32 %v1191_v38, %v610_v23  ;;  %v631_v40 = vadd.f32 %v1923_v42, %v1938_v52 }
 0x13c   :  { %v1193_v28 = vpop.f32.mrf.mxu1  ;;  %v1283_v26 = vpop.f32.mrf.mxu0 }
 0x13d   :  { %v956_v29 = vmax.f32 %v879_v25, 0.0  ;;  %v1194_v1 = vadd.f32 %v1193_v28, %v1192_v18 }
 0x13e   :  { %v1195_v30 = vpop.f32.mrf.mxu1  ;;  %v881_v43 = vpop.f32.mrf.mxu0 }
 0x13f   :  { %981 = vst.msk [vmem:[%s2169_s3 + $0x40] sm:$0xff] %vm500_vm1, %v956_v29  ;;  %v882_v31 = vadd.f32 %v881_v43, %v746_v4  ;;  %v751_v37 = vadd.f32 %v1194_v1, %v615_v45  ;;  %v634_v1 = vadd.f32 %v1929_v46, %v1938_v52 }
 0x140   :  { %v1196_v34 = vpop.f32.mrf.mxu1  ;;  %v1284_v36 = vpop.f32.mrf.mxu0 }
 0x141   :  { %v957_v47 = vmax.f32 %v882_v31, 0.0  ;;  %v1197_v49 = vadd.f32 %v1196_v34, %v1195_v30 }
 0x142   :  { %v1198_v7 = vpop.f32.mrf.mxu1  ;;  %v886_v10 = vpop.f32.mrf.mxu0 }
 0x143   :  { %982 = vst.msk [vmem:[%s2169_s3 + $0x48] sm:$0xff] %vm500_vm1, %v957_v47  ;;  %v887_v39 = vadd.f32 %v886_v10, %v751_v37  ;;  %v754_v60 = vadd.f32 %v1197_v49, %v618_v41 }
 0x144   :  { %v1199_v35 = vpop.f32.mrf.mxu1  ;;  %v1287_v51 = vpop.f32.mrf.mxu0 }
 0x145   :  { %v958_v54 = vmax.f32 %v887_v39, 0.0  ;;  %v1200_v58 = vadd.f32 %v1199_v35, %v1198_v7 }
 0x146   :  { %v1201_v53 = vpop.f32.mrf.mxu1  ;;  %v889_v56 = vpop.f32.mrf.mxu0 }
 0x147   :  { %983 = vst.msk [vmem:[%s2169_s3 + $0x50] sm:$0xff] %vm500_vm1, %v958_v54  ;;  %v890_v50 = vadd.f32 %v889_v56, %v754_v60  ;;  %v759_v8 = vadd.f32 %v1200_v58, %v623_v13 }
 0x148   :  { %v1202_v57 = vpop.f32.mrf.mxu1  ;;  %v1288_v0 = vpop.f32.mrf.mxu0 }
 0x149   :  { %v959_v2 = vmax.f32 %v890_v50, 0.0  ;;  %v1203_v5 = vadd.f32 %v1202_v57, %v1201_v53 }
 0x14a   :  { %v1204_v11 = vpop.f32.mrf.mxu1  ;;  %v894_v12 = vpop.f32.mrf.mxu0 }
 0x14b   :  { %984 = vst.msk [vmem:[%s2169_s3 + $0x58] sm:$0xff] %vm500_vm1, %v959_v2  ;;  %v895_v63 = vadd.f32 %v894_v12, %v759_v8  ;;  %v762_v59 = vadd.f32 %v1203_v5, %v626_v14 }
 0x14c   :  { %v1205_v6 = vpop.f32.mrf.mxu1  ;;  %v1291_v17 = vpop.f32.mrf.mxu0 }
 0x14d   :  { %v960_v19 = vmax.f32 %v895_v63, 0.0  ;;  %v1206_v22 = vadd.f32 %v1205_v6, %v1204_v11 }
 0x14e   :  { %v1207_v62 = vpop.f32.mrf.mxu1  ;;  %v897_v38 = vpop.f32.mrf.mxu0 }
 0x14f   :  { %985 = vst.msk [vmem:[%s2169_s3 + $0x60] sm:$0xff] %vm500_vm1, %v960_v19  ;;  %v898_v18 = vadd.f32 %v897_v38, %v762_v59  ;;  %v767_v28 = vadd.f32 %v1206_v22, %v631_v40 }
 0x150   :  { %v1208_v20 = vpop.f32.mrf.mxu1  ;;  %v1292_v23 = vpop.f32.mrf.mxu0 }
 0x151   :  { %v961_v24 = vmax.f32 %v898_v18, 0.0  ;;  %v1209_v25 = vadd.f32 %v1208_v20, %v1207_v62 }
 0x152   :  { %v1210_v26 = vpop.f32.mrf.mxu1  ;;  %v902_v29 = vpop.f32.mrf.mxu0 }
 0x153   :  { %986 = vst.msk [vmem:[%s2169_s3 + $0x68] sm:$0xff] %vm500_vm1, %v961_v24  ;;  %v903_v42 = vadd.f32 %v902_v29, %v767_v28  ;;  %v770_v32 = vadd.f32 %v1209_v25, %v634_v1 }
 0x154   :  { %v1211_v4 = vpop.f32.mrf.mxu1  ;;  %v1295_v30 = vpop.f32.mrf.mxu0 }
 0x155   :  { %v962_v43 = vmax.f32 %v903_v42, 0.0  ;;  %v1212_v45 = vadd.f32 %v1211_v4, %v1210_v26 }
 0x156   :  { %v1213_v31 = vpop.f32.mrf.mxu1  ;;  %v905_v34 = vpop.f32.mrf.mxu0 }
 0x157   :  { %987 = vst.msk [vmem:[%s2169_s3 + $0x70] sm:$0xff] %vm500_vm1, %v962_v43  ;;  %v906_v36 = vadd.f32 %v905_v34, %v770_v32  ;;  %v775_v37 = vadd.f32 %v1212_v45, %v1943_v55 }
 0x158   :  { %v1214_v46 = vpop.f32.mrf.mxu1  ;;  %v1296_v52 = vpop.f32.mrf.mxu0 }
 0x159   :  { %v963_v47 = vmax.f32 %v906_v36, 0.0  ;;  %v1215_v49 = vadd.f32 %v1214_v46, %v1213_v31 }
 0x15a   :  { %v1216_v7 = vpop.f32.mrf.mxu1  ;;  %v910_v10 = vpop.f32.mrf.mxu0 }
 0x15b   :  { %988 = vst.msk [vmem:[%s2169_s3 + $0x78] sm:$0xff] %vm500_vm1, %v963_v47  ;;  %v911_v41 = vadd.f32 %v910_v10, %v775_v37  ;;  %v778_v54 = vadd.f32 %v1215_v49, %v1950_v61 }
 0x15c   :  { %v1217_v48 = vpop.f32.mrf.mxu1  ;;  %v1299_v39 = vpop.f32.mrf.mxu0 }
 0x15d   :  { %v964_v35 = vmax.f32 %v911_v41, 0.0  ;;  %v1218_v51 = vadd.f32 %v1217_v48, %v1216_v7 }
 0x15e   :  { %v1219_v58 = vpop.f32.mrf.mxu1  ;;  %v913_v60 = vpop.f32.mrf.mxu0 }
 0x15f   :  { %989 = vst.msk [vmem:[%s2169_s3 + $0x80] sm:$0xff] %vm500_vm1, %v964_v35  ;;  %v914_v55 = vadd.f32 %v913_v60, %v778_v54  ;;  %v783_v50 = vadd.f32 %v1218_v51, %v1957_v3 }
 0x160   :  { %v1220_v53 = vpop.f32.mrf.mxu1  ;;  %v1300_v56 = vpop.f32.mrf.mxu0 }
 0x161   :  { %v965_v13 = vmax.f32 %v914_v55, 0.0  ;;  %v1221_v16 = vadd.f32 %v1220_v53, %v1219_v58 }
 0x162   :  { %v1222_v57 = vpop.f32.mrf.mxu1  ;;  %v918_v0 = vpop.f32.mrf.mxu0 }
 0x163   :  { %990 = vst.msk [vmem:[%s2169_s3 + $0x88] sm:$0xff] %vm500_vm1, %v965_v13  ;;  %v919_v61 = vadd.f32 %v918_v0, %v783_v50  ;;  %v786_v12 = vadd.f32 %v1221_v16, %v1964_v9 }
 0x164   :  { %v1223_v2 = vpop.f32.mrf.mxu1  ;;  %v1303_v5 = vpop.f32.mrf.mxu0 }
 0x165   :  { %v966_v8 = vmax.f32 %v919_v61, 0.0  ;;  %v1224_v11 = vadd.f32 %v1223_v2, %v1222_v57 }
 0x166   :  { %v1225_v14 = vpop.f32.mrf.mxu1  ;;  %v921_v63 = vpop.f32.mrf.mxu0 }
 0x167   :  { %991 = vst.msk [vmem:[%s2169_s3 + $0x90] sm:$0xff] %vm500_vm1, %v966_v8  ;;  %v922_v3 = vadd.f32 %v921_v63, %v786_v12  ;;  %v791_v59 = vadd.f32 %v1224_v11, %v1971_v15 }
 0x168   :  { %v1226_v6 = vpop.f32.mrf.mxu1  ;;  %v1304_v17 = vpop.f32.mrf.mxu0 }
 0x169   :  { %v967_v19 = vmax.f32 %v922_v3, 0.0  ;;  %v1227_v22 = vadd.f32 %v1226_v6, %v1225_v14 }
 0x16a   :  { %v1228_v62 = vpop.f32.mrf.mxu1  ;;  %v926_v38 = vpop.f32.mrf.mxu0 }
 0x16b   :  { %992 = vst.msk [vmem:[%s2169_s3 + $0x98] sm:$0xff] %vm500_vm1, %v967_v19  ;;  %v927_v9 = vadd.f32 %v926_v38, %v791_v59  ;;  %v794_v24 = vadd.f32 %v1227_v22, %v1978_v21 }
 0x16c   :  { %v1229_v40 = vpop.f32.mrf.mxu1  ;;  %v1307_v18 = vpop.f32.mrf.mxu0 }
 0x16d   :  { %v968_v20 = vmax.f32 %v927_v9, 0.0  ;;  %v1230_v23 = vadd.f32 %v1229_v40, %v1228_v62 }
 0x16e   :  { %v1231_v25 = vpop.f32.mrf.mxu1  ;;  %v929_v28 = vpop.f32.mrf.mxu0 }
 0x16f   :  { %993 = vst.msk [vmem:[%s2169_s3 + $0xa0] sm:$0xff] %vm500_vm1, %v968_v20  ;;  %v930_v15 = vadd.f32 %v929_v28, %v794_v24  ;;  %v799_v4 = vadd.f32 %v1230_v23, %v1985_v27 }
 0x170   :  { %v1232_v26 = vpop.f32.mrf.mxu1  ;;  %v1308_v29 = vpop.f32.mrf.mxu0 }
 0x171   :  { %v969_v1 = vmax.f32 %v930_v15, 0.0  ;;  %v1233_v42 = vadd.f32 %v1232_v26, %v1231_v25 }
 0x172   :  { %v1234_v30 = vpop.f32.mrf.mxu1  ;;  %v934_v43 = vpop.f32.mrf.mxu0 }
 0x173   :  { %994 = vst.msk [vmem:[%s2169_s3 + $0xa8] sm:$0xff] %vm500_vm1, %v969_v1  ;;  %v935_v21 = vadd.f32 %v934_v43, %v799_v4  ;;  %v802_v36 = vadd.f32 %v1233_v42, %v1992_v33 }
 0x174   :  { %v1235_v45 = vpop.f32.mrf.mxu1  ;;  %v1311_v32 = vpop.f32.mrf.mxu0 }
 0x175   :  { %v970_v31 = vmax.f32 %v935_v21, 0.0  ;;  %v1236_v34 = vadd.f32 %v1235_v45, %v1234_v30 }
 0x176   :  { %v1237_v46 = vpop.f32.mrf.mxu1  ;;  %v937_v52 = vpop.f32.mrf.mxu0 }
 0x177   :  { %995 = vst.msk [vmem:[%s2169_s3 + $0xb0] sm:$0xff] %vm500_vm1, %v970_v31  ;;  %v938_v27 = vadd.f32 %v937_v52, %v802_v36  ;;  %v807_v7 = vadd.f32 %v1236_v34, %v1999_v44 }
 0x178   :  { %v1238_v47 = vpop.f32.mrf.mxu1  ;;  %v1312_v49 = vpop.f32.mrf.mxu0 }
 0x179   :  { %v971_v37 = vmax.f32 %v938_v27, 0.0 }
 0x17a   :  { %v942_v10 = vpop.f32.mrf.mxu0 }
 0x17b   :  { %996 = vst.msk [vmem:[%s2169_s3 + $0xb8] sm:$0xff] %vm500_vm1, %v971_v37  ;;  %v943_v33 = vadd.f32 %v942_v10, %v807_v7 }
 0x17c   :  { %v1315_v41 = vpop.f32.mrf.mxu0 }
 0x17d   :  { %v972_v48 = vmax.f32 %v943_v33, 0.0 }
 0x17e   :  { %v945_v39 = vpop.f32.mrf.mxu0 }
 0x17f   :  { %997 = vst.msk [vmem:[%s2169_s3 + $0xc0] sm:$0xff] %vm500_vm1, %v972_v48 }
 0x180   :  { %v1316_v35 = vpop.f32.mrf.mxu0 }

// kernel: dpin_forward.7
= control target key start
LH: loop header
LB: loop body
LE: loop exit
PB: predicated region body
PF: predicated region fallthrough
CT: control target
= control target key end

     0   :  { %10 = vsyncpa [#allocation4], 0  ;;  %s4151_s18 = smov 0   ;;  %s4698_s0 = inlined_call_operand.vmem [shape: f32[2,6400], index: 0, kind: input, shape index: {}]   ;;  %s4699_s1 = inlined_call_operand.vmem [shape: bf16[6400,512], index: 1, kind: input, shape index: {}]   ;;  %s4700_s2 = inlined_call_operand.vmem [shape: f32[1,512], index: 2, kind: input, shape index: {}]   ;;  %s4701_s3 = inlined_call_operand.vmem [shape: bf16[512,18], index: 3, kind: input, shape index: {}]   ;;  %s4702_s4 = inlined_call_operand.vmem [shape: f32[1,18], index: 4, kind: input, shape index: {}]   ;;  %s4703_s5 = inlined_call_operand.hbm [shape: f32[2,18], index: 5, kind: output, shape index: {}]  }
   0x1 LB: > { %s4157_s19 = sadd.s32 4294967295, %s4116_s18   ;;  %p3142_p0 = scmp.ge.s32.totalorder %s4116_s18, 1  ;;  %s4116_s18 = sphi %s4151_s18, %s16_s18  }
   0x2   : > { %p196_p1 = scmp.lt.s32.totalorder %s4116_s18, 6 }
   0x4   : > { %p197_p2 = pnand %p3142_p0, %p196_p1 }
   0x5   : > { %s225_s20 = smul.u32 (!%p197_p2), 10, %s4157_s19  ;;  %p3146_p5 = scmp.ne.s32.totalorder (!%p197_p2), %s4157_s19, 0 }
   0x6   : > { %200 = sbr.rel (%p197_p2) target bundleno = 801 (0x321), region = 40 }
   0x7   : > { %s231_s21 = smul.u32 (!%p197_p2), 160, %s4157_s19  ;;  %p226_p3 = scmp.lt.s32.totalorder (!%p197_p2), %s225_s20, 49 }
   0x9   : > { %p232_p4 = scmp.lt.s32.totalorder (!%p197_p2), %s231_s21, 799 }
   0xb   : > { %s4705_s20 = smov (!%p226_p3, %s225_s20), 49  ;;  %s4707_s21 = smov (!%p232_p4, %s231_s21), 799 }
   0xc   : > { %s3143_s22 = sshll.u32 %s4705_s20, 1  ;;  %s3506_s26 = sshll.u32 %s4707_s21, 4 }
   0xd   : > { %s4166_s25 = scalar_lea.vmem %s4698_s0, %s3143_s22  ;;  %s4171_s29 = scalar_lea.vmem %s4699_s1, %s3506_s26 }
   0xe   : > { %242 = sbr.rel (%p3146_p5) target bundleno = 21 (0x15), region = 44 }
  0x13   : > { %v4118_v0 = vmov 0.0  }
  0x14   : > { %243 = vst [vmem:[#allocation2] sm:$0xff] %v4118_v0 }
  0x15 PF: > { %v3568_v1 = vld [vmem:[%s4171_s29 + $0xe4] ss:$16 sps:$4 sm:$0xff]   ;;  %v3572_v3 = vld [vmem:[%s4171_s29 + $0xe0] ss:$16 sps:$4 sm:$0xff]   ;;  %v4119_v37 = vmov 1983009808   ;;  %v255_v39 = vlaneseq }
  0x16   : > { %v3570_v2 = vld [vmem:[%s4171_s29 + $0x2e4] ss:$16 sps:$4 sm:$0xff]   ;;  %2233 = vmatprep.subr.bf16.mxu0 %v3568_v1  ;;  %v3573_v4 = vld [vmem:[%s4171_s29 + $0x2e0] ss:$16 sps:$4 sm:$0xff]   ;;  %v253_v38 = vunpack.c.l.s4 %v4119_v37  ;;  %p3468_p6 = scmp.ne.s32.totalorder %s4157_s19, 4 }
  0x17   : > { %2274 = vmatprep.subr.bf16.mxu1 %v3570_v2  ;;  %v3574_v5 = vld [vmem:[%s4171_s29 + $0xc4] ss:$16 sps:$4 sm:$0xff]   ;;  %2234 = vmatpush1.bf16.msra.mxu0 %v3572_v3  ;;  %v3578_v7 = vld [vmem:[%s4171_s29 + $0xc0] ss:$16 sps:$4 sm:$0xff]   ;;  %v4213_v44 = vshrl.u32 %v255_v39, 7 }
  0x18   : > { %2275 = vmatpush1.bf16.msra.mxu1 %v3573_v4  ;;  %v3576_v6 = vld [vmem:[%s4171_s29 + $0x2c4] ss:$16 sps:$4 sm:$0xff]   ;;  %2235 = vmatprep.subr.bf16.mxu0 %v3574_v5  ;;  %v3579_v8 = vld [vmem:[%s4171_s29 + $0x2c0] ss:$16 sps:$4 sm:$0xff]   ;;  %v254_v43 = vunpack.c.0.s8 %v253_v38 }
  0x19   : > { %2276 = vmatprep.subr.bf16.mxu1 %v3576_v6  ;;  %v3580_v9 = vld [vmem:[%s4171_s29 + $0xa4] ss:$16 sps:$4 sm:$0xff]   ;;  %v3584_v11 = vld [vmem:[%s4171_s29 + $0xa0] ss:$16 sps:$4 sm:$0xff]  }
  0x1a   : > { %v3582_v10 = vld [vmem:[%s4171_s29 + $0x2a4] ss:$16 sps:$4 sm:$0xff]   ;;  %v3585_v12 = vld [vmem:[%s4171_s29 + $0x2a0] ss:$16 sps:$4 sm:$0xff]   ;;  %v4221_v50 = vsub.s32 %v254_v43, %v4213_v44  ;;  %v246_v43 = vld [vmem:[%s4166_s25 + $0x8] sm:$0xff] }
  0x1b   : > { %2236 = vmatpush1.bf16.msra.mxu0 %v3578_v7  ;;  %v3586_v13 = vld [vmem:[%s4171_s29 + $0x84] ss:$16 sps:$4 sm:$0xff]   ;;  %v3590_v15 = vld [vmem:[%s4171_s29 + $0x80] ss:$16 sps:$4 sm:$0xff]  }
  0x1c   : > { %2277 = vmatpush1.bf16.msra.mxu1 %v3579_v8  ;;  %2237 = vmatprep.subr.bf16.mxu0 %v3580_v9  ;;  %v3588_v14 = vld [vmem:[%s4171_s29 + $0x284] ss:$16 sps:$4 sm:$0xff]   ;;  %v3591_v16 = vld [vmem:[%s4171_s29 + $0x280] ss:$16 sps:$4 sm:$0xff]  }
  0x1d   : > { %2278 = vmatprep.subr.bf16.mxu1 %v3582_v10  ;;  %v3592_v17 = vld [vmem:[%s4171_s29 + $0x64] ss:$16 sps:$4 sm:$0xff]   ;;  %v3596_v19 = vld [vmem:[%s4171_s29 + $0x60] ss:$16 sps:$4 sm:$0xff]  }
  0x1e   : > { %v3594_v18 = vld [vmem:[%s4171_s29 + $0x264] ss:$16 sps:$4 sm:$0xff]   ;;  %v3597_v20 = vld [vmem:[%s4171_s29 + $0x260] ss:$16 sps:$4 sm:$0xff]  }
  0x1f   : > { %2238 = vmatpush1.bf16.msra.mxu0 %v3584_v11  ;;  %v3598_v21 = vld [vmem:[%s4171_s29 + $0x44] ss:$16 sps:$4 sm:$0xff]   ;;  %v3602_v23 = vld [vmem:[%s4171_s29 + $0x40] ss:$16 sps:$4 sm:$0xff]  }
  0x20   : > { %2279 = vmatpush1.bf16.msra.mxu1 %v3585_v12  ;;  %2239 = vmatprep.subr.bf16.mxu0 %v3586_v13  ;;  %v3600_v22 = vld [vmem:[%s4171_s29 + $0x244] ss:$16 sps:$4 sm:$0xff]   ;;  %v3603_v24 = vld [vmem:[%s4171_s29 + $0x240] ss:$16 sps:$4 sm:$0xff]  }
  0x21   : > { %2280 = vmatprep.subr.bf16.mxu1 %v3588_v14  ;;  %v3604_v25 = vld [vmem:[%s4171_s29 + $0x24] ss:$16 sps:$4 sm:$0xff]   ;;  %v3608_v27 = vld [vmem:[%s4171_s29 + $0x20] ss:$16 sps:$4 sm:$0xff]  }
  0x22   : > { %v3606_v26 = vld [vmem:[%s4171_s29 + $0x224] ss:$16 sps:$4 sm:$0xff]   ;;  %v3609_v28 = vld [vmem:[%s4171_s29 + $0x220] ss:$16 sps:$4 sm:$0xff]  }
  0x23   : > { %2240 = vmatpush1.bf16.msra.mxu0 %v3590_v15  ;;  %v3610_v29 = vld [vmem:[%s4171_s29 + $0x4] ss:$16 sps:$4 sm:$0xff]   ;;  %v3614_v31 = vld [vmem:[%s4171_s29] ss:$16 sps:$4 sm:$0xff]  }
  0x24   : > { %2281 = vmatpush1.bf16.msra.mxu1 %v3591_v16  ;;  %2241 = vmatprep.subr.bf16.mxu0 %v3592_v17  ;;  %v3612_v30 = vld [vmem:[%s4171_s29 + $0x204] ss:$16 sps:$4 sm:$0xff]   ;;  %v3615_v32 = vld [vmem:[%s4171_s29 + $0x200] ss:$16 sps:$4 sm:$0xff]  }
  0x25   : > { %2282 = vmatprep.subr.bf16.mxu1 %v3594_v18  ;;  %v3616_v33 = vld [vmem:[%s4171_s29 + $0x1e4] ss:$16 sps:$4 sm:$0xff]   ;;  %v3620_v35 = vld [vmem:[%s4171_s29 + $0x1e0] ss:$16 sps:$4 sm:$0xff]  }
  0x26   : > { %v3618_v34 = vld [vmem:[%s4171_s29 + $0x3e4] ss:$16 sps:$4 sm:$0xff]   ;;  %v3621_v36 = vld [vmem:[%s4171_s29 + $0x3e0] ss:$16 sps:$4 sm:$0xff]  }
  0x27   : > { %2242 = vmatpush1.bf16.msra.mxu0 %v3596_v19  ;;  %v3622_v40 = vld [vmem:[%s4171_s29 + $0x1c4] ss:$16 sps:$4 sm:$0xff]   ;;  %v3626_v42 = vld [vmem:[%s4171_s29 + $0x1c0] ss:$16 sps:$4 sm:$0xff]  }
  0x28   : > { %2283 = vmatpush1.bf16.msra.mxu1 %v3597_v20  ;;  %2243 = vmatprep.subr.bf16.mxu0 %v3598_v21  ;;  %v3624_v41 = vld [vmem:[%s4171_s29 + $0x3c4] ss:$16 sps:$4 sm:$0xff]   ;;  %v3627_v45 = vld [vmem:[%s4171_s29 + $0x3c0] ss:$16 sps:$4 sm:$0xff]  }
  0x29   : > { %2284 = vmatprep.subr.bf16.mxu1 %v3600_v22  ;;  %v3628_v46 = vld [vmem:[%s4171_s29 + $0x1a4] ss:$16 sps:$4 sm:$0xff]   ;;  %v3632_v48 = vld [vmem:[%s4171_s29 + $0x1a0] ss:$16 sps:$4 sm:$0xff]  }
  0x2a   : > { %v3630_v47 = vld [vmem:[%s4171_s29 + $0x3a4] ss:$16 sps:$4 sm:$0xff]   ;;  %v3633_v49 = vld [vmem:[%s4171_s29 + $0x3a0] ss:$16 sps:$4 sm:$0xff]  }
  0x2b   : > { %2244 = vmatpush1.bf16.msra.mxu0 %v3602_v23  ;;  %v3634_v51 = vld [vmem:[%s4171_s29 + $0x184] ss:$16 sps:$4 sm:$0xff]   ;;  %v3638_v54 = vld [vmem:[%s4171_s29 + $0x180] ss:$16 sps:$4 sm:$0xff]  }
  0x2c   : > { %2285 = vmatpush1.bf16.msra.mxu1 %v3603_v24  ;;  %2245 = vmatprep.subr.bf16.mxu0 %v3604_v25  ;;  %v3636_v52 = vld [vmem:[%s4171_s29 + $0x384] ss:$16 sps:$4 sm:$0xff]   ;;  %v3639_v57 = vld [vmem:[%s4171_s29 + $0x380] ss:$16 sps:$4 sm:$0xff]  }
  0x2d   : > { %2286 = vmatprep.subr.bf16.mxu1 %v3606_v26  ;;  %v245_v53 = vld [vmem:[%s4166_s25] sm:$0xff] }
  0x2e   : > { %v258_v55 = vrot.slane %v245_v53, %v4221_v50  ;;  %v251_v56 = vcombine.high %v245_v53, %v245_v53  ;;  %v3640_v58 = vld [vmem:[%s4171_s29 + $0x164] ss:$16 sps:$4 sm:$0xff]   ;;  %v3644_v62 = vld [vmem:[%s4171_s29 + $0x160] ss:$16 sps:$4 sm:$0xff]  }
  0x2f   : > { %2246 = vmatpush1.bf16.msra.mxu0 %v3608_v27  ;;  %v3642_v59 = vld [vmem:[%s4171_s29 + $0x364] ss:$16 sps:$4 sm:$0xff]   ;;  %v3645_v1 = vld [vmem:[%s4171_s29 + $0x360] ss:$16 sps:$4 sm:$0xff]  }
  0x30   : > { %2287 = vmatpush1.bf16.msra.mxu1 %v3609_v28  ;;  %2247 = vmatprep.subr.bf16.mxu0 %v3610_v29  ;;  %v266_v60 = vcombine.high %v258_v55, %v258_v55  ;;  %v265_v61 = vrot.slane %v251_v56, %v4221_v50  ;;  %v3646_v2 = vld [vmem:[%s4171_s29 + $0x144] ss:$16 sps:$4 sm:$0xff]   ;;  %v3650_v5 = vld [vmem:[%s4171_s29 + $0x140] ss:$16 sps:$4 sm:$0xff]   ;;  %v4254_v17 = vpack.c.bf16 %v258_v55, %v258_v55 }
  0x31   : > { %2288 = vmatprep.subr.bf16.mxu1 %v3612_v30  ;;  %v3648_v3 = vld [vmem:[%s4171_s29 + $0x344] ss:$16 sps:$4 sm:$0xff]   ;;  %v3651_v6 = vld [vmem:[%s4171_s29 + $0x340] ss:$16 sps:$4 sm:$0xff]  }
  0x32   : > { %v4233_v63 = vpack.c.bf16 %v266_v60, %v266_v60  ;;  %v267_v0 = vcombine.high %v265_v61, %v265_v61  ;;  %v3652_v7 = vld [vmem:[%s4171_s29 + $0x124] ss:$16 sps:$4 sm:$0xff]   ;;  %v3656_v9 = vld [vmem:[%s4171_s29 + $0x120] ss:$16 sps:$4 sm:$0xff]   ;;  %v4256_v18 = vpack.c.bf16 %v265_v61, %v265_v61 }
  0x33   : > { %2248 = vmatpush1.bf16.msra.mxu0 %v3614_v31  ;;  %v3654_v8 = vld [vmem:[%s4171_s29 + $0x324] ss:$16 sps:$4 sm:$0xff]   ;;  %v3657_v10 = vld [vmem:[%s4171_s29 + $0x320] ss:$16 sps:$4 sm:$0xff]  }
  0x34   : > { %2289 = vmatpush1.bf16.msra.mxu1 %v3615_v32  ;;  %2249 = vmatprep.subr.bf16.mxu0 %v3616_v33  ;;  %v4238_v4 = vpack.c.bf16 %v267_v0, %v267_v0  ;;  %v3658_v11 = vld [vmem:[%s4171_s29 + $0x104] ss:$16 sps:$4 sm:$0xff]   ;;  %v3662_v13 = vld [vmem:[%s4171_s29 + $0x100] ss:$16 sps:$4 sm:$0xff]  }
  0x35   : > { %2290 = vmatprep.subr.bf16.mxu1 %v3618_v34  ;;  %2265 = vmatprep.mubr.bf16.mxu0 %v4233_v63  ;;  %v3660_v12 = vld [vmem:[%s4171_s29 + $0x304] ss:$16 sps:$4 sm:$0xff]   ;;  %v3663_v14 = vld [vmem:[%s4171_s29 + $0x300] ss:$16 sps:$4 sm:$0xff]  }
  0x36   : > { %2306 = vmatprep.mubr.bf16.mxu1 %v4238_v4  ;;  %v3667_v15 = vld [vmem:[%s4171_s29 + $0x4e4] ss:$16 sps:$4 sm:$0xff]   ;;  %v3665_v19 = vld [vmem:[%s4171_s29 + $0x4e0] ss:$16 sps:$4 sm:$0xff]  }
  0x37   : > { %2250 = vmatpush2.bf16.msra.mxu0 %v3620_v35  ;;  %v3670_v16 = vld [vmem:[%s4171_s29 + $0x6e4] ss:$16 sps:$4 sm:$0xff]   ;;  %v3668_v20 = vld [vmem:[%s4171_s29 + $0x6e0] ss:$16 sps:$4 sm:$0xff]  }
  0x38   : > { %2291 = vmatpush2.bf16.msra.mxu1 %v3621_v36  ;;  %2251 = vmatprep.subr.bf16.mxu0 %v3622_v40  ;;  %v3673_v21 = vld [vmem:[%s4171_s29 + $0x4c4] ss:$16 sps:$4 sm:$0xff]   ;;  %v3671_v23 = vld [vmem:[%s4171_s29 + $0x4c0] ss:$16 sps:$4 sm:$0xff]  }
  0x39   : > { %2292 = vmatprep.subr.bf16.mxu1 %v3624_v41  ;;  %v3676_v22 = vld [vmem:[%s4171_s29 + $0x6c4] ss:$16 sps:$4 sm:$0xff]   ;;  %v3674_v24 = vld [vmem:[%s4171_s29 + $0x6c0] ss:$16 sps:$4 sm:$0xff]  }
  0x3a   : > { %v3679_v25 = vld [vmem:[%s4171_s29 + $0x4a4] ss:$16 sps:$4 sm:$0xff]   ;;  %v3677_v27 = vld [vmem:[%s4171_s29 + $0x4a0] ss:$16 sps:$4 sm:$0xff]  }
  0x3b   : > { %2252 = vmatpush2.bf16.msra.mxu0 %v3626_v42  ;;  %v3682_v26 = vld [vmem:[%s4171_s29 + $0x6a4] ss:$16 sps:$4 sm:$0xff]   ;;  %v3680_v28 = vld [vmem:[%s4171_s29 + $0x6a0] ss:$16 sps:$4 sm:$0xff]  }
  0x3c   : > { %2293 = vmatpush2.bf16.msra.mxu1 %v3627_v45  ;;  %2253 = vmatprep.subr.bf16.mxu0 %v3628_v46  ;;  %v3685_v29 = vld [vmem:[%s4171_s29 + $0x484] ss:$16 sps:$4 sm:$0xff]   ;;  %v3683_v31 = vld [vmem:[%s4171_s29 + $0x480] ss:$16 sps:$4 sm:$0xff]   ;;  %v4286_v45 = vrot.slane %v246_v43, %v4221_v50  ;;  %v268_v46 = vcombine.high %v246_v43, %v246_v43 }
  0x3d   : > { %2294 = vmatprep.subr.bf16.mxu1 %v3630_v47  ;;  %v3688_v30 = vld [vmem:[%s4171_s29 + $0x684] ss:$16 sps:$4 sm:$0xff]   ;;  %v3686_v32 = vld [vmem:[%s4171_s29 + $0x680] ss:$16 sps:$4 sm:$0xff]  }
  0x3e   : > { %v3691_v33 = vld [vmem:[%s4171_s29 + $0x464] ss:$16 sps:$4 sm:$0xff]   ;;  %v3689_v35 = vld [vmem:[%s4171_s29 + $0x460] ss:$16 sps:$4 sm:$0xff]  }
  0x3f   : > { %2254 = vmatpush2.bf16.msra.mxu0 %v3632_v48  ;;  %v3694_v34 = vld [vmem:[%s4171_s29 + $0x664] ss:$16 sps:$4 sm:$0xff]   ;;  %v3692_v36 = vld [vmem:[%s4171_s29 + $0x660] ss:$16 sps:$4 sm:$0xff]  }
  0x40   : > { %2295 = vmatpush2.bf16.msra.mxu1 %v3633_v49  ;;  %2255 = vmatprep.subr.bf16.mxu0 %v3634_v51  ;;  %v3697_v37 = vld [vmem:[%s4171_s29 + $0x444] ss:$16 sps:$4 sm:$0xff]   ;;  %v3695_v39 = vld [vmem:[%s4171_s29 + $0x440] ss:$16 sps:$4 sm:$0xff]   ;;  %v283_v49 = vcombine.high %v4286_v45, %v4286_v45  ;;  %v4293_v51 = vrot.slane %v268_v46, %v4221_v50  ;;  %v3779_v46 = vld [vmem:[%s4171_s29 + $0xac] ss:$16 sps:$4 sm:$0xff]  }
  0x41   : > { %2296 = vmatprep.subr.bf16.mxu1 %v3636_v52  ;;  %v3700_v38 = vld [vmem:[%s4171_s29 + $0x644] ss:$16 sps:$4 sm:$0xff]   ;;  %v3698_v40 = vld [vmem:[%s4171_s29 + $0x640] ss:$16 sps:$4 sm:$0xff]  }
  0x42   : > { %v3703_v41 = vld [vmem:[%s4171_s29 + $0x424] ss:$16 sps:$4 sm:$0xff]   ;;  %v3701_v47 = vld [vmem:[%s4171_s29 + $0x420] ss:$16 sps:$4 sm:$0xff]   ;;  %v284_v55 = vcombine.high %v4293_v51, %v4293_v51 }
  0x43   : > { %2256 = vmatpush2.bf16.msra.mxu0 %v3638_v54  ;;  %v3706_v42 = vld [vmem:[%s4171_s29 + $0x624] ss:$16 sps:$4 sm:$0xff]   ;;  %v3704_v48 = vld [vmem:[%s4171_s29 + $0x620] ss:$16 sps:$4 sm:$0xff]   ;;  %v4297_v54 = vpack.c.bf16 %v283_v49, %v283_v49 }
  0x44   : > { %2297 = vmatpush2.bf16.msra.mxu1 %v3639_v57  ;;  %2257 = vmatprep.subr.bf16.mxu0 %v3640_v58  ;;  %v3709_v52 = vld [vmem:[%s4171_s29 + $0x404] ss:$16 sps:$4 sm:$0xff]   ;;  %v3707_v56 = vld [vmem:[%s4171_s29 + $0x400] ss:$16 sps:$4 sm:$0xff]   ;;  %v4303_v58 = vpack.c.bf16 %v284_v55, %v284_v55  ;;  %v3791_v55 = vld [vmem:[%s4171_s29 + $0x6c] ss:$16 sps:$4 sm:$0xff]  }
  0x45   : > { %2298 = vmatprep.subr.bf16.mxu1 %v3642_v59  ;;  %v3712_v53 = vld [vmem:[%s4171_s29 + $0x604] ss:$16 sps:$4 sm:$0xff]   ;;  %v3710_v57 = vld [vmem:[%s4171_s29 + $0x600] ss:$16 sps:$4 sm:$0xff]  }
  0x46   : > { %v3715_v59 = vld [vmem:[%s4171_s29 + $0x5e4] ss:$16 sps:$4 sm:$0xff]   ;;  %v3713_v61 = vld [vmem:[%s4171_s29 + $0x5e0] ss:$16 sps:$4 sm:$0xff]  }
  0x47   : > { %2258 = vmatpush2.bf16.msra.mxu0 %v3644_v62  ;;  %v3718_v60 = vld [vmem:[%s4171_s29 + $0x7e4] ss:$16 sps:$4 sm:$0xff]   ;;  %v3716_v62 = vld [vmem:[%s4171_s29 + $0x7e0] ss:$16 sps:$4 sm:$0xff]  }
  0x48   : > { %2299 = vmatpush2.bf16.msra.mxu1 %v3645_v1  ;;  %2259 = vmatprep.subr.bf16.mxu0 %v3646_v2  ;;  %v3721_v0 = vld [vmem:[%s4171_s29 + $0x5c4] ss:$16 sps:$4 sm:$0xff]   ;;  %v3719_v2 = vld [vmem:[%s4171_s29 + $0x5c0] ss:$16 sps:$4 sm:$0xff]  }
  0x49   : > { %2300 = vmatprep.subr.bf16.mxu1 %v3648_v3  ;;  %v3724_v1 = vld [vmem:[%s4171_s29 + $0x7c4] ss:$16 sps:$4 sm:$0xff]   ;;  %v3722_v3 = vld [vmem:[%s4171_s29 + $0x7c0] ss:$16 sps:$4 sm:$0xff]  }
  0x4a   : > { %v3776_v43 = vld [vmem:[%s4171_s29 + $0x8a4] ss:$16 sps:$4 sm:$0xff]  }
  0x4b   : > { %2260 = vmatpush2.bf16.msra.mxu0 %v3650_v5  ;;  %v3727_v5 = vld [vmem:[%s4171_s29 + $0x5a4] ss:$16 sps:$4 sm:$0xff]  }
  0x4c   : > { %2301 = vmatpush2.bf16.msra.mxu1 %v3651_v6  ;;  %2261 = vmatprep.subr.bf16.mxu0 %v3652_v7  ;;  %v3730_v6 = vld [vmem:[%s4171_s29 + $0x7a4] ss:$16 sps:$4 sm:$0xff]   ;;  %v3725_v7 = vld [vmem:[%s4171_s29 + $0x5a0] ss:$16 sps:$4 sm:$0xff]  }
  0x4d   : > { %2302 = vmatprep.subr.bf16.mxu1 %v3654_v8  ;;  %v3728_v8 = vld [vmem:[%s4171_s29 + $0x7a0] ss:$16 sps:$4 sm:$0xff]   ;;  %v3782_v49 = vld [vmem:[%s4171_s29 + $0x884] ss:$16 sps:$4 sm:$0xff]  }
  0x4f   : > { %2262 = vmatpush2.bf16.msra.mxu0 %v3656_v9  ;;  %v3733_v9 = vld [vmem:[%s4171_s29 + $0x584] ss:$16 sps:$4 sm:$0xff]  }
  0x50   : > { %2303 = vmatpush2.bf16.msra.mxu1 %v3657_v10  ;;  %2263 = vmatprep.subr.bf16.mxu0 %v3658_v11  ;;  %v3736_v10 = vld [vmem:[%s4171_s29 + $0x784] ss:$16 sps:$4 sm:$0xff]   ;;  %v3731_v11 = vld [vmem:[%s4171_s29 + $0x580] ss:$16 sps:$4 sm:$0xff]  }
  0x51   : > { %2304 = vmatprep.subr.bf16.mxu1 %v3660_v12  ;;  %v3734_v12 = vld [vmem:[%s4171_s29 + $0x780] ss:$16 sps:$4 sm:$0xff]  }
  0x53   : > { %2264 = vmatpush2.bf16.msra.mxu0 %v3662_v13  ;;  %v3739_v13 = vld [vmem:[%s4171_s29 + $0x564] ss:$16 sps:$4 sm:$0xff]  }
  0x54   : > { %2305 = vmatpush2.bf16.msra.mxu1 %v3663_v14  ;;  %2315 = vmatprep.subr.bf16.mxu0 %v3667_v15  ;;  %v3742_v14 = vld [vmem:[%s4171_s29 + $0x764] ss:$16 sps:$4 sm:$0xff]   ;;  %v3737_v15 = vld [vmem:[%s4171_s29 + $0x560] ss:$16 sps:$4 sm:$0xff]  }
  0x55   : > { %2356 = vmatprep.subr.bf16.mxu1 %v3670_v16  ;;  %v3740_v16 = vld [vmem:[%s4171_s29 + $0x760] ss:$16 sps:$4 sm:$0xff]  }
  0x56   : > { %2266 = vmatmul.mubr.bf16.vlgmr.msra.gmra.mxu0 %v4254_v17 }
  0x57   : > { %2307 = vmatmul.mubr.bf16.vlgmr.msra.gmra.mxu1 %v4256_v18  ;;  %2316 = vmatpush1.bf16.msra.mxu0 %v3665_v19  ;;  %v3745_v19 = vld [vmem:[%s4171_s29 + $0x544] ss:$16 sps:$4 sm:$0xff]  }
  0x58   : > { %2357 = vmatpush1.bf16.msra.mxu1 %v3668_v20  ;;  %2317 = vmatprep.subr.bf16.mxu0 %v3673_v21  ;;  %v3748_v20 = vld [vmem:[%s4171_s29 + $0x744] ss:$16 sps:$4 sm:$0xff]   ;;  %v3743_v21 = vld [vmem:[%s4171_s29 + $0x540] ss:$16 sps:$4 sm:$0xff]  }
  0x59   : > { %2358 = vmatprep.subr.bf16.mxu1 %v3676_v22  ;;  %2347 = vmatprep.mubr.bf16.mxu0 %v4297_v54  ;;  %v3746_v22 = vld [vmem:[%s4171_s29 + $0x740] ss:$16 sps:$4 sm:$0xff]  }
  0x5a   : > { %2388 = vmatprep.mubr.bf16.mxu1 %v4303_v58 }
  0x5b   : > { %2318 = vmatpush1.bf16.msra.mxu0 %v3671_v23  ;;  %v3751_v23 = vld [vmem:[%s4171_s29 + $0x524] ss:$16 sps:$4 sm:$0xff]  }
  0x5c   : > { %2359 = vmatpush1.bf16.msra.mxu1 %v3674_v24  ;;  %2319 = vmatprep.subr.bf16.mxu0 %v3679_v25  ;;  %v3754_v24 = vld [vmem:[%s4171_s29 + $0x724] ss:$16 sps:$4 sm:$0xff]   ;;  %v3749_v25 = vld [vmem:[%s4171_s29 + $0x520] ss:$16 sps:$4 sm:$0xff]  }
  0x5d   : > { %2360 = vmatprep.subr.bf16.mxu1 %v3682_v26  ;;  %v3752_v26 = vld [vmem:[%s4171_s29 + $0x720] ss:$16 sps:$4 sm:$0xff]  }
  0x5f   : > { %2320 = vmatpush1.bf16.msra.mxu0 %v3677_v27  ;;  %v3757_v27 = vld [vmem:[%s4171_s29 + $0x504] ss:$16 sps:$4 sm:$0xff]  }
  0x60   : > { %2361 = vmatpush1.bf16.msra.mxu1 %v3680_v28  ;;  %2321 = vmatprep.subr.bf16.mxu0 %v3685_v29  ;;  %v3760_v28 = vld [vmem:[%s4171_s29 + $0x704] ss:$16 sps:$4 sm:$0xff]   ;;  %v3755_v29 = vld [vmem:[%s4171_s29 + $0x500] ss:$16 sps:$4 sm:$0xff]  }
  0x61   : > { %2362 = vmatprep.subr.bf16.mxu1 %v3688_v30  ;;  %v3758_v30 = vld [vmem:[%s4171_s29 + $0x700] ss:$16 sps:$4 sm:$0xff]  }
  0x63   : > { %2322 = vmatpush1.bf16.msra.mxu0 %v3683_v31  ;;  %v3764_v31 = vld [vmem:[%s4171_s29 + $0x8e4] ss:$16 sps:$4 sm:$0xff]  }
  0x64   : > { %2363 = vmatpush1.bf16.msra.mxu1 %v3686_v32  ;;  %2323 = vmatprep.subr.bf16.mxu0 %v3691_v33  ;;  %v3767_v32 = vld [vmem:[%s4171_s29 + $0xec] ss:$16 sps:$4 sm:$0xff]   ;;  %v3762_v33 = vld [vmem:[%s4171_s29 + $0x8e0] ss:$16 sps:$4 sm:$0xff]  }
  0x65   : > { %2364 = vmatprep.subr.bf16.mxu1 %v3694_v34  ;;  %v4344_v34 = vpack.c.bf16 %v4286_v45, %v4286_v45 }
  0x67   : > { %2324 = vmatpush1.bf16.msra.mxu0 %v3689_v35  ;;  %v4348_v35 = vpack.c.bf16 %v4293_v51, %v4293_v51  ;;  %v3785_v51 = vld [vmem:[%s4171_s29 + $0x8c] ss:$16 sps:$4 sm:$0xff]  }
  0x68   : > { %2365 = vmatpush1.bf16.msra.mxu1 %v3692_v36  ;;  %2325 = vmatprep.subr.bf16.mxu0 %v3697_v37  ;;  %v3765_v36 = vld [vmem:[%s4171_s29 + $0xe8] ss:$16 sps:$4 sm:$0xff]   ;;  %v3770_v37 = vld [vmem:[%s4171_s29 + $0x8c4] ss:$16 sps:$4 sm:$0xff]  }
  0x69   : > { %2366 = vmatprep.subr.bf16.mxu1 %v3700_v38  ;;  %v3773_v38 = vld [vmem:[%s4171_s29 + $0xcc] ss:$16 sps:$4 sm:$0xff]  }
  0x6b   : > { %2326 = vmatpush1.bf16.msra.mxu0 %v3695_v39  ;;  %v4354_v39 = vld.sshfl [vmem:[%s4166_s25 + $0x10] sm:$0x33 pattern:$0x76325410] }
  0x6c   : > { %2367 = vmatpush1.bf16.msra.mxu1 %v3698_v40  ;;  %2327 = vmatprep.subr.bf16.mxu0 %v3703_v41  ;;  %v292_v40 = vcombine.high %v4354_v39, %v4354_v39  ;;  %v3768_v41 = vld [vmem:[%s4171_s29 + $0x8c0] ss:$16 sps:$4 sm:$0xff]  }
  0x6d   : > { %2368 = vmatprep.subr.bf16.mxu1 %v3706_v42  ;;  %v3771_v42 = vld [vmem:[%s4171_s29 + $0xc8] ss:$16 sps:$4 sm:$0xff]  }
  0x6e   : > { %v4363_v45 = vpack.c.bf16 %v292_v40, %v292_v40  ;;  %v3846_v40 = vld [vmem:[%s4171_s29 + $0x920] ss:$16 sps:$4 sm:$0xff]  }
  0x6f   : > { %2328 = vmatpush1.bf16.msra.mxu0 %v3701_v47  ;;  %v3774_v47 = vld [vmem:[%s4171_s29 + $0x8a0] ss:$16 sps:$4 sm:$0xff]  }
  0x70   : > { %2369 = vmatpush1.bf16.msra.mxu1 %v3704_v48  ;;  %2329 = vmatprep.subr.bf16.mxu0 %v3709_v52  ;;  %v3777_v48 = vld [vmem:[%s4171_s29 + $0xa8] ss:$16 sps:$4 sm:$0xff]   ;;  %v3780_v52 = vld [vmem:[%s4171_s29 + $0x880] ss:$16 sps:$4 sm:$0xff]  }
  0x71   : > { %2370 = vmatprep.subr.bf16.mxu1 %v3712_v53  ;;  %v3783_v53 = vld [vmem:[%s4171_s29 + $0x88] ss:$16 sps:$4 sm:$0xff]  }
  0x73   : > { %2330 = vmatpush1.bf16.msra.mxu0 %v3707_v56  ;;  %v3786_v56 = vld [vmem:[%s4171_s29 + $0x860] ss:$16 sps:$4 sm:$0xff]  }
  0x74   : > { %2371 = vmatpush1.bf16.msra.mxu1 %v3710_v57  ;;  %2331 = vmatprep.subr.bf16.mxu0 %v3715_v59  ;;  %v3789_v57 = vld [vmem:[%s4171_s29 + $0x68] ss:$16 sps:$4 sm:$0xff]   ;;  %v3794_v59 = vld [vmem:[%s4171_s29 + $0x844] ss:$16 sps:$4 sm:$0xff]  }
  0x75   : > { %2372 = vmatprep.subr.bf16.mxu1 %v3718_v60  ;;  %v3797_v60 = vld [vmem:[%s4171_s29 + $0x4c] ss:$16 sps:$4 sm:$0xff]  }
  0x77   : > { %2332 = vmatpush2.bf16.msra.mxu0 %v3713_v61  ;;  %v3792_v61 = vld [vmem:[%s4171_s29 + $0x840] ss:$16 sps:$4 sm:$0xff]  }
  0x78   : > { %2373 = vmatpush2.bf16.msra.mxu1 %v3716_v62  ;;  %2333 = vmatprep.subr.bf16.mxu0 %v3721_v0  ;;  %v3795_v62 = vld [vmem:[%s4171_s29 + $0x48] ss:$16 sps:$4 sm:$0xff]   ;;  %v3800_v0 = vld [vmem:[%s4171_s29 + $0x824] ss:$16 sps:$4 sm:$0xff]  }
  0x79   : > { %2374 = vmatprep.subr.bf16.mxu1 %v3724_v1  ;;  %v3803_v1 = vld [vmem:[%s4171_s29 + $0x2c] ss:$16 sps:$4 sm:$0xff]  }
  0x7b   : > { %2334 = vmatpush2.bf16.msra.mxu0 %v3719_v2  ;;  %v3798_v2 = vld [vmem:[%s4171_s29 + $0x820] ss:$16 sps:$4 sm:$0xff]  }
  0x7c   : > { %2375 = vmatpush2.bf16.msra.mxu1 %v3722_v3  ;;  %2335 = vmatprep.subr.bf16.mxu0 %v3727_v5  ;;  %v3801_v3 = vld [vmem:[%s4171_s29 + $0x28] ss:$16 sps:$4 sm:$0xff]   ;;  %v3806_v5 = vld [vmem:[%s4171_s29 + $0x804] ss:$16 sps:$4 sm:$0xff]  }
  0x7d   : > { %2376 = vmatprep.subr.bf16.mxu1 %v3730_v6  ;;  %v3809_v6 = vld [vmem:[%s4171_s29 + $0xc] ss:$16 sps:$4 sm:$0xff]  }
  0x7f   : > { %2336 = vmatpush2.bf16.msra.mxu0 %v3725_v7  ;;  %v3804_v7 = vld [vmem:[%s4171_s29 + $0x800] ss:$16 sps:$4 sm:$0xff]  }
  0x80   : > { %2377 = vmatpush2.bf16.msra.mxu1 %v3728_v8  ;;  %2337 = vmatprep.subr.bf16.mxu0 %v3733_v9  ;;  %v3807_v8 = vld [vmem:[%s4171_s29 + $0x8] ss:$16 sps:$4 sm:$0xff]   ;;  %v3812_v9 = vld [vmem:[%s4171_s29 + $0x9e4] ss:$16 sps:$4 sm:$0xff]  }
  0x81   : > { %2378 = vmatprep.subr.bf16.mxu1 %v3736_v10  ;;  %v3815_v10 = vld [vmem:[%s4171_s29 + $0x1ec] ss:$16 sps:$4 sm:$0xff]  }
  0x83   : > { %2338 = vmatpush2.bf16.msra.mxu0 %v3731_v11  ;;  %v3810_v11 = vld [vmem:[%s4171_s29 + $0x9e0] ss:$16 sps:$4 sm:$0xff]  }
  0x84   : > { %2379 = vmatpush2.bf16.msra.mxu1 %v3734_v12  ;;  %2339 = vmatprep.subr.bf16.mxu0 %v3739_v13  ;;  %v3813_v12 = vld [vmem:[%s4171_s29 + $0x1e8] ss:$16 sps:$4 sm:$0xff]   ;;  %v3818_v13 = vld [vmem:[%s4171_s29 + $0x9c4] ss:$16 sps:$4 sm:$0xff]  }
  0x85   : > { %2380 = vmatprep.subr.bf16.mxu1 %v3742_v14  ;;  %v3821_v14 = vld [vmem:[%s4171_s29 + $0x1cc] ss:$16 sps:$4 sm:$0xff]  }
  0x87   : > { %2340 = vmatpush2.bf16.msra.mxu0 %v3737_v15  ;;  %v3816_v15 = vld [vmem:[%s4171_s29 + $0x9c0] ss:$16 sps:$4 sm:$0xff]  }
  0x88   : > { %2381 = vmatpush2.bf16.msra.mxu1 %v3740_v16  ;;  %2341 = vmatprep.subr.bf16.mxu0 %v3745_v19  ;;  %v3819_v16 = vld [vmem:[%s4171_s29 + $0x1c8] ss:$16 sps:$4 sm:$0xff]   ;;  %v3824_v19 = vld [vmem:[%s4171_s29 + $0x9a4] ss:$16 sps:$4 sm:$0xff]  }
  0x89   : > { %2382 = vmatprep.subr.bf16.mxu1 %v3748_v20  ;;  %v3827_v20 = vld [vmem:[%s4171_s29 + $0x1ac] ss:$16 sps:$4 sm:$0xff]  }
  0x8b   : > { %2342 = vmatpush2.bf16.msra.mxu0 %v3743_v21  ;;  %v3822_v21 = vld [vmem:[%s4171_s29 + $0x9a0] ss:$16 sps:$4 sm:$0xff]  }
  0x8c   : > { %2383 = vmatpush2.bf16.msra.mxu1 %v3746_v22  ;;  %2343 = vmatprep.subr.bf16.mxu0 %v3751_v23  ;;  %v3825_v22 = vld [vmem:[%s4171_s29 + $0x1a8] ss:$16 sps:$4 sm:$0xff]   ;;  %v3830_v23 = vld [vmem:[%s4171_s29 + $0x984] ss:$16 sps:$4 sm:$0xff]  }
  0x8d   : > { %2384 = vmatprep.subr.bf16.mxu1 %v3754_v24  ;;  %v3833_v24 = vld [vmem:[%s4171_s29 + $0x18c] ss:$16 sps:$4 sm:$0xff]  }
  0x8f   : > { %2344 = vmatpush2.bf16.msra.mxu0 %v3749_v25  ;;  %v3828_v25 = vld [vmem:[%s4171_s29 + $0x980] ss:$16 sps:$4 sm:$0xff]  }
  0x90   : > { %2385 = vmatpush2.bf16.msra.mxu1 %v3752_v26  ;;  %2345 = vmatprep.subr.bf16.mxu0 %v3757_v27  ;;  %v3831_v26 = vld [vmem:[%s4171_s29 + $0x188] ss:$16 sps:$4 sm:$0xff]   ;;  %v3836_v27 = vld [vmem:[%s4171_s29 + $0x964] ss:$16 sps:$4 sm:$0xff]  }
  0x91   : > { %2386 = vmatprep.subr.bf16.mxu1 %v3760_v28  ;;  %v3839_v28 = vld [vmem:[%s4171_s29 + $0x16c] ss:$16 sps:$4 sm:$0xff]  }
  0x93   : > { %2346 = vmatpush2.bf16.msra.mxu0 %v3755_v29  ;;  %v3834_v29 = vld [vmem:[%s4171_s29 + $0x960] ss:$16 sps:$4 sm:$0xff]  }
  0x94   : > { %2387 = vmatpush2.bf16.msra.mxu1 %v3758_v30  ;;  %2397 = vmatprep.subr.bf16.mxu0 %v3764_v31  ;;  %v3837_v30 = vld [vmem:[%s4171_s29 + $0x168] ss:$16 sps:$4 sm:$0xff]   ;;  %v3842_v31 = vld [vmem:[%s4171_s29 + $0x944] ss:$16 sps:$4 sm:$0xff]  }
  0x95   : > { %2438 = vmatprep.subr.bf16.mxu1 %v3767_v32  ;;  %v3845_v32 = vld [vmem:[%s4171_s29 + $0x14c] ss:$16 sps:$4 sm:$0xff]  }
  0x96   : > { %2348 = vmatmul.mubr.bf16.vlgmr.msra.gmra.mxu0 %v4344_v34 }
  0x97   : > { %2389 = vmatmul.mubr.bf16.vlgmr.msra.gmra.mxu1 %v4348_v35  ;;  %2398 = vmatpush1.bf16.msra.mxu0 %v3762_v33  ;;  %v3840_v33 = vld [vmem:[%s4171_s29 + $0x940] ss:$16 sps:$4 sm:$0xff]  }
  0x98   : > { %2439 = vmatpush1.bf16.msra.mxu1 %v3765_v36  ;;  %2399 = vmatprep.subr.bf16.mxu0 %v3770_v37  ;;  %v3843_v36 = vld [vmem:[%s4171_s29 + $0x148] ss:$16 sps:$4 sm:$0xff]   ;;  %v3848_v37 = vld [vmem:[%s4171_s29 + $0x924] ss:$16 sps:$4 sm:$0xff]  }
  0x99   : > { %2440 = vmatprep.subr.bf16.mxu1 %v3773_v38  ;;  %2429 = vmatprep.mubr.bf16.mxu0 %v4363_v45  ;;  %v3851_v38 = vld [vmem:[%s4171_s29 + $0x12c] ss:$16 sps:$4 sm:$0xff]  }
  0x9a   : > { %2470 = vmatprep.mubr.bf16.mxu1 %v4233_v63  ;;  %v3788_v63 = vld [vmem:[%s4171_s29 + $0x864] ss:$16 sps:$4 sm:$0xff]  }
  0x9b   : > { %2400 = vmatpush1.bf16.msra.mxu0 %v3768_v41  ;;  %v3849_v41 = vld [vmem:[%s4171_s29 + $0x128] ss:$16 sps:$4 sm:$0xff]  }
  0x9c   : > { %2441 = vmatpush1.bf16.msra.mxu1 %v3771_v42  ;;  %2401 = vmatprep.subr.bf16.mxu0 %v3776_v43  ;;  %v3854_v42 = vld [vmem:[%s4171_s29 + $0x904] ss:$16 sps:$4 sm:$0xff]   ;;  %v3857_v43 = vld [vmem:[%s4171_s29 + $0x10c] ss:$16 sps:$4 sm:$0xff]  }
  0x9d   : > { %2442 = vmatprep.subr.bf16.mxu1 %v3779_v46  ;;  %v3852_v46 = vld [vmem:[%s4171_s29 + $0x900] ss:$16 sps:$4 sm:$0xff]  }
  0x9f   : > { %2402 = vmatpush1.bf16.msra.mxu0 %v3774_v47  ;;  %v3855_v47 = vld [vmem:[%s4171_s29 + $0x108] ss:$16 sps:$4 sm:$0xff]  }
  0xa0   : > { %2443 = vmatpush1.bf16.msra.mxu1 %v3777_v48  ;;  %2403 = vmatprep.subr.bf16.mxu0 %v3782_v49  ;;  %v3860_v48 = vld [vmem:[%s4171_s29 + $0x2ec] ss:$16 sps:$4 sm:$0xff]  }
  0xa1   : > { %2444 = vmatprep.subr.bf16.mxu1 %v3785_v51  ;;  %v3863_v49 = vld [vmem:[%s4171_s29 + $0x4ec] ss:$16 sps:$4 sm:$0xff]   ;;  %v4426_v51 = vpack.c.bf16 %v4354_v39, %v4354_v39  ;;  %v3867_v39 = vld [vmem:[%s4171_s29 + $0x4c8] ss:$16 sps:$4 sm:$0xff]  }
  0xa3   : > { %2404 = vmatpush1.bf16.msra.mxu0 %v3780_v52  ;;  %v3858_v52 = vld [vmem:[%s4171_s29 + $0x2e8] ss:$16 sps:$4 sm:$0xff]  }
  0xa4   : > { %2445 = vmatpush1.bf16.msra.mxu1 %v3783_v53  ;;  %2405 = vmatprep.subr.bf16.mxu0 %v3788_v63  ;;  %v3861_v53 = vld [vmem:[%s4171_s29 + $0x4e8] ss:$16 sps:$4 sm:$0xff]   ;;  %v3866_v63 = vld [vmem:[%s4171_s29 + $0x2cc] ss:$16 sps:$4 sm:$0xff]  }
  0xa5   : > { %2446 = vmatprep.subr.bf16.mxu1 %v3791_v55  ;;  %v3869_v55 = vld [vmem:[%s4171_s29 + $0x4cc] ss:$16 sps:$4 sm:$0xff]  }
  0xa7   : > { %2406 = vmatpush1.bf16.msra.mxu0 %v3786_v56  ;;  %v3864_v56 = vld [vmem:[%s4171_s29 + $0x2c8] ss:$16 sps:$4 sm:$0xff]  }
  0xa8   : > { %2447 = vmatpush1.bf16.msra.mxu1 %v3789_v57  ;;  %2407 = vmatprep.subr.bf16.mxu0 %v3794_v59  ;;  %v3872_v57 = vld [vmem:[%s4171_s29 + $0x2ac] ss:$16 sps:$4 sm:$0xff]  }
  0xa9   : > { %2448 = vmatprep.subr.bf16.mxu1 %v3797_v60  ;;  %v3875_v59 = vld [vmem:[%s4171_s29 + $0x4ac] ss:$16 sps:$4 sm:$0xff]   ;;  %v3870_v60 = vld [vmem:[%s4171_s29 + $0x2a8] ss:$16 sps:$4 sm:$0xff]  }
  0xab   : > { %2408 = vmatpush1.bf16.msra.mxu0 %v3792_v61  ;;  %v3878_v61 = vld [vmem:[%s4171_s29 + $0x28c] ss:$16 sps:$4 sm:$0xff]  }
  0xac   : > { %2449 = vmatpush1.bf16.msra.mxu1 %v3795_v62  ;;  %2409 = vmatprep.subr.bf16.mxu0 %v3800_v0  ;;  %v3881_v62 = vld [vmem:[%s4171_s29 + $0x48c] ss:$16 sps:$4 sm:$0xff]   ;;  %v3876_v0 = vld [vmem:[%s4171_s29 + $0x288] ss:$16 sps:$4 sm:$0xff]  }
  0xad   : > { %2450 = vmatprep.subr.bf16.mxu1 %v3803_v1  ;;  %v3887_v1 = vld [vmem:[%s4171_s29 + $0x46c] ss:$16 sps:$4 sm:$0xff]  }
  0xaf   : > { %2410 = vmatpush1.bf16.msra.mxu0 %v3798_v2  ;;  %v3882_v2 = vld [vmem:[%s4171_s29 + $0x268] ss:$16 sps:$4 sm:$0xff]  }
  0xb0   : > { %2451 = vmatpush1.bf16.msra.mxu1 %v3801_v3  ;;  %2411 = vmatprep.subr.bf16.mxu0 %v3806_v5  ;;  %v3885_v3 = vld [vmem:[%s4171_s29 + $0x468] ss:$16 sps:$4 sm:$0xff]   ;;  %v3890_v5 = vld [vmem:[%s4171_s29 + $0x24c] ss:$16 sps:$4 sm:$0xff]  }
  0xb1   : > { %2452 = vmatprep.subr.bf16.mxu1 %v3809_v6  ;;  %v3893_v6 = vld [vmem:[%s4171_s29 + $0x44c] ss:$16 sps:$4 sm:$0xff]  }
  0xb3   : > { %2412 = vmatpush1.bf16.msra.mxu0 %v3804_v7  ;;  %v3888_v7 = vld [vmem:[%s4171_s29 + $0x248] ss:$16 sps:$4 sm:$0xff]  }
  0xb4   : > { %2453 = vmatpush1.bf16.msra.mxu1 %v3807_v8  ;;  %2413 = vmatprep.subr.bf16.mxu0 %v3812_v9  ;;  %v3891_v8 = vld [vmem:[%s4171_s29 + $0x448] ss:$16 sps:$4 sm:$0xff]   ;;  %v3896_v9 = vld [vmem:[%s4171_s29 + $0x22c] ss:$16 sps:$4 sm:$0xff]  }
  0xb5   : > { %2454 = vmatprep.subr.bf16.mxu1 %v3815_v10  ;;  %v3899_v10 = vld [vmem:[%s4171_s29 + $0x42c] ss:$16 sps:$4 sm:$0xff]  }
  0xb7   : > { %2414 = vmatpush2.bf16.msra.mxu0 %v3810_v11  ;;  %v3894_v11 = vld [vmem:[%s4171_s29 + $0x228] ss:$16 sps:$4 sm:$0xff]  }
  0xb8   : > { %2455 = vmatpush2.bf16.msra.mxu1 %v3813_v12  ;;  %2415 = vmatprep.subr.bf16.mxu0 %v3818_v13  ;;  %v3897_v12 = vld [vmem:[%s4171_s29 + $0x428] ss:$16 sps:$4 sm:$0xff]   ;;  %v3902_v13 = vld [vmem:[%s4171_s29 + $0x20c] ss:$16 sps:$4 sm:$0xff]  }
  0xb9   : > { %2456 = vmatprep.subr.bf16.mxu1 %v3821_v14  ;;  %v3905_v14 = vld [vmem:[%s4171_s29 + $0x40c] ss:$16 sps:$4 sm:$0xff]  }
  0xbb   : > { %2416 = vmatpush2.bf16.msra.mxu0 %v3816_v15  ;;  %v3900_v15 = vld [vmem:[%s4171_s29 + $0x208] ss:$16 sps:$4 sm:$0xff]  }
  0xbc   : > { %2457 = vmatpush2.bf16.msra.mxu1 %v3819_v16  ;;  %2417 = vmatprep.subr.bf16.mxu0 %v3824_v19  ;;  %v3903_v16 = vld [vmem:[%s4171_s29 + $0x408] ss:$16 sps:$4 sm:$0xff]   ;;  %v3908_v19 = vld [vmem:[%s4171_s29 + $0x3ec] ss:$16 sps:$4 sm:$0xff]  }
  0xbd   : > { %2458 = vmatprep.subr.bf16.mxu1 %v3827_v20  ;;  %v3911_v20 = vld [vmem:[%s4171_s29 + $0x5ec] ss:$16 sps:$4 sm:$0xff]  }
  0xbf   : > { %2418 = vmatpush2.bf16.msra.mxu0 %v3822_v21  ;;  %v3906_v21 = vld [vmem:[%s4171_s29 + $0x3e8] ss:$16 sps:$4 sm:$0xff]  }
  0xc0   : > { %2459 = vmatpush2.bf16.msra.mxu1 %v3825_v22  ;;  %2419 = vmatprep.subr.bf16.mxu0 %v3830_v23  ;;  %v3909_v22 = vld [vmem:[%s4171_s29 + $0x5e8] ss:$16 sps:$4 sm:$0xff]   ;;  %v3914_v23 = vld [vmem:[%s4171_s29 + $0x3cc] ss:$16 sps:$4 sm:$0xff]  }
  0xc1   : > { %2460 = vmatprep.subr.bf16.mxu1 %v3833_v24  ;;  %v3917_v24 = vld [vmem:[%s4171_s29 + $0x5cc] ss:$16 sps:$4 sm:$0xff]  }
  0xc3   : > { %2420 = vmatpush2.bf16.msra.mxu0 %v3828_v25  ;;  %v3912_v25 = vld [vmem:[%s4171_s29 + $0x3c8] ss:$16 sps:$4 sm:$0xff]  }
  0xc4   : > { %2461 = vmatpush2.bf16.msra.mxu1 %v3831_v26  ;;  %2421 = vmatprep.subr.bf16.mxu0 %v3836_v27  ;;  %v3915_v26 = vld [vmem:[%s4171_s29 + $0x5c8] ss:$16 sps:$4 sm:$0xff]   ;;  %v3920_v27 = vld [vmem:[%s4171_s29 + $0x3ac] ss:$16 sps:$4 sm:$0xff]  }
  0xc5   : > { %2462 = vmatprep.subr.bf16.mxu1 %v3839_v28  ;;  %v3923_v28 = vld [vmem:[%s4171_s29 + $0x5ac] ss:$16 sps:$4 sm:$0xff]  }
  0xc7   : > { %2422 = vmatpush2.bf16.msra.mxu0 %v3834_v29  ;;  %v3918_v29 = vld [vmem:[%s4171_s29 + $0x3a8] ss:$16 sps:$4 sm:$0xff]  }
  0xc8   : > { %2463 = vmatpush2.bf16.msra.mxu1 %v3837_v30  ;;  %2423 = vmatprep.subr.bf16.mxu0 %v3842_v31  ;;  %v3921_v30 = vld [vmem:[%s4171_s29 + $0x5a8] ss:$16 sps:$4 sm:$0xff]   ;;  %v3926_v31 = vld [vmem:[%s4171_s29 + $0x38c] ss:$16 sps:$4 sm:$0xff]  }
  0xc9   : > { %2464 = vmatprep.subr.bf16.mxu1 %v3845_v32  ;;  %v3929_v32 = vld [vmem:[%s4171_s29 + $0x58c] ss:$16 sps:$4 sm:$0xff]  }
  0xcb   : > { %2424 = vmatpush2.bf16.msra.mxu0 %v3840_v33  ;;  %v3924_v33 = vld [vmem:[%s4171_s29 + $0x388] ss:$16 sps:$4 sm:$0xff]  }
  0xcc   : > { %2465 = vmatpush2.bf16.msra.mxu1 %v3843_v36  ;;  %2425 = vmatprep.subr.bf16.mxu0 %v3848_v37  ;;  %v3927_v36 = vld [vmem:[%s4171_s29 + $0x588] ss:$16 sps:$4 sm:$0xff]   ;;  %v3932_v37 = vld [vmem:[%s4171_s29 + $0x36c] ss:$16 sps:$4 sm:$0xff]  }
  0xcd   : > { %2466 = vmatprep.subr.bf16.mxu1 %v3851_v38  ;;  %v3935_v38 = vld [vmem:[%s4171_s29 + $0x56c] ss:$16 sps:$4 sm:$0xff]  }
  0xcf   : > { %2426 = vmatpush2.bf16.msra.mxu0 %v3846_v40  ;;  %v3930_v40 = vld [vmem:[%s4171_s29 + $0x368] ss:$16 sps:$4 sm:$0xff]  }
  0xd0   : > { %2467 = vmatpush2.bf16.msra.mxu1 %v3849_v41  ;;  %2427 = vmatprep.subr.bf16.mxu0 %v3854_v42  ;;  %v3933_v41 = vld [vmem:[%s4171_s29 + $0x568] ss:$16 sps:$4 sm:$0xff]   ;;  %v3938_v42 = vld [vmem:[%s4171_s29 + $0x34c] ss:$16 sps:$4 sm:$0xff]  }
  0xd1   : > { %2468 = vmatprep.subr.bf16.mxu1 %v3857_v43  ;;  %v3941_v43 = vld [vmem:[%s4171_s29 + $0x54c] ss:$16 sps:$4 sm:$0xff]  }
  0xd3   : > { %2428 = vmatpush2.bf16.msra.mxu0 %v3852_v46  ;;  %v3936_v46 = vld [vmem:[%s4171_s29 + $0x348] ss:$16 sps:$4 sm:$0xff]  }
  0xd4   : > { %2469 = vmatpush2.bf16.msra.mxu1 %v3855_v47  ;;  %2479 = vmatprep.subr.bf16.mxu0 %v3860_v48  ;;  %v3939_v47 = vld [vmem:[%s4171_s29 + $0x548] ss:$16 sps:$4 sm:$0xff]   ;;  %v3944_v48 = vld [vmem:[%s4171_s29 + $0x32c] ss:$16 sps:$4 sm:$0xff]  }
  0xd5   : > { %2520 = vmatprep.subr.bf16.mxu1 %v3863_v49  ;;  %v3947_v49 = vld [vmem:[%s4171_s29 + $0x52c] ss:$16 sps:$4 sm:$0xff]  }
  0xd6   : > { %2430 = vmatmul.mubr.bf16.vlgmr.msra.gmra.mxu0 %v4426_v51 }
  0xd7   : > { %2471 = vmatmul.mubr.bf16.vlgmr.msra.gmra.mxu1 %v4254_v17  ;;  %2480 = vmatpush1.bf16.msra.mxu0 %v3858_v52  ;;  %v3873_v17 = vld [vmem:[%s4171_s29 + $0x4a8] ss:$16 sps:$4 sm:$0xff]  }
  0xd8   : > { %2521 = vmatpush1.bf16.msra.mxu1 %v3861_v53  ;;  %2481 = vmatprep.subr.bf16.mxu0 %v3866_v63  ;;  %v3942_v52 = vld [vmem:[%s4171_s29 + $0x328] ss:$16 sps:$4 sm:$0xff]   ;;  %v3950_v63 = vld [vmem:[%s4171_s29 + $0x30c] ss:$16 sps:$4 sm:$0xff]  }
  0xd9   : > { %2522 = vmatprep.subr.bf16.mxu1 %v3869_v55  ;;  %2511 = vmatprep.mubr.bf16.mxu0 %v4238_v4  ;;  %v3879_v4 = vld [vmem:[%s4171_s29 + $0x488] ss:$16 sps:$4 sm:$0xff]   ;;  %v3953_v55 = vld [vmem:[%s4171_s29 + $0x50c] ss:$16 sps:$4 sm:$0xff]  }
  0xda   : > { %2552 = vmatprep.mubr.bf16.mxu1 %v4297_v54  ;;  %v3884_v54 = vld [vmem:[%s4171_s29 + $0x26c] ss:$16 sps:$4 sm:$0xff]   ;;  %v3945_v53 = vld [vmem:[%s4171_s29 + $0x528] ss:$16 sps:$4 sm:$0xff]  }
  0xdb   : > { %2482 = vmatpush1.bf16.msra.mxu0 %v3864_v56  ;;  %v3948_v56 = vld [vmem:[%s4171_s29 + $0x308] ss:$16 sps:$4 sm:$0xff]  }
  0xdc   : > { %2523 = vmatpush1.bf16.msra.mxu1 %v3867_v39  ;;  %2483 = vmatprep.subr.bf16.mxu0 %v3872_v57  ;;  %v3951_v39 = vld [vmem:[%s4171_s29 + $0x508] ss:$16 sps:$4 sm:$0xff]   ;;  %v3956_v57 = vld [vmem:[%s4171_s29 + $0x6ec] ss:$16 sps:$4 sm:$0xff]  }
  0xdd   : > { %2524 = vmatprep.subr.bf16.mxu1 %v3875_v59  ;;  %v3959_v59 = vld [vmem:[%s4171_s29 + $0x8ec] ss:$16 sps:$4 sm:$0xff]  }
  0xdf   : > { %2484 = vmatpush1.bf16.msra.mxu0 %v3870_v60  ;;  %v3954_v60 = vld [vmem:[%s4171_s29 + $0x6e8] ss:$16 sps:$4 sm:$0xff]  }
  0xe0   : > { %2525 = vmatpush1.bf16.msra.mxu1 %v3873_v17  ;;  %2485 = vmatprep.subr.bf16.mxu0 %v3878_v61  ;;  %v3957_v17 = vld [vmem:[%s4171_s29 + $0x8e8] ss:$16 sps:$4 sm:$0xff]   ;;  %v3962_v61 = vld [vmem:[%s4171_s29 + $0x6cc] ss:$16 sps:$4 sm:$0xff]  }
  0xe1   : > { %2526 = vmatprep.subr.bf16.mxu1 %v3881_v62  ;;  %v3965_v62 = vld [vmem:[%s4171_s29 + $0x8cc] ss:$16 sps:$4 sm:$0xff]  }
  0xe3   : > { %2486 = vmatpush1.bf16.msra.mxu0 %v3876_v0 }
  0xe4   : > { %2527 = vmatpush1.bf16.msra.mxu1 %v3879_v4  ;;  %2487 = vmatprep.subr.bf16.mxu0 %v3884_v54 }
  0xe5   : > { %2528 = vmatprep.subr.bf16.mxu1 %v3887_v1  ;;  %v3960_v1 = vld [vmem:[%s4171_s29 + $0x6c8] ss:$16 sps:$4 sm:$0xff]  }
  0xe7   : > { %2488 = vmatpush1.bf16.msra.mxu0 %v3882_v2  ;;  %v3963_v2 = vld [vmem:[%s4171_s29 + $0x8c8] ss:$16 sps:$4 sm:$0xff]  }
  0xe8   : > { %2529 = vmatpush1.bf16.msra.mxu1 %v3885_v3  ;;  %2489 = vmatprep.subr.bf16.mxu0 %v3890_v5 }
  0xe9   : > { %2530 = vmatprep.subr.bf16.mxu1 %v3893_v6  ;;  %v3968_v6 = vld [vmem:[%s4171_s29 + $0x6ac] ss:$16 sps:$4 sm:$0xff]  }
  0xeb   : > { %2490 = vmatpush1.bf16.msra.mxu0 %v3888_v7  ;;  %v3971_v7 = vld [vmem:[%s4171_s29 + $0x8ac] ss:$16 sps:$4 sm:$0xff]  }
  0xec   : > { %2531 = vmatpush1.bf16.msra.mxu1 %v3891_v8  ;;  %2491 = vmatprep.subr.bf16.mxu0 %v3896_v9  ;;  %v3966_v9 = vld [vmem:[%s4171_s29 + $0x6a8] ss:$16 sps:$4 sm:$0xff]  }
  0xed   : > { %2532 = vmatprep.subr.bf16.mxu1 %v3899_v10  ;;  %v3969_v10 = vld [vmem:[%s4171_s29 + $0x8a8] ss:$16 sps:$4 sm:$0xff]  }
  0xef   : > { %2492 = vmatpush1.bf16.msra.mxu0 %v3894_v11 }
  0xf0   : > { %2533 = vmatpush1.bf16.msra.mxu1 %v3897_v12  ;;  %2493 = vmatprep.subr.bf16.mxu0 %v3902_v13  ;;  %v3974_v13 = vld [vmem:[%s4171_s29 + $0x68c] ss:$16 sps:$4 sm:$0xff]  }
  0xf1   : > { %2534 = vmatprep.subr.bf16.mxu1 %v3905_v14  ;;  %v3975_v14 = vld [vmem:[%s4171_s29 + $0x888] ss:$16 sps:$4 sm:$0xff]  }
  0xf3   : > { %2494 = vmatpush1.bf16.msra.mxu0 %v3900_v15  ;;  %v3980_v15 = vld [vmem:[%s4171_s29 + $0x66c] ss:$16 sps:$4 sm:$0xff]  }
  0xf4   : > { %2535 = vmatpush1.bf16.msra.mxu1 %v3903_v16  ;;  %2495 = vmatprep.subr.bf16.mxu0 %v3908_v19  ;;  %v3983_v16 = vld [vmem:[%s4171_s29 + $0x86c] ss:$16 sps:$4 sm:$0xff]   ;;  %v3978_v19 = vld [vmem:[%s4171_s29 + $0x668] ss:$16 sps:$4 sm:$0xff]  }
  0xf5   : > { %2536 = vmatprep.subr.bf16.mxu1 %v3911_v20  ;;  %v3981_v20 = vld [vmem:[%s4171_s29 + $0x868] ss:$16 sps:$4 sm:$0xff]  }
  0xf7   : > { %2496 = vmatpush2.bf16.msra.mxu0 %v3906_v21  ;;  %v3986_v21 = vld [vmem:[%s4171_s29 + $0x64c] ss:$16 sps:$4 sm:$0xff]  }
  0xf8   : > { %2537 = vmatpush2.bf16.msra.mxu1 %v3909_v22  ;;  %2497 = vmatprep.subr.bf16.mxu0 %v3914_v23  ;;  %v3989_v22 = vld [vmem:[%s4171_s29 + $0x84c] ss:$16 sps:$4 sm:$0xff]   ;;  %v3984_v23 = vld [vmem:[%s4171_s29 + $0x648] ss:$16 sps:$4 sm:$0xff]  }
  0xf9   : > { %2538 = vmatprep.subr.bf16.mxu1 %v3917_v24  ;;  %v3987_v24 = vld [vmem:[%s4171_s29 + $0x848] ss:$16 sps:$4 sm:$0xff]  }
  0xfb   : > { %2498 = vmatpush2.bf16.msra.mxu0 %v3912_v25  ;;  %v3992_v25 = vld [vmem:[%s4171_s29 + $0x62c] ss:$16 sps:$4 sm:$0xff]  }
  0xfc   : > { %2539 = vmatpush2.bf16.msra.mxu1 %v3915_v26  ;;  %2499 = vmatprep.subr.bf16.mxu0 %v3920_v27  ;;  %v3995_v26 = vld [vmem:[%s4171_s29 + $0x82c] ss:$16 sps:$4 sm:$0xff]   ;;  %v3990_v27 = vld [vmem:[%s4171_s29 + $0x628] ss:$16 sps:$4 sm:$0xff]  }
  0xfd   : > { %2540 = vmatprep.subr.bf16.mxu1 %v3923_v28  ;;  %v3993_v28 = vld [vmem:[%s4171_s29 + $0x828] ss:$16 sps:$4 sm:$0xff]  }
  0xff   : > { %2500 = vmatpush2.bf16.msra.mxu0 %v3918_v29  ;;  %v3998_v29 = vld [vmem:[%s4171_s29 + $0x60c] ss:$16 sps:$4 sm:$0xff]  }
 0x100   : > { %2541 = vmatpush2.bf16.msra.mxu1 %v3921_v30  ;;  %2501 = vmatprep.subr.bf16.mxu0 %v3926_v31  ;;  %v4001_v30 = vld [vmem:[%s4171_s29 + $0x80c] ss:$16 sps:$4 sm:$0xff]   ;;  %v3996_v31 = vld [vmem:[%s4171_s29 + $0x608] ss:$16 sps:$4 sm:$0xff]  }
 0x101   : > { %2542 = vmatprep.subr.bf16.mxu1 %v3929_v32  ;;  %v3999_v32 = vld [vmem:[%s4171_s29 + $0x808] ss:$16 sps:$4 sm:$0xff]  }
 0x103   : > { %2502 = vmatpush2.bf16.msra.mxu0 %v3924_v33  ;;  %v4004_v33 = vld [vmem:[%s4171_s29 + $0x7ec] ss:$16 sps:$4 sm:$0xff]  }
 0x104   : > { %2543 = vmatpush2.bf16.msra.mxu1 %v3927_v36  ;;  %2503 = vmatprep.subr.bf16.mxu0 %v3932_v37  ;;  %v4007_v36 = vld [vmem:[%s4171_s29 + $0x9ec] ss:$16 sps:$4 sm:$0xff]   ;;  %v4002_v37 = vld [vmem:[%s4171_s29 + $0x7e8] ss:$16 sps:$4 sm:$0xff]  }
 0x105   : > { %2544 = vmatprep.subr.bf16.mxu1 %v3935_v38  ;;  %v4005_v38 = vld [vmem:[%s4171_s29 + $0x9e8] ss:$16 sps:$4 sm:$0xff]  }
 0x107   : > { %2504 = vmatpush2.bf16.msra.mxu0 %v3930_v40  ;;  %v4010_v40 = vld [vmem:[%s4171_s29 + $0x7cc] ss:$16 sps:$4 sm:$0xff]  }
 0x108   : > { %2545 = vmatpush2.bf16.msra.mxu1 %v3933_v41  ;;  %2505 = vmatprep.subr.bf16.mxu0 %v3938_v42  ;;  %v4013_v41 = vld [vmem:[%s4171_s29 + $0x9cc] ss:$16 sps:$4 sm:$0xff]   ;;  %v4008_v42 = vld [vmem:[%s4171_s29 + $0x7c8] ss:$16 sps:$4 sm:$0xff]  }
 0x109   : > { %2546 = vmatprep.subr.bf16.mxu1 %v3941_v43  ;;  %v4011_v43 = vld [vmem:[%s4171_s29 + $0x9c8] ss:$16 sps:$4 sm:$0xff]  }
 0x10b   : > { %2506 = vmatpush2.bf16.msra.mxu0 %v3936_v46  ;;  %v4016_v46 = vld [vmem:[%s4171_s29 + $0x7ac] ss:$16 sps:$4 sm:$0xff]  }
 0x10c   : > { %2547 = vmatpush2.bf16.msra.mxu1 %v3939_v47  ;;  %2507 = vmatprep.subr.bf16.mxu0 %v3944_v48  ;;  %v4019_v47 = vld [vmem:[%s4171_s29 + $0x9ac] ss:$16 sps:$4 sm:$0xff]   ;;  %v4014_v48 = vld [vmem:[%s4171_s29 + $0x7a8] ss:$16 sps:$4 sm:$0xff]  }
 0x10d   : > { %2548 = vmatprep.subr.bf16.mxu1 %v3947_v49  ;;  %v4017_v49 = vld [vmem:[%s4171_s29 + $0x9a8] ss:$16 sps:$4 sm:$0xff]  }
 0x10f   : > { %2508 = vmatpush2.bf16.msra.mxu0 %v3942_v52  ;;  %v4022_v52 = vld [vmem:[%s4171_s29 + $0x78c] ss:$16 sps:$4 sm:$0xff]  }
 0x110   : > { %2549 = vmatpush2.bf16.msra.mxu1 %v3945_v53  ;;  %2509 = vmatprep.subr.bf16.mxu0 %v3950_v63  ;;  %v4025_v53 = vld [vmem:[%s4171_s29 + $0x98c] ss:$16 sps:$4 sm:$0xff]   ;;  %v4020_v63 = vld [vmem:[%s4171_s29 + $0x788] ss:$16 sps:$4 sm:$0xff]  }
 0x111   : > { %2550 = vmatprep.subr.bf16.mxu1 %v3953_v55  ;;  %v4023_v55 = vld [vmem:[%s4171_s29 + $0x988] ss:$16 sps:$4 sm:$0xff]  }
 0x113   : > { %2510 = vmatpush2.bf16.msra.mxu0 %v3948_v56  ;;  %v4028_v56 = vld [vmem:[%s4171_s29 + $0x76c] ss:$16 sps:$4 sm:$0xff]  }
 0x114   : > { %2551 = vmatpush2.bf16.msra.mxu1 %v3951_v39  ;;  %2561 = vmatprep.subr.bf16.mxu0 %v3956_v57  ;;  %v4031_v39 = vld [vmem:[%s4171_s29 + $0x96c] ss:$16 sps:$4 sm:$0xff]   ;;  %v4026_v57 = vld [vmem:[%s4171_s29 + $0x768] ss:$16 sps:$4 sm:$0xff]  }
 0x115   : > { %2602 = vmatprep.subr.bf16.mxu1 %v3959_v59  ;;  %v4029_v59 = vld [vmem:[%s4171_s29 + $0x968] ss:$16 sps:$4 sm:$0xff]  }
 0x116   : > { %v2267_v0 = vpop.f32.mrf.mxu0  ;;  %2512 = vmatmul.mubr.bf16.vlgmr.msra.gmra.mxu0 %v4256_v18 }
 0x117   : > { %v2308_v4 = vpop.f32.mrf.mxu1  ;;  %2553 = vmatmul.mubr.bf16.vlgmr.msra.gmra.mxu1 %v4344_v34  ;;  %2562 = vmatpush1.bf16.msra.mxu0 %v3954_v60  ;;  %v4034_v60 = vld [vmem:[%s4171_s29 + $0x74c] ss:$16 sps:$4 sm:$0xff]  }
 0x118   : > { %v4502_v54 = vadd.f32 %v2308_v4, %v2267_v0  ;;  %2603 = vmatpush1.bf16.msra.mxu1 %v3957_v17  ;;  %v2269_v3 = vpop.f32.mrf.mxu0  ;;  %2563 = vmatprep.subr.bf16.mxu0 %v3962_v61  ;;  %v4037_v17 = vld [vmem:[%s4171_s29 + $0x94c] ss:$16 sps:$4 sm:$0xff]   ;;  %v4032_v61 = vld [vmem:[%s4171_s29 + $0x748] ss:$16 sps:$4 sm:$0xff]  }
 0x119   : > { %v2310_v5 = vpop.f32.mrf.mxu1  ;;  %2604 = vmatprep.subr.bf16.mxu1 %v3965_v62  ;;  %2593 = vmatprep.mubr.bf16.mxu0 %v4303_v58  ;;  %v3977_v58 = vld [vmem:[%s4171_s29 + $0x88c] ss:$16 sps:$4 sm:$0xff]   ;;  %v4035_v62 = vld [vmem:[%s4171_s29 + $0x948] ss:$16 sps:$4 sm:$0xff]  }
 0x11a   : > { %v4508_v8 = vadd.f32 %v2310_v5, %v2269_v3  ;;  %2634 = vmatprep.mubr.bf16.mxu1 %v4363_v45  ;;  %v2271_v18 = vpop.f32.mrf.mxu0  ;;  %v3972_v45 = vld [vmem:[%s4171_s29 + $0x688] ss:$16 sps:$4 sm:$0xff]   ;;  %v4040_v0 = vld [vmem:[%s4171_s29 + $0x72c] ss:$16 sps:$4 sm:$0xff]  }
 0x11b   : > { %v2312_v34 = vpop.f32.mrf.mxu1  ;;  %2564 = vmatpush1.bf16.msra.mxu0 %v3960_v1  ;;  %v4043_v4 = vld [vmem:[%s4171_s29 + $0x92c] ss:$16 sps:$4 sm:$0xff]   ;;  %v4038_v1 = vld [vmem:[%s4171_s29 + $0x728] ss:$16 sps:$4 sm:$0xff]  }
 0x11c   : > { %2605 = vmatpush1.bf16.msra.mxu1 %v3963_v2  ;;  %v2272_v11 = vpop.f32.mrf.mxu0  ;;  %2565 = vmatprep.subr.bf16.mxu0 %v3968_v6  ;;  %v4041_v2 = vld [vmem:[%s4171_s29 + $0x928] ss:$16 sps:$4 sm:$0xff]   ;;  %v4046_v3 = vld [vmem:[%s4171_s29 + $0x70c] ss:$16 sps:$4 sm:$0xff]  }
 0x11d   : > { %v2313_v12 = vpop.f32.mrf.mxu1  ;;  %2606 = vmatprep.subr.bf16.mxu1 %v3971_v7  ;;  %v4049_v5 = vld [vmem:[%s4171_s29 + $0x90c] ss:$16 sps:$4 sm:$0xff]   ;;  %v4044_v6 = vld [vmem:[%s4171_s29 + $0x708] ss:$16 sps:$4 sm:$0xff]  }
 0x11e   : > { %v4047_v7 = vld [vmem:[%s4171_s29 + $0x908] ss:$16 sps:$4 sm:$0xff]  }
 0x11f   : > { %2566 = vmatpush1.bf16.msra.mxu0 %v3966_v9 }
 0x120   : > { %2607 = vmatpush1.bf16.msra.mxu1 %v3969_v10  ;;  %2567 = vmatprep.subr.bf16.mxu0 %v3974_v13 }
 0x121   : > { %2608 = vmatprep.subr.bf16.mxu1 %v3977_v58 }
 0x123   : > { %2568 = vmatpush1.bf16.msra.mxu0 %v3972_v45 }
 0x124   : > { %2609 = vmatpush1.bf16.msra.mxu1 %v3975_v14  ;;  %2569 = vmatprep.subr.bf16.mxu0 %v3980_v15 }
 0x125   : > { %2610 = vmatprep.subr.bf16.mxu1 %v3983_v16 }
 0x127   : > { %2570 = vmatpush1.bf16.msra.mxu0 %v3978_v19 }
 0x128   : > { %2611 = vmatpush1.bf16.msra.mxu1 %v3981_v20  ;;  %2571 = vmatprep.subr.bf16.mxu0 %v3986_v21 }
 0x129   : > { %2612 = vmatprep.subr.bf16.mxu1 %v3989_v22 }
 0x12b   : > { %2572 = vmatpush1.bf16.msra.mxu0 %v3984_v23 }
 0x12c   : > { %2613 = vmatpush1.bf16.msra.mxu1 %v3987_v24  ;;  %2573 = vmatprep.subr.bf16.mxu0 %v3992_v25 }
 0x12d   : > { %2614 = vmatprep.subr.bf16.mxu1 %v3995_v26 }
 0x12f   : > { %2574 = vmatpush1.bf16.msra.mxu0 %v3990_v27 }
 0x130   : > { %2615 = vmatpush1.bf16.msra.mxu1 %v3993_v28  ;;  %2575 = vmatprep.subr.bf16.mxu0 %v3998_v29 }
 0x131   : > { %2616 = vmatprep.subr.bf16.mxu1 %v4001_v30 }
 0x133   : > { %2576 = vmatpush1.bf16.msra.mxu0 %v3996_v31 }
 0x134   : > { %2617 = vmatpush1.bf16.msra.mxu1 %v3999_v32  ;;  %2577 = vmatprep.subr.bf16.mxu0 %v4004_v33 }
 0x135   : > { %2618 = vmatprep.subr.bf16.mxu1 %v4007_v36 }
 0x137   : > { %2578 = vmatpush2.bf16.msra.mxu0 %v4002_v37 }
 0x138   : > { %2619 = vmatpush2.bf16.msra.mxu1 %v4005_v38  ;;  %2579 = vmatprep.subr.bf16.mxu0 %v4010_v40 }
 0x139   : > { %2620 = vmatprep.subr.bf16.mxu1 %v4013_v41 }
 0x13b   : > { %2580 = vmatpush2.bf16.msra.mxu0 %v4008_v42 }
 0x13c   : > { %2621 = vmatpush2.bf16.msra.mxu1 %v4011_v43  ;;  %2581 = vmatprep.subr.bf16.mxu0 %v4016_v46 }
 0x13d   : > { %2622 = vmatprep.subr.bf16.mxu1 %v4019_v47 }
 0x13f   : > { %2582 = vmatpush2.bf16.msra.mxu0 %v4014_v48 }
 0x140   : > { %2623 = vmatpush2.bf16.msra.mxu1 %v4017_v49  ;;  %2583 = vmatprep.subr.bf16.mxu0 %v4022_v52 }
 0x141   : > { %2624 = vmatprep.subr.bf16.mxu1 %v4025_v53 }
 0x143   : > { %2584 = vmatpush2.bf16.msra.mxu0 %v4020_v63 }
 0x144   : > { %2625 = vmatpush2.bf16.msra.mxu1 %v4023_v55  ;;  %2585 = vmatprep.subr.bf16.mxu0 %v4028_v56 }
 0x145   : > { %2626 = vmatprep.subr.bf16.mxu1 %v4031_v39 }
 0x147   : > { %2586 = vmatpush2.bf16.msra.mxu0 %v4026_v57 }
 0x148   : > { %2627 = vmatpush2.bf16.msra.mxu1 %v4029_v59  ;;  %2587 = vmatprep.subr.bf16.mxu0 %v4034_v60  ;;  %v244_v60 = vld [vmem:[#allocation2] sm:$0xff] }
 0x149   : > { %2628 = vmatprep.subr.bf16.mxu1 %v4037_v17 }
 0x14b   : > { %2588 = vmatpush2.bf16.msra.mxu0 %v4032_v61 }
 0x14c   : > { %2629 = vmatpush2.bf16.msra.mxu1 %v4035_v62  ;;  %2589 = vmatprep.subr.bf16.mxu0 %v4040_v0 }
 0x14d   : > { %2630 = vmatprep.subr.bf16.mxu1 %v4043_v4 }
 0x14f   : > { %2590 = vmatpush2.bf16.msra.mxu0 %v4038_v1 }
 0x150   : > { %2631 = vmatpush2.bf16.msra.mxu1 %v4041_v2  ;;  %2591 = vmatprep.subr.bf16.mxu0 %v4046_v3 }
 0x151   : > { %2632 = vmatprep.subr.bf16.mxu1 %v4049_v5 }
 0x153   : > { %2592 = vmatpush2.bf16.msra.mxu0 %v4044_v6 }
 0x154   : > { %2633 = vmatpush2.bf16.msra.mxu1 %v4047_v7 }
 0x156   : > { %v2349_v18 = vpop.f32.mrf.mxu0  ;;  %2594 = vmatmul.mubr.bf16.vlgmr.msra.gmra.mxu0 %v4348_v35 }
 0x157   : > { %v2390_v34 = vpop.f32.mrf.mxu1  ;;  %2635 = vmatmul.mubr.bf16.vlgmr.msra.gmra.mxu1 %v4426_v51  ;;  %v2350_v9 = vadd.f32 %v2349_v18, %v4502_v54 }
 0x158   : > { %v2351_v10 = vpop.f32.mrf.mxu0 }
 0x159   : > { %v2392_v11 = vpop.f32.mrf.mxu1  ;;  %v2391_v12 = vadd.f32 %v2390_v34, %v2350_v9  ;;  %v2352_v13 = vadd.f32 %v2351_v10, %v4508_v8 }
 0x15a   : > { %v2353_v58 = vpop.f32.mrf.mxu0 }
 0x15b   : > { %v2394_v45 = vpop.f32.mrf.mxu1  ;;  %v2393_v14 = vadd.f32 %v2392_v11, %v2352_v13 }
 0x15c   : > { %v2354_v15 = vpop.f32.mrf.mxu0 }
 0x15d   : > { %v2395_v16 = vpop.f32.mrf.mxu1 }
 0x196   : > { %v2431_v19 = vpop.f32.mrf.mxu0 }
 0x197   : > { %v2472_v20 = vpop.f32.mrf.mxu1  ;;  %v2432_v21 = vadd.f32 %v2431_v19, %v2391_v12 }
 0x198   : > { %v2433_v22 = vpop.f32.mrf.mxu0 }
 0x199   : > { %v2474_v23 = vpop.f32.mrf.mxu1  ;;  %v2434_v35 = vadd.f32 %v2433_v22, %v2393_v14 }
 0x19a   : > { %v2435_v24 = vpop.f32.mrf.mxu0 }
 0x19b   : > { %v2476_v51 = vpop.f32.mrf.mxu1  ;;  %v2647_v25 = vcombine.low %v2432_v21, %v2434_v35 }
 0x19c   : > { %v2436_v54 = vpop.f32.mrf.mxu0 }
 0x19d   : > { %v2477_v26 = vpop.f32.mrf.mxu1  ;;  %v2655_v57 = vrot.slane %v2647_v25, %v4221_v50 }
 0x1d6   : > { %v2513_v27 = vpop.f32.mrf.mxu0 }
 0x1d7   : > { %v2554_v28 = vpop.f32.mrf.mxu1  ;;  %v2514_v29 = vadd.f32 %v2513_v27, %v2472_v20 }
 0x1d8   : > { %v2515_v8 = vpop.f32.mrf.mxu0 }
 0x1d9   : > { %v2556_v30 = vpop.f32.mrf.mxu1  ;;  %v2555_v31 = vadd.f32 %v2554_v28, %v2514_v29  ;;  %v2516_v38 = vadd.f32 %v2515_v8, %v2474_v23 }
 0x1da   : > { %v2517_v32 = vpop.f32.mrf.mxu0 }
 0x1db   : > { %v2558_v33 = vpop.f32.mrf.mxu1  ;;  %v2557_v42 = vadd.f32 %v2556_v30, %v2516_v38 }
 0x1dc   : > { %v2518_v36 = vpop.f32.mrf.mxu0 }
 0x1dd   : > { %v2559_v37 = vpop.f32.mrf.mxu1 }
 0x216   : > { %v2595_v40 = vpop.f32.mrf.mxu0 }
 0x217   : > { %v2636_v41 = vpop.f32.mrf.mxu1  ;;  %v2596_v43 = vadd.f32 %v2595_v40, %v2555_v31 }
 0x218   : > { %v2597_v46 = vpop.f32.mrf.mxu0 }
 0x219   : > { %v2638_v47 = vpop.f32.mrf.mxu1  ;;  %v2598_v48 = vadd.f32 %v2597_v46, %v2557_v42  ;;  %v2637_v53 = vadd.f32 %v2636_v41, %v2596_v43 }
 0x21a   : > { %v2599_v49 = vpop.f32.mrf.mxu0 }
 0x21b   : > { %v2640_v52 = vpop.f32.mrf.mxu1  ;;  %v2639_v63 = vadd.f32 %v2638_v47, %v2598_v48 }
 0x21c   : > { %v2600_v55 = vpop.f32.mrf.mxu0 }
 0x21d   : > { %v2641_v56 = vpop.f32.mrf.mxu1  ;;  %v2648_v39 = vcombine.low %v2637_v53, %v2639_v63 }
 0x21f   : > { %v2662_v59 = vrot.slane %v2648_v39, %v4221_v50 }
 0x221   : > { %v2663_v17 = vcombine.low %v2655_v57, %v2662_v59  ;;  %2670 = sbr.rel (%p3468_p6) target bundleno = 786 (0x312), region = 48 }
 0x223   : > { %v2665_v61 = vadd.f32 %v2663_v17, %v244_v60 }
 0x225   : > { %2666 = vst [vmem:[#allocation2] sm:$0xff] %v2665_v61 }
 0x226   : > { %v4050_v62 = vld [vmem:[%s4701_s3 + $0x78] sm:$0xff]   ;;  %v4054_v2 = vld [vmem:[%s4701_s3 + $0x70] sm:$0xff]   ;;  %v4058_v7 = vld [vmem:[%s4701_s3 + $0x68] sm:$0xff]   ;;  %v2676_v24 = vsub.s32 0, %v4213_v44  ;;  %v2680_v25 = vsub.s32 1, %v4213_v44  ;;  %v2684_v26 = vsub.s32 2, %v4213_v44 }
 0x227   : > { %v4051_v0 = vld [vmem:[%s4701_s3 + $0xf8] sm:$0xff]   ;;  %3507 = vmatprep.subr.bf16.mxu0 %v4050_v62  ;;  %v4055_v3 = vld [vmem:[%s4701_s3 + $0xf0] sm:$0xff]   ;;  %v4059_v18 = vld [vmem:[%s4701_s3 + $0xe8] sm:$0xff]   ;;  %v2688_v28 = vsub.s32 3, %v4213_v44  ;;  %vm3079_vm0 = vcmask 140288  }
 0x228   : > { %v4052_v4 = vld [vmem:[%s4701_s3 + $0x38] sm:$0xff]   ;;  %3529 = vmatprep.subr.bf16.mxu1 %v4051_v0  ;;  %v4056_v5 = vld [vmem:[%s4701_s3 + $0x30] sm:$0xff]   ;;  %v4060_v34 = vld [vmem:[%s4701_s3 + $0x28] sm:$0xff]  }
 0x229   : > { %v4053_v1 = vld [vmem:[%s4701_s3 + $0xb8] sm:$0xff]   ;;  %3508 = vmatpush3.bf16.msra.mxu0 %v4052_v4  ;;  %v4057_v6 = vld [vmem:[%s4701_s3 + $0xb0] sm:$0xff]   ;;  %v4061_v9 = vld [vmem:[%s4701_s3 + $0xa8] sm:$0xff]  }
 0x22a   : > { %3530 = vmatpush3.bf16.msra.mxu1 %v4053_v1  ;;  %3509 = vmatprep.subr.bf16.mxu0 %v4054_v2  ;;  %v4062_v10 = vld [vmem:[%s4701_s3 + $0x60] sm:$0xff]   ;;  %v4066_v58 = vld [vmem:[%s4701_s3 + $0x58] sm:$0xff]   ;;  %v4070_v16 = vld [vmem:[%s4701_s3 + $0x50] sm:$0xff]  }
 0x22b   : > { %3531 = vmatprep.subr.bf16.mxu1 %v4055_v3  ;;  %v4063_v11 = vld [vmem:[%s4701_s3 + $0xe0] sm:$0xff]   ;;  %v4067_v45 = vld [vmem:[%s4701_s3 + $0xd8] sm:$0xff]   ;;  %v4071_v19 = vld [vmem:[%s4701_s3 + $0xd0] sm:$0xff]  }
 0x22c   : > { %v4064_v12 = vld [vmem:[%s4701_s3 + $0x20] sm:$0xff]   ;;  %v4068_v14 = vld [vmem:[%s4701_s3 + $0x18] sm:$0xff]   ;;  %v4072_v20 = vld [vmem:[%s4701_s3 + $0x10] sm:$0xff]  }
 0x22d   : > { %3510 = vmatpush3.bf16.msra.mxu0 %v4056_v5  ;;  %v4065_v13 = vld [vmem:[%s4701_s3 + $0xa0] sm:$0xff]   ;;  %v4069_v15 = vld [vmem:[%s4701_s3 + $0x98] sm:$0xff]   ;;  %v4073_v21 = vld [vmem:[%s4701_s3 + $0x90] sm:$0xff]  }
 0x22e   : > { %3532 = vmatpush3.bf16.msra.mxu1 %v4057_v6  ;;  %3511 = vmatprep.subr.bf16.mxu0 %v4058_v7  ;;  %v4074_v22 = vld [vmem:[%s4701_s3 + $0x48] sm:$0xff]   ;;  %v4078_v54 = vld [vmem:[%s4701_s3 + $0x40] sm:$0xff]  }
 0x22f   : > { %3533 = vmatprep.subr.bf16.mxu1 %v4059_v18  ;;  %v4075_v23 = vld [vmem:[%s4701_s3 + $0xc8] sm:$0xff]   ;;  %v4079_v27 = vld [vmem:[%s4701_s3 + $0xc0] sm:$0xff]  }
 0x230   : > { %v4076_v35 = vld [vmem:[%s4701_s3 + $0x8] sm:$0xff]   ;;  %v4080_v29 = vld [vmem:[%s4701_s3] sm:$0xff]  }
 0x231   : > { %3512 = vmatpush3.bf16.msra.mxu0 %v4060_v34  ;;  %v4077_v51 = vld [vmem:[%s4701_s3 + $0x88] sm:$0xff]   ;;  %v4081_v8 = vld [vmem:[%s4701_s3 + $0x80] sm:$0xff]  }
 0x232   : > { %3534 = vmatpush3.bf16.msra.mxu1 %v4061_v9  ;;  %3513 = vmatprep.subr.bf16.mxu0 %v4062_v10  ;;  %v2672_v30 = vld [vmem:[%s4700_s2] sm:$0xf] }
 0x233   : > { %3535 = vmatprep.subr.bf16.mxu1 %v4063_v11  ;;  %v2677_v31 = vrot.slane %v2672_v30, %v2676_v24  ;;  %v2681_v32 = vrot.slane %v2672_v30, %v2680_v25  ;;  %v2685_v33 = vrot.slane %v2672_v30, %v2684_v26  ;;  %v2689_v44 = vrot.slane %v2672_v30, %v2688_v28  ;;  %v2671_v41 = vld [vmem:[#allocation2] sm:$0xff] }
 0x234   : > { %v3469_v60 = vld [vmem:[%s4702_s4] ss:$0 sm:$0xff] }
 0x235   : > { %3514 = vmatpush3.bf16.msra.mxu0 %v4064_v12  ;;  %v2690_v36 = vcombine.low %v2677_v31, %v2681_v32  ;;  %v2691_v37 = vcombine.low %v2685_v33, %v2689_v44 }
 0x236   : > { %3536 = vmatpush3.bf16.msra.mxu1 %v4065_v13  ;;  %3515 = vmatprep.subr.bf16.mxu0 %v4066_v58 }
 0x237   : > { %3537 = vmatprep.subr.bf16.mxu1 %v4067_v45  ;;  %v2698_v38 = vrot.slane %v2690_v36, %v4221_v50  ;;  %v2705_v40 = vrot.slane %v2691_v37, %v4221_v50 }
 0x239   : > { %3516 = vmatpush3.bf16.msra.mxu0 %v4068_v14  ;;  %v2706_v42 = vcombine.low %v2698_v38, %v2705_v40 }
 0x23a   : > { %3538 = vmatpush3.bf16.msra.mxu1 %v4069_v15  ;;  %3517 = vmatprep.subr.bf16.mxu0 %v4070_v16 }
 0x23b   : > { %3539 = vmatprep.subr.bf16.mxu1 %v4071_v19  ;;  %v2708_v43 = vadd.f32 %v2706_v42, %v2671_v41 }
 0x23d   : > { %3518 = vmatpush3.bf16.msra.mxu0 %v4072_v20  ;;  %v2709_v46 = vmax.f32 %v2708_v43, 0.0 }
 0x23e   : > { %3540 = vmatpush3.bf16.msra.mxu1 %v4073_v21  ;;  %3519 = vmatprep.subr.bf16.mxu0 %v4074_v22 }
 0x23f   : > { %3541 = vmatprep.subr.bf16.mxu1 %v4075_v23  ;;  %v2718_v47 = vrot.slane %v2709_v46, %v4221_v50  ;;  %v2711_v48 = vcombine.high %v2709_v46, %v2709_v46 }
 0x241   : > { %3520 = vmatpush3.bf16.msra.mxu0 %v4076_v35  ;;  %v2726_v49 = vcombine.high %v2718_v47, %v2718_v47  ;;  %v2725_v52 = vrot.slane %v2711_v48, %v4221_v50  ;;  %v2732_v53 = vpack.c.bf16 %v2718_v47, %v2718_v47 }
 0x242   : > { %3542 = vmatpush3.bf16.msra.mxu1 %v4077_v51  ;;  %3521 = vmatprep.subr.bf16.mxu0 %v4078_v54 }
 0x243   : > { %3543 = vmatprep.subr.bf16.mxu1 %v4079_v27  ;;  %v2733_v63 = vpack.c.bf16 %v2726_v49, %v2726_v49  ;;  %v2727_v55 = vcombine.high %v2725_v52, %v2725_v52  ;;  %v2734_v56 = vpack.c.bf16 %v2725_v52, %v2725_v52 }
 0x245   : > { %3522 = vmatpush3.bf16.msra.mxu0 %v4080_v29  ;;  %3031 = vmatprep.mubr.bf16.mxu0 %v2733_v63  ;;  %v2735_v39 = vpack.c.bf16 %v2727_v55, %v2727_v55 }
 0x246   : > { %3544 = vmatpush3.bf16.msra.mxu1 %v4081_v8 }
 0x247   : > { %3071 = vmatprep.mubr.bf16.mxu1 %v2735_v39 }
 0x248   : > { %3032 = vmatmul.mubr.bf16.vlgmr.msra.gmra.mxu0 %v2732_v53 }
 0x249   : > { %3072 = vmatmul.mubr.bf16.vlgmr.msra.gmra.mxu1 %v2734_v56 }
 0x308   : > { %v3523_v57 = vpop.f32.mrf.mxu0 }
 0x309   : > { %v3545_v59 = vpop.f32.mrf.mxu1 }
 0x30a   : > { %v3524_v17 = vpop.f32.mrf.mxu0 }
 0x30b   : > { %v3525_v61 = vadd.f32 %v3524_v17, %v3523_v57  ;;  %v3546_v62 = vpop.f32.mrf.mxu1 }
 0x30c   : > { %v3526_v0 = vpop.f32.mrf.mxu0  ;;  %v3547_v4 = vadd.f32 %v3546_v62, %v3545_v59 }
 0x30d   : > { %v3034_v50 = vadd.f32 %v3525_v61, %v3469_v60  ;;  %v3548_v1 = vpop.f32.mrf.mxu1 }
 0x30e   : > { %v3527_v2 = vpop.f32.mrf.mxu0 }
 0x30f   : > { %v3074_v3 = vadd.f32 %v3547_v4, %v3034_v50  ;;  %v3549_v5 = vpop.f32.mrf.mxu1 }
 0x311   : > { %3080 = vst.msk [vmem:[#allocation3] sm:$0x3] %vm3079_vm0, %v3074_v3 }
 0x312 PF: > { %p3555_p7 = scmp.eq.s32.totalorder %s4157_s19, 4  ;;  %s4120_s29 = smov [#allocation3]  }
 0x313   : > { %s3088_s30 = sshll.u32 %s4120_s29, 4  ;;  %s3089_s30 = int_to_ptr.vmem [resolvable:$true] %s3088_s30 }
 0x314   : > { %s4082_s6 = scalar_lea.vmem %s3089_s30, 32  ;;  %p4089_p11 = scmp.lt.s32.totalorder %s3089_s30, %s3089_s30 }
 0x315   : > { %p4083_p8 = scmp.ne.s32.totalorder %s3089_s30, %s4082_s6  ;;  %p4090_p12 = scmp.lt.s32.totalorder %s4082_s6, %s4082_s6 }
 0x317   : > { %p4084_p9 = pnand %p4083_p8, %p3555_p7  ;;  %p4091_p13 = por %p4090_p12, %p4089_p11 }
 0x319   : > { %p4085_p10 = pneg %p4084_p9 }
 0x31b   : > { %p4092_p0 = pnand %p4091_p13, %p4085_p10 }
 0x31d   : > { %4095 = shalt.err (!%p4092_p0)
}
 0x31e   : > { %3552 = dma.vmem_to_hbm [thread:$0]  (%p3555_p7), %s3089_s30, 32, %s4703_s5, [#allocation4]  }
 0x31f   : > { %4111 = dma.done.wait (%p3555_p7), [#allocation4], 32  }
 0x320   : > { %4113 = vsyncadd (%p3555_p7), [#allocation4], 4294967264 }
 0x321 PF: > { %s16_s18 = sadd.s32 1, %s4116_s18  }
 0x322   : > { %p13_p1 = scmp.ge.s32.totalorder %s16_s18, 7  }
 0x324   :  { %15 = sbr.rel (!%p13_p1) target bundleno = 1 (0x1), region = 78 }
 0x329   :  { %3101 = vsyncpa [#allocation4], 1 }
 0x32a   :  { %3103 = vsyncpa [#allocation4 + $0x1], 1 }

</bundles_post_ra>
